<compile_context>
chip_gen: v7x
topology: tpu7x:2x2x1
jax: 0.10.0
libtpu: 0.0.40
codegen_flags: <defaults>
</compile_context>

<pallas_src>
import functools
import math

import jax
import jax.numpy as jnp
from jax.experimental import pallas as pl
from jax.experimental.pallas import tpu as pltpu

LAYERS = [1, 1, 1, 1]        # BasicBlocks per stage (ResNet-18 uses [2, 2, 2, 2])
NUM_CLASSES = 2
BN_EPS = 1e-5
VMEM_LIMIT = 32 * 1024 * 1024   # explicit scoped-VMEM cap; safe on v5e / v6e / v7x


def _round_up(n, m):
    return ((n + m - 1) // m) * m


def _pick_tile_m(M):
    """M-axis matmul tile. A single block (<=512 rows) enables the fused BN epilogue;
    otherwise pick the largest 128-multiple tile with <= ~25% padding waste."""
    Mp = _round_up(M, 128)
    if Mp <= 512:
        return Mp
    for t in (1024, 512, 256):
        if _round_up(Mp, t) - Mp <= Mp // 4:
            return t
    return 128


def _pick_tile_n(Np):
    """Split N when possible so v7x's two TensorCores both get work on the
    single-M-block matmuls (harmless on single-TC v5e/v6e)."""
    for t in (256, 128):
        if Np > t and Np % t == 0:
            return t
    return Np


def _pick_rows_ew(Mp):
    """Row tile for the HBM-bound elementwise kernels (Mp is a multiple of 128)."""
    for r in (1024, 512, 256, 128):
        if Mp % r == 0:
            return r
    return 128


# --------------------------------------------------------------------------- #
# Matmul kernels (full-K single shot, no scratch, bf16 outputs)
# --------------------------------------------------------------------------- #
def _mm_stats_kernel(a_ref, b_ref, o_ref, s_ref, q_ref):
    # One MXU dot over the whole (padded) K; f32 accumulation, bf16 store.
    acc = jnp.dot(a_ref[...], b_ref[...], preferred_element_type=jnp.float32)
    o_ref[...] = acc.astype(o_ref.dtype)
    n = acc.shape[1]
    # Per-M-block column sum / sum of squares for BatchNorm batch statistics
    # (broadcast to 8 sublane rows so the output block is (8, tn)).
    s_ref[...] = jnp.broadcast_to(jnp.sum(acc, axis=0, keepdims=True), (8, n))
    q_ref[...] = jnp.broadcast_to(jnp.sum(acc * acc, axis=0, keepdims=True), (8, n))


def _mm_bn_kernel(a_ref, b_ref, g_ref, be_ref, *rest, m_real, relu, has_res):
    # Single-M-block case: batch stats are complete inside this grid step, so BN
    # (+ residual + ReLU) is applied right in the matmul epilogue.
    if has_res:
        r_ref, o_ref = rest
    else:
        r_ref = None
        (o_ref,) = rest
    acc = jnp.dot(a_ref[...], b_ref[...], preferred_element_type=jnp.float32)
    inv_m = 1.0 / float(m_real)
    s = jnp.sum(acc, axis=0, keepdims=True)
    q = jnp.sum(acc * acc, axis=0, keepdims=True)
    mean = s * inv_m
    var = jnp.maximum(q * inv_m - mean * mean, 0.0)   # biased batch stats (train mode)
    scale = g_ref[...] * jax.lax.rsqrt(var + BN_EPS)
    bias = be_ref[...] - mean * scale
    y = acc * scale + bias
    if has_res:
        y = y + r_ref[...].astype(jnp.float32)
    if relu:
        y = jnp.maximum(y, 0.0)
    o_ref[...] = y.astype(o_ref.dtype)


def _matmul_with_stats(a_p, b, tm, tn):
    """a_p:(Mp,Kp) bf16, b:(Kp,Np) bf16. Returns bf16 product + per-block column
    sums / sums-of-squares from the f32 accumulator."""
    Mp, Kp = a_p.shape
    _, Np = b.shape
    n_i, n_j = Mp // tm, Np // tn
    return pl.pallas_call(
        _mm_stats_kernel,
        out_shape=(jax.ShapeDtypeStruct((Mp, Np), jnp.bfloat16),
                   jax.ShapeDtypeStruct((n_i * 8, Np), jnp.float32),
                   jax.ShapeDtypeStruct((n_i * 8, Np), jnp.float32)),
        grid=(n_i, n_j),
        in_specs=[pl.BlockSpec((tm, Kp), lambda i, j: (i, 0)),
                  pl.BlockSpec((Kp, tn), lambda i, j: (0, j))],
        out_specs=(pl.BlockSpec((tm, tn), lambda i, j: (i, j)),
                   pl.BlockSpec((8, tn), lambda i, j: (i, j)),
                   pl.BlockSpec((8, tn), lambda i, j: (i, j))),
        compiler_params=pltpu.CompilerParams(
            dimension_semantics=("parallel", "parallel"),
            vmem_limit_bytes=VMEM_LIMIT),
    )(a_p, b)


def _matmul_bn_fused(a_p, b, gamma_p, beta_p, res_p, m_real, relu, tm, tn):
    """Single-M-block matmul with BN (+residual) (+ReLU) fused in the epilogue."""
    Mp, Kp = a_p.shape
    _, Np = b.shape
    n_j = Np // tn
    kernel = functools.partial(_mm_bn_kernel, m_real=m_real, relu=relu,
                               has_res=res_p is not None)
    args = [a_p, b, gamma_p, beta_p]
    in_specs = [pl.BlockSpec((tm, Kp), lambda j: (0, 0)),
                pl.BlockSpec((Kp, tn), lambda j: (0, j)),
                pl.BlockSpec((1, tn), lambda j: (0, j)),
                pl.BlockSpec((1, tn), lambda j: (0, j))]
    if res_p is not None:
        args.append(res_p)
        in_specs.append(pl.BlockSpec((tm, tn), lambda j: (0, j)))
    return pl.pallas_call(
        kernel,
        out_shape=jax.ShapeDtypeStruct((Mp, Np), jnp.bfloat16),
        grid=(n_j,),
        in_specs=in_specs,
        out_specs=pl.BlockSpec((tm, tn), lambda j: (0, j)),
        compiler_params=pltpu.CompilerParams(
            dimension_semantics=("parallel",),
            vmem_limit_bytes=VMEM_LIMIT),
    )(*args)


# --------------------------------------------------------------------------- #
# Fused scale/bias (+ residual) (+ ReLU) elementwise kernel (bf16 in / bf16 out)
# --------------------------------------------------------------------------- #
def _bn_act_kernel(x_ref, s_ref, b_ref, o_ref, *, relu):
    y = x_ref[...].astype(jnp.float32) * s_ref[...] + b_ref[...]
    if relu:
        y = jnp.maximum(y, 0.0)
    o_ref[...] = y.astype(o_ref.dtype)


def _bn_add_relu_kernel(x_ref, r_ref, s_ref, b_ref, o_ref):
    y = (x_ref[...].astype(jnp.float32) * s_ref[...] + b_ref[...]
         + r_ref[...].astype(jnp.float32))
    o_ref[...] = jnp.maximum(y, 0.0).astype(o_ref.dtype)


def _apply_bn_act(x_pad, scale, bias, residual_pad, relu):
    """x_pad: (Mp, Np) bf16 straight from the matmul; scale/bias: (1, Np) f32."""
    Mp, Np = x_pad.shape
    rows = _pick_rows_ew(Mp)
    row_spec = pl.BlockSpec((rows, Np), lambda i: (i, 0))
    vec_spec = pl.BlockSpec((1, Np), lambda i: (0, 0))
    if residual_pad is None:
        kernel = functools.partial(_bn_act_kernel, relu=relu)
        args = (x_pad, scale, bias)
        in_specs = [row_spec, vec_spec, vec_spec]
    else:
        kernel = _bn_add_relu_kernel
        args = (x_pad, residual_pad, scale, bias)
        in_specs = [row_spec, row_spec, vec_spec, vec_spec]
    return pl.pallas_call(
        kernel,
        out_shape=jax.ShapeDtypeStruct((Mp, Np), jnp.bfloat16),
        grid=(Mp // rows,),
        in_specs=in_specs,
        out_specs=row_spec,
        compiler_params=pltpu.CompilerParams(
            dimension_semantics=("parallel",),
            vmem_limit_bytes=VMEM_LIMIT),
    )(*args)


# --------------------------------------------------------------------------- #
# Conv + BatchNorm (+ residual) (+ ReLU), one jitted unit per conv config
# --------------------------------------------------------------------------- #
@functools.partial(jax.jit, static_argnames=("kh", "kw", "stride", "pad", "relu"))
def _conv_bn_jit(x_nhwc, w_mat, gamma, beta, residual, *, kh, kw, stride, pad, relu):
    N, H, W, Cin = x_nhwc.shape
    OH = (H + 2 * pad - kh) // stride + 1
    OW = (W + 2 * pad - kw) // stride + 1
    M = N * OH * OW
    cout = gamma.shape[0]
    Kp, Np = w_mat.shape

    x_bf = x_nhwc.astype(jnp.bfloat16)           # bf16 MXU operands, f32 accumulation
    if kh == 1 and kw == 1:                      # 1x1 conv: no im2col needed
        patches = x_bf[:, ::stride, ::stride, :].reshape(M, Cin)
    else:
        xp = jnp.pad(x_bf, ((0, 0), (pad, pad), (pad, pad), (0, 0)))
        cols = []
        for ky in range(kh):
            for kx in range(kw):
                cols.append(xp[:, ky:ky + stride * (OH - 1) + 1:stride,
                                kx:kx + stride * (OW - 1) + 1:stride, :])
        patches = jnp.stack(cols, axis=3).reshape(M, kh * kw * Cin)
    # TODO(synk): lower 3x3/7x7 convs as implicit GEMM (shifted-window loads inside
    # the matmul kernel via memory_space=pl.ANY + manual DMA) so the im2col patch
    # tensor is never materialized in HBM.

    K = patches.shape[1]
    tm = _pick_tile_m(M)
    Mp = _round_up(M, tm)
    tn = _pick_tile_n(Np)
    a_p = patches
    if (Mp, Kp) != (M, K):
        a_p = jnp.pad(patches, ((0, Mp - M), (0, Kp - K)))

    gamma_p = jnp.pad(gamma.reshape(1, cout), ((0, 0), (0, Np - cout)))
    beta_p = jnp.pad(beta.reshape(1, cout), ((0, 0), (0, Np - cout)))
    res_p = None
    if residual is not None:
        res_p = jnp.pad(residual.astype(jnp.bfloat16).reshape(M, cout),
                        ((0, Mp - M), (0, Np - cout)))

    if Mp == tm:
        # layer3 / layer4: single M block -> BN fused into the matmul epilogue.
        y = _matmul_bn_fused(a_p, w_mat, gamma_p, beta_p, res_p, M, relu, tm, tn)
    else:
        y_raw, s_arr, q_arr = _matmul_with_stats(a_p, w_mat, tm, tn)
        s = jnp.sum(s_arr[::8, :], axis=0)
        q = jnp.sum(q_arr[::8, :], axis=0)
        mean = s / M
        var = jnp.maximum(q / M - mean * mean, 0.0)   # biased batch stats (train mode)
        scale = gamma_p * jax.lax.rsqrt(var.reshape(1, Np) + BN_EPS)
        bias = beta_p - mean.reshape(1, Np) * scale
        y = _apply_bn_act(y_raw, scale, bias, res_p, relu)
    return y[:M, :cout].reshape(N, OH, OW, cout)


def conv_bn(x_nhwc, cp, relu=True, residual=None):
    return _conv_bn_jit(x_nhwc, cp["w"], cp["gamma"], cp["beta"], residual,
                        kh=cp["kh"], kw=cp["kw"], stride=cp["stride"],
                        pad=cp["pad"], relu=relu)


# --------------------------------------------------------------------------- #
# MaxPool 3x3 / stride 2 / pad 1 — windows read in-kernel from a pair-split view
# --------------------------------------------------------------------------- #
def _maxpool_kernel(x_ref, o_ref):
    # x_ref: (1, 2, 2, P, Q, C) = [n, h-slot, w-slot, h-pair, w-pair, c]
    # output (oh, ow) takes padded rows {2oh, 2oh+1, 2oh+2} -> slots/pairs below.
    oh, ow = o_ref.shape[1], o_ref.shape[2]
    m = None
    for hs, dh in ((0, 0), (1, 0), (0, 1)):
        for ws, dw in ((0, 0), (1, 0), (0, 1)):
            v = x_ref[0, hs, ws, dh:dh + oh, dw:dw + ow, :]
            m = v if m is None else jnp.maximum(m, v)
    o_ref[0] = m


@jax.jit
def max_pool_3x3_s2_p1(x_nhwc):
    N, H, W, C = x_nhwc.shape
    OH = (H + 2 - 3) // 2 + 1
    OW = (W + 2 - 3) // 2 + 1
    # pad with -inf (PyTorch maxpool semantics), then expose the stride-2 windows as
    # static slices by splitting H/W into (pair, slot) and hoisting the slots to
    # leading dims (the reshape is free; the transpose is one small XLA copy).
    xp = jnp.pad(x_nhwc, ((0, 0), (1, 1), (1, 1), (0, 0)),
                 constant_values=-jnp.inf)
    P, Q = OH + 1, OW + 1
    xr = xp.reshape(N, P, 2, Q, 2, C).transpose(0, 2, 4, 1, 3, 5)   # (N,2,2,P,Q,C)
    return pl.pallas_call(
        _maxpool_kernel,
        out_shape=jax.ShapeDtypeStruct((N, OH, OW, C), x_nhwc.dtype),
        grid=(N,),
        in_specs=[pl.BlockSpec((1, 2, 2, P, Q, C),
                               lambda n: (n, 0, 0, 0, 0, 0))],
        out_specs=pl.BlockSpec((1, OH, OW, C), lambda n: (n, 0, 0, 0)),
        compiler_params=pltpu.CompilerParams(
            dimension_semantics=("parallel",),
            vmem_limit_bytes=VMEM_LIMIT),
    )(xr)


# --------------------------------------------------------------------------- #
# Parameters (deterministic, matching the reference __init__ shapes / init).
# Conv weights pre-packed once: OIHW -> (KH*KW*Cin, Cout), padded to 128, bf16.
# --------------------------------------------------------------------------- #
def _prep_conv(key, cout, cin, kh, kw, stride, pad):
    std = math.sqrt(2.0 / (kh * kw * cout))              # normal(0, sqrt(2/n)) init
    w = std * jax.random.normal(key, (cout, cin, kh, kw), jnp.float32)
    K = kh * kw * cin
    Kp, Np = _round_up(K, 128), _round_up(cout, 128)
    w_mat = jnp.transpose(w, (2, 3, 1, 0)).reshape(K, cout)
    w_mat = jnp.pad(w_mat, ((0, Kp - K), (0, Np - cout))).astype(jnp.bfloat16)
    return {"w": w_mat,
            "gamma": jnp.ones((cout,), jnp.float32),
            "beta": jnp.zeros((cout,), jnp.float32),
            "kh": kh, "kw": kw, "stride": stride, "pad": pad}


def init_params(key):
    keys = iter(jax.random.split(key, 64))
    p = {"conv1": _prep_conv(next(keys), 64, 3, 7, 7, 2, 3)}
    stages = []
    inplanes = 64
    for planes, nblocks, stride in ((64, LAYERS[0], 1), (128, LAYERS[1], 2),
                                    (256, LAYERS[2], 2), (512, LAYERS[3], 2)):
        # TODO(synk): the reference _make_layer forces inplanes = 256*5 = 1280 before the
        # planes==512 stage, which makes the PyTorch forward shape-inconsistent for standard
        # BasicBlocks (layer3 emits 256 channels); we keep the shape-consistent value.
        blocks = []
        for bi in range(nblocks):
            s = stride if bi == 0 else 1
            blk = {"conv1": _prep_conv(next(keys), planes, inplanes, 3, 3, s, 1),
                   "conv2": _prep_conv(next(keys), planes, planes, 3, 3, 1, 1),
                   "downsample": None}
            if s != 1 or inplanes != planes:
                blk["downsample"] = _prep_conv(next(keys), planes, inplanes, 1, 1, s, 0)
            blocks.append(blk)
            inplanes = planes
        stages.append(blocks)
    p["stages"] = stages
    bound = 1.0 / math.sqrt(512.0)                        # nn.Linear default-style init
    p["fc_w"] = jax.random.uniform(next(keys), (NUM_CLASSES, 512), jnp.float32,
                                   -bound, bound)
    p["fc_b"] = jax.random.uniform(next(keys), (NUM_CLASSES,), jnp.float32,
                                   -bound, bound)
    return p


# --------------------------------------------------------------------------- #
# Forward pass
# --------------------------------------------------------------------------- #
def basic_block(x, blk):
    out = conv_bn(x, blk["conv1"], relu=True)
    if blk["downsample"] is not None:
        identity = conv_bn(x, blk["downsample"], relu=False)
    else:
        identity = x
    # out = relu(bn2(conv2(out)) + identity); residual+relu fused with BN.
    return conv_bn(out, blk["conv2"], relu=True, residual=identity)


def resnet_forward(x_nchw, params):
    x = jnp.transpose(x_nchw, (0, 2, 3, 1))               # NCHW -> NHWC
    # group1: conv7x7/s2 + BN + ReLU + maxpool3x3/s2 (all bf16 activations)
    x = conv_bn(x, params["conv1"], relu=True)
    x = max_pool_3x3_s2_p1(x)
    # layer1..layer4
    for stage in params["stages"]:
        for blk in stage:
            x = basic_block(x, blk)
    # AvgPool2d(7) on the 7x7 layer4 map == per-sample spatial mean; FC is a
    # (2,512)x(512,2) matmul -- both tiny, done in plain jnp (f32).
    pooled = jnp.mean(x.astype(jnp.float32), axis=(1, 2))
    return jnp.dot(pooled, params["fc_w"].T) + params["fc_b"]


if __name__ == "__main__":
    key = jax.random.PRNGKey(0)
    k_in, k_par = jax.random.split(key)
    # AvgPool2d(7) + the stride pattern implies a 224x224, 3-channel input.
    x = jax.random.normal(k_in, (2, 3, 224, 224), jnp.float32)
    params = init_params(k_par)
    out = resnet_forward(x, params)
    out = jax.block_until_ready(out)
    assert out.shape == (2, NUM_CLASSES), out.shape
    assert bool(jnp.all(jnp.isfinite(out)))
    print("KERNEL_OK")
</pallas_src>

<mosaic_0001>
module attributes {stable_mosaic.version = 11 : i64} {
  func.func @_mm_stats_kernel(%arg0: i32, %arg1: i32, %arg2: memref<1024x256xbf16, #tpu.memory_space<vmem>>, %arg3: memref<256x128xbf16, #tpu.memory_space<vmem>>, %arg4: memref<1024x128xbf16, #tpu.memory_space<vmem>>, %arg5: memref<8x128xf32, #tpu.memory_space<vmem>>, %arg6: memref<8x128xf32, #tpu.memory_space<vmem>>) attributes {dimension_semantics = [#tpu.dimension_semantics<parallel>, #tpu.dimension_semantics<parallel>], iteration_bounds = array<i64: 25, 1>, scalar_prefetch = 0 : i64, scratch_operands = 0 : i64, tpu.core_type = #tpu.core_type<tc>, window_params = [{transform_indices = @transform_0, window_bounds = array<i64: 1024, 256>}, {transform_indices = @transform_1, window_bounds = array<i64: 256, 128>}, {transform_indices = @transform_2, window_bounds = array<i64: 1024, 128>}, {transform_indices = @transform_3, window_bounds = array<i64: 8, 128>}, {transform_indices = @transform_4, window_bounds = array<i64: 8, 128>}]} {
    %c0 = arith.constant 0 : index
    %c0_0 = arith.constant 0 : index
    %0 = vector.load %arg2[%c0, %c0_0] : memref<1024x256xbf16, #tpu.memory_space<vmem>>, vector<1024x256xbf16>
    %c0_1 = arith.constant 0 : index
    %c0_2 = arith.constant 0 : index
    %1 = vector.load %arg3[%c0_1, %c0_2] : memref<256x128xbf16, #tpu.memory_space<vmem>>, vector<256x128xbf16>
    %cst = arith.constant dense<0.000000e+00> : vector<1024x128xf32>
    %2 = tpu.matmul %0, %1, %cst {dimension_numbers = #tpu.dot_dimension_numbers<[1], [0], [0], [1], [0, 0, 1, 1], [], []>} : vector<1024x256xbf16>, vector<256x128xbf16>, vector<1024x128xf32> -> vector<1024x128xf32>
    %3 = arith.truncf %2 : vector<1024x128xf32> to vector<1024x128xbf16>
    %c0_3 = arith.constant 0 : index
    %c0_4 = arith.constant 0 : index
    %4 = vector.load %arg4[%c0_3, %c0_4] : memref<1024x128xbf16, #tpu.memory_space<vmem>>, vector<1024x128xbf16>
    tpu.vector_store %arg4[%c0_3, %c0_4], %3 {strides = array<i32>} : memref<1024x128xbf16, #tpu.memory_space<vmem>>, vector<1024x128xbf16>,
    %cst_5 = arith.constant dense<0.000000e+00> : vector<128xf32>
    %5 = vector.multi_reduction <add>, %2, %cst_5 [0] : vector<1024x128xf32> to vector<128xf32>
    %6 = vector.shape_cast %5 : vector<128xf32> to vector<1x128xf32>
    %7 = vector.shape_cast %6 : vector<1x128xf32> to vector<1x128xf32>
    %8 = vector.broadcast %7 : vector<1x128xf32> to vector<8x128xf32>
    %c0_6 = arith.constant 0 : index
    %c0_7 = arith.constant 0 : index
    %9 = vector.load %arg5[%c0_6, %c0_7] : memref<8x128xf32, #tpu.memory_space<vmem>>, vector<8x128xf32>
    tpu.vector_store %arg5[%c0_6, %c0_7], %8 {strides = array<i32>} : memref<8x128xf32, #tpu.memory_space<vmem>>, vector<8x128xf32>,
    %10 = arith.mulf %2, %2 : vector<1024x128xf32>
    %cst_8 = arith.constant dense<0.000000e+00> : vector<128xf32>
    %11 = vector.multi_reduction <add>, %10, %cst_8 [0] : vector<1024x128xf32> to vector<128xf32>
    %12 = vector.shape_cast %11 : vector<128xf32> to vector<1x128xf32>
    %13 = vector.shape_cast %12 : vector<1x128xf32> to vector<1x128xf32>
    %14 = vector.broadcast %13 : vector<1x128xf32> to vector<8x128xf32>
    %c0_9 = arith.constant 0 : index
    %c0_10 = arith.constant 0 : index
    %15 = vector.load %arg6[%c0_9, %c0_10] : memref<8x128xf32, #tpu.memory_space<vmem>>, vector<8x128xf32>
    tpu.vector_store %arg6[%c0_9, %c0_10], %14 {strides = array<i32>} : memref<8x128xf32, #tpu.memory_space<vmem>>, vector<8x128xf32>,
    return
  }
  func.func @transform_0(%arg0: i32, %arg1: i32) -> (i32, i32) {
    %c0_i32 = arith.constant 0 : i32
    %c0_i32_0 = arith.constant 0 : i32
    return %arg0, %c0_i32 : i32, i32
  }
  func.func @transform_1(%arg0: i32, %arg1: i32) -> (i32, i32) {
    %c0_i32 = arith.constant 0 : i32
    %c0_i32_0 = arith.constant 0 : i32
    return %c0_i32, %arg1 : i32, i32
  }
  func.func @transform_2(%arg0: i32, %arg1: i32) -> (i32, i32) {
    %c0_i32 = arith.constant 0 : i32
    return %arg0, %arg1 : i32, i32
  }
  func.func @transform_3(%arg0: i32, %arg1: i32) -> (i32, i32) {
    %c0_i32 = arith.constant 0 : i32
    return %arg0, %arg1 : i32, i32
  }
  func.func @transform_4(%arg0: i32, %arg1: i32) -> (i32, i32) {
    %c0_i32 = arith.constant 0 : i32
    return %arg0, %arg1 : i32, i32
  }
}

module attributes {stable_mosaic.version = 11 : i64} {
  func.func @_bn_act_kernel(%arg0: i32, %arg1: memref<1024x128xbf16, #tpu.memory_space<vmem>>, %arg2: memref<1x128xf32, #tpu.memory_space<vmem>>, %arg3: memref<1x128xf32, #tpu.memory_space<vmem>>, %arg4: memref<1024x128xbf16, #tpu.memory_space<vmem>>) attributes {dimension_semantics = [#tpu.dimension_semantics<parallel>], iteration_bounds = array<i64: 25>, scalar_prefetch = 0 : i64, scratch_operands = 0 : i64, tpu.core_type = #tpu.core_type<tc>, window_params = [{transform_indices = @transform_0, window_bounds = array<i64: 1024, 128>}, {pipeline_mode = #tpu.pipeline_mode<synchronous>, transform_indices = @transform_1, window_bounds = array<i64: 1, 128>}, {pipeline_mode = #tpu.pipeline_mode<synchronous>, transform_indices = @transform_2, window_bounds = array<i64: 1, 128>}, {transform_indices = @transform_3, window_bounds = array<i64: 1024, 128>}]} {
    %c0 = arith.constant 0 : index
    %c0_0 = arith.constant 0 : index
    %0 = vector.load %arg1[%c0, %c0_0] : memref<1024x128xbf16, #tpu.memory_space<vmem>>, vector<1024x128xbf16>
    %1 = arith.extf %0 : vector<1024x128xbf16> to vector<1024x128xf32>
    %c0_1 = arith.constant 0 : index
    %c0_2 = arith.constant 0 : index
    %2 = vector.load %arg2[%c0_1, %c0_2] : memref<1x128xf32, #tpu.memory_space<vmem>>, vector<1x128xf32>
    %3 = vector.broadcast %2 : vector<1x128xf32> to vector<1024x128xf32>
    %4 = arith.mulf %1, %3 : vector<1024x128xf32>
    %c0_3 = arith.constant 0 : index
    %c0_4 = arith.constant 0 : index
    %5 = vector.load %arg3[%c0_3, %c0_4] : memref<1x128xf32, #tpu.memory_space<vmem>>, vector<1x128xf32>
    %6 = vector.broadcast %5 : vector<1x128xf32> to vector<1024x128xf32>
    %7 = arith.addf %4, %6 : vector<1024x128xf32>
    %cst = arith.constant 0.000000e+00 : f32
    %8 = vector.broadcast %cst : f32 to vector<1024x128xf32>
    %9 = arith.maximumf %7, %8 : vector<1024x128xf32>
    %10 = arith.truncf %9 : vector<1024x128xf32> to vector<1024x128xbf16>
    %c0_5 = arith.constant 0 : index
    %c0_6 = arith.constant 0 : index
    %11 = vector.load %arg4[%c0_5, %c0_6] : memref<1024x128xbf16, #tpu.memory_space<vmem>>, vector<1024x128xbf16>
    tpu.vector_store %arg4[%c0_5, %c0_6], %10 {strides = array<i32>} : memref<1024x128xbf16, #tpu.memory_space<vmem>>, vector<1024x128xbf16>,
    return
  }
  func.func @transform_0(%arg0: i32) -> (i32, i32) {
    %c0_i32 = arith.constant 0 : i32
    %c0_i32_0 = arith.constant 0 : i32
    return %arg0, %c0_i32 : i32, i32
  }
  func.func @transform_1(%arg0: i32) -> (i32, i32) {
    %c0_i32 = arith.constant 0 : i32
    %c0_i32_0 = arith.constant 0 : i32
    %c0_i32_1 = arith.constant 0 : i32
    return %c0_i32, %c0_i32_0 : i32, i32
  }
  func.func @transform_2(%arg0: i32) -> (i32, i32) {
    %c0_i32 = arith.constant 0 : i32
    %c0_i32_0 = arith.constant 0 : i32
    %c0_i32_1 = arith.constant 0 : i32
    return %c0_i32, %c0_i32_0 : i32, i32
  }
  func.func @transform_3(%arg0: i32) -> (i32, i32) {
    %c0_i32 = arith.constant 0 : i32
    %c0_i32_0 = arith.constant 0 : i32
    return %arg0, %c0_i32 : i32, i32
  }
}

</mosaic_0001>

<bundles_post_ra>
// kernel: _conv_bn_jit.2
= control target key start
LH: loop header
LB: loop body
LE: loop exit
PB: predicated region body
PF: predicated region fallthrough
CT: control target
= control target key end

     0   :  { %s4042_s15 = smov 0   ;;  %s4044_s16 = smov 0   ;;  %s4750_s0 = inlined_call_operand.vmem [shape: bf16[25600,256], index: 0, kind: input, shape index: {}]   ;;  %s4751_s1 = inlined_call_operand.vmem [shape: bf16[256,128], index: 1, kind: input, shape index: {}]   ;;  %s4752_s2 = inlined_call_operand.vmem [shape: bf16[25600,128], index: 2, kind: output, shape index: {0}]   ;;  %s4753_s3 = inlined_call_operand.vmem [shape: f32[200,128], index: 3, kind: output, shape index: {1}]   ;;  %s4754_s4 = inlined_call_operand.vmem [shape: f32[200,128], index: 4, kind: output, shape index: {2}]  }
   0x1   :  { %s4046_s17 = smov 0  }
   0x2 LB: > { %s27_s18 = sadd.s32 1, %s4010_s16  ;;  %p2933_p0 = scmp.ge.s32.totalorder %s4014_s17, 1  ;;  %s4014_s17 = sphi %s4046_s17, %s15_s17   ;;  %s4010_s16 = sphi %s4044_s16, %s4824_s16   ;;  %s4006_s15 = sphi %s4042_s15, %s4823_s15  }
   0x3   : > { %p29_p1 = scmp.ge.s32.totalorder %s27_s18, 25  ;;  %p196_p2 = scmp.lt.s32.totalorder %s4014_s17, 26 }
   0x5   : > { %s4826_s18 = smov (%p29_p1, %s27_s18), 0  ;;  %p197_p3 = pnand %p2933_p0, %p196_p2 }
   0x7   : > { %200 = sbr.rel (%p197_p3) target bundleno = 686 (0x2ae), region = 28 }
   0xe   : > { %v3784_v0 = vld [vmem:[%s4751_s1] sm:$0xff]   ;;  %v4016_v1 = vmov 0   ;;  %s2934_s21 = sshll.u32 %s4006_s15, 7  ;;  %v3785_v2 = vld [vmem:[%s4751_s1 + $0x8] sm:$0xff]   ;;  %v3786_v3 = vld [vmem:[%s4751_s1 + $0x10] sm:$0xff]   ;;  %p264_p5 = scmp.lt.s32.totalorder %s4006_s15, 24 }
   0xf   : > { %1175 = vmatprep.subr.bf16.mxu0 %v4016_v1  ;;  %3727 = vmatprep.subr.bf16.mxu1 %v4016_v1  ;;  %p245_p4 = scmp.lt.s32.totalorder %s2934_s21, 3199  ;;  %v3787_v4 = vld [vmem:[%s4751_s1 + $0x18] sm:$0xff]   ;;  %v3788_v5 = vld [vmem:[%s4751_s1 + $0x20] sm:$0xff]   ;;  %v3789_v7 = vld [vmem:[%s4751_s1 + $0x28] sm:$0xff]  }
  0x10   : > { %1176 = vmatpush1.bf16.msra.mxu0 %v3784_v0  ;;  %3743 = vmatpush1.bf16.msra.mxu1 %v3784_v0  ;;  %v3790_v8 = vld [vmem:[%s4751_s1 + $0x30] sm:$0xff]   ;;  %v3791_v9 = vld [vmem:[%s4751_s1 + $0x38] sm:$0xff]   ;;  %v3792_v10 = vld [vmem:[%s4751_s1 + $0x40] sm:$0xff]   ;;  %s4830_s15 = smov (!%p264_p5, %s4006_s15), 24 }
  0x11   : > { %1177 = vmatprep.subr.bf16.mxu0 %v4016_v1  ;;  %3728 = vmatprep.subr.bf16.mxu1 %v4016_v1  ;;  %s4828_s21 = smov (!%p245_p4, %s2934_s21), 3199  ;;  %v3793_v11 = vld [vmem:[%s4751_s1 + $0x48] sm:$0xff]   ;;  %v3794_v12 = vld [vmem:[%s4751_s1 + $0x50] sm:$0xff]   ;;  %v3795_v13 = vld [vmem:[%s4751_s1 + $0x58] sm:$0xff]  }
  0x12   : > { %s3215_s28 = sshll.u32 %s4828_s21, 3  ;;  %v3796_v14 = vld [vmem:[%s4751_s1 + $0x60] sm:$0xff]   ;;  %v3797_v15 = vld [vmem:[%s4751_s1 + $0x68] sm:$0xff]   ;;  %v3798_v16 = vld [vmem:[%s4751_s1 + $0x70] sm:$0xff]   ;;  %s2938_s10 = sshll.u32 %s4828_s21, 2 }
  0x13   : > { %s4092_s7 = scalar_lea.vmem %s4750_s0, %s3215_s28  ;;  %v3799_v18 = vld [vmem:[%s4751_s1 + $0x78] sm:$0xff]   ;;  %s4269_s13 = scalar_lea.vmem %s4752_s2, %s2938_s10 }
  0x14   : > { %1178 = vmatpush1.bf16.msra.mxu0 %v3785_v2  ;;  %3744 = vmatpush1.bf16.msra.mxu1 %v3785_v2  ;;  %v3802_v6 = vld [vmem:[%s4092_s7 + $0x4] ss:$8 sps:$4 sm:$0xff]   ;;  %v3800_v19 = vld [vmem:[%s4092_s7] ss:$8 sps:$4 sm:$0xff]   ;;  %v3803_v21 = vld [vmem:[%s4092_s7 + $0x14] ss:$8 sps:$4 sm:$0xff]  }
  0x15   : > { %1179 = vmatprep.subr.bf16.mxu0 %v4016_v1  ;;  %3729 = vmatprep.subr.bf16.mxu1 %v4016_v1  ;;  %v3850_v17 = vld [vmem:[%s4092_s7 + $0x204] ss:$8 sps:$4 sm:$0xff]   ;;  %v3848_v20 = vld [vmem:[%s4092_s7 + $0x200] ss:$8 sps:$4 sm:$0xff]   ;;  %v3854_v22 = vld [vmem:[%s4092_s7 + $0x214] ss:$8 sps:$4 sm:$0xff]  }
  0x16   : > { %1207 = vmatprep.mubr.bf16.mxu0 %v3802_v6  ;;  %1463 = vmatprep.mubr.bf16.mxu1 %v3850_v17  ;;  %v3805_v23 = vld [vmem:[%s4092_s7 + $0x10] ss:$8 sps:$4 sm:$0xff]   ;;  %v3806_v25 = vld [vmem:[%s4092_s7 + $0x24] ss:$8 sps:$4 sm:$0xff]   ;;  %v3808_v27 = vld [vmem:[%s4092_s7 + $0x20] ss:$8 sps:$4 sm:$0xff]  }
  0x17   : > { %v3856_v24 = vld [vmem:[%s4092_s7 + $0x210] ss:$8 sps:$4 sm:$0xff]   ;;  %v3860_v26 = vld [vmem:[%s4092_s7 + $0x224] ss:$8 sps:$4 sm:$0xff]   ;;  %v3862_v28 = vld [vmem:[%s4092_s7 + $0x220] ss:$8 sps:$4 sm:$0xff]  }
  0x18   : > { %1180 = vmatpush1.bf16.msra.mxu0 %v3786_v3  ;;  %3745 = vmatpush1.bf16.msra.mxu1 %v3786_v3  ;;  %v3809_v29 = vld [vmem:[%s4092_s7 + $0x34] ss:$8 sps:$4 sm:$0xff]   ;;  %v3811_v31 = vld [vmem:[%s4092_s7 + $0x30] ss:$8 sps:$4 sm:$0xff]   ;;  %v3812_v33 = vld [vmem:[%s4092_s7 + $0x44] ss:$8 sps:$4 sm:$0xff]  }
  0x19   : > { %1181 = vmatprep.subr.bf16.mxu0 %v4016_v1  ;;  %3730 = vmatprep.subr.bf16.mxu1 %v4016_v1  ;;  %v3866_v30 = vld [vmem:[%s4092_s7 + $0x234] ss:$8 sps:$4 sm:$0xff]   ;;  %v3868_v32 = vld [vmem:[%s4092_s7 + $0x230] ss:$8 sps:$4 sm:$0xff]   ;;  %v3872_v34 = vld [vmem:[%s4092_s7 + $0x244] ss:$8 sps:$4 sm:$0xff]  }
  0x1a   : > { %v3814_v35 = vld [vmem:[%s4092_s7 + $0x40] ss:$8 sps:$4 sm:$0xff]   ;;  %v3815_v37 = vld [vmem:[%s4092_s7 + $0x54] ss:$8 sps:$4 sm:$0xff]   ;;  %v3817_v39 = vld [vmem:[%s4092_s7 + $0x50] ss:$8 sps:$4 sm:$0xff]  }
  0x1b   : > { %v3874_v36 = vld [vmem:[%s4092_s7 + $0x240] ss:$8 sps:$4 sm:$0xff]   ;;  %v3878_v38 = vld [vmem:[%s4092_s7 + $0x254] ss:$8 sps:$4 sm:$0xff]   ;;  %v3880_v40 = vld [vmem:[%s4092_s7 + $0x250] ss:$8 sps:$4 sm:$0xff]  }
  0x1c   : > { %1182 = vmatpush1.bf16.msra.mxu0 %v3787_v4  ;;  %3746 = vmatpush1.bf16.msra.mxu1 %v3787_v4  ;;  %v3818_v41 = vld [vmem:[%s4092_s7 + $0x64] ss:$8 sps:$4 sm:$0xff]   ;;  %v3820_v43 = vld [vmem:[%s4092_s7 + $0x60] ss:$8 sps:$4 sm:$0xff]   ;;  %v3821_v45 = vld [vmem:[%s4092_s7 + $0x74] ss:$8 sps:$4 sm:$0xff]  }
  0x1d   : > { %1183 = vmatprep.subr.bf16.mxu0 %v4016_v1  ;;  %3731 = vmatprep.subr.bf16.mxu1 %v4016_v1  ;;  %v3884_v42 = vld [vmem:[%s4092_s7 + $0x264] ss:$8 sps:$4 sm:$0xff]   ;;  %v3886_v44 = vld [vmem:[%s4092_s7 + $0x260] ss:$8 sps:$4 sm:$0xff]   ;;  %v3890_v46 = vld [vmem:[%s4092_s7 + $0x274] ss:$8 sps:$4 sm:$0xff]  }
  0x1e   : > { %v3823_v47 = vld [vmem:[%s4092_s7 + $0x70] ss:$8 sps:$4 sm:$0xff]   ;;  %v3824_v49 = vld [vmem:[%s4092_s7 + $0x84] ss:$8 sps:$4 sm:$0xff]   ;;  %v3826_v51 = vld [vmem:[%s4092_s7 + $0x80] ss:$8 sps:$4 sm:$0xff]  }
  0x1f   : > { %v3892_v48 = vld [vmem:[%s4092_s7 + $0x270] ss:$8 sps:$4 sm:$0xff]   ;;  %v3896_v50 = vld [vmem:[%s4092_s7 + $0x284] ss:$8 sps:$4 sm:$0xff]   ;;  %v3898_v52 = vld [vmem:[%s4092_s7 + $0x280] ss:$8 sps:$4 sm:$0xff]  }
  0x20   : > { %1184 = vmatpush1.bf16.msra.mxu0 %v3788_v5  ;;  %3747 = vmatpush1.bf16.msra.mxu1 %v3788_v5  ;;  %v3827_v53 = vld [vmem:[%s4092_s7 + $0x94] ss:$8 sps:$4 sm:$0xff]   ;;  %v3829_v55 = vld [vmem:[%s4092_s7 + $0x90] ss:$8 sps:$4 sm:$0xff]   ;;  %v3830_v57 = vld [vmem:[%s4092_s7 + $0xa4] ss:$8 sps:$4 sm:$0xff]  }
  0x21   : > { %1185 = vmatprep.subr.bf16.mxu0 %v4016_v1  ;;  %3732 = vmatprep.subr.bf16.mxu1 %v4016_v1  ;;  %v3902_v54 = vld [vmem:[%s4092_s7 + $0x294] ss:$8 sps:$4 sm:$0xff]   ;;  %v3904_v56 = vld [vmem:[%s4092_s7 + $0x290] ss:$8 sps:$4 sm:$0xff]   ;;  %v3908_v58 = vld [vmem:[%s4092_s7 + $0x2a4] ss:$8 sps:$4 sm:$0xff]  }
  0x22   : > { %v3832_v59 = vld [vmem:[%s4092_s7 + $0xa0] ss:$8 sps:$4 sm:$0xff]   ;;  %v3833_v61 = vld [vmem:[%s4092_s7 + $0xb4] ss:$8 sps:$4 sm:$0xff]   ;;  %v3835_v63 = vld [vmem:[%s4092_s7 + $0xb0] ss:$8 sps:$4 sm:$0xff]  }
  0x23   : > { %v3910_v60 = vld [vmem:[%s4092_s7 + $0x2a0] ss:$8 sps:$4 sm:$0xff]   ;;  %v3914_v62 = vld [vmem:[%s4092_s7 + $0x2b4] ss:$8 sps:$4 sm:$0xff]   ;;  %v3916_v0 = vld [vmem:[%s4092_s7 + $0x2b0] ss:$8 sps:$4 sm:$0xff]  }
  0x24   : > { %1186 = vmatpush1.bf16.msra.mxu0 %v3789_v7  ;;  %3748 = vmatpush1.bf16.msra.mxu1 %v3789_v7  ;;  %v3920_v2 = vld [vmem:[%s4092_s7 + $0x2c4] ss:$8 sps:$4 sm:$0xff]   ;;  %v3838_v3 = vld [vmem:[%s4092_s7 + $0xc0] ss:$8 sps:$4 sm:$0xff]   ;;  %v3839_v5 = vld [vmem:[%s4092_s7 + $0xd4] ss:$8 sps:$4 sm:$0xff]  }
  0x25   : > { %1187 = vmatprep.subr.bf16.mxu0 %v4016_v1  ;;  %3733 = vmatprep.subr.bf16.mxu1 %v4016_v1  ;;  %v3922_v4 = vld [vmem:[%s4092_s7 + $0x2c0] ss:$8 sps:$4 sm:$0xff]   ;;  %v3926_v6 = vld [vmem:[%s4092_s7 + $0x2d4] ss:$8 sps:$4 sm:$0xff]   ;;  %v3841_v7 = vld [vmem:[%s4092_s7 + $0xd0] ss:$8 sps:$4 sm:$0xff]  }
  0x26   : > { %v3851_v17 = vld [vmem:[%s4092_s7 + $0x104] ss:$8 sps:$4 sm:$0xff]   ;;  %s2939_s21 = sshll.u32 %s4830_s15, 3 }
  0x27   : > { %s270_s19 = scalar_lea.vmem %s4753_s3, %s2939_s21  ;;  %s277_s23 = scalar_lea.vmem %s4754_s4, %s2939_s21 }
  0x28   : > { %1188 = vmatpush1.bf16.msra.mxu0 %v3790_v8  ;;  %3749 = vmatpush1.bf16.msra.mxu1 %v3790_v8  ;;  %v3928_v8 = vld [vmem:[%s4092_s7 + $0x2d0] ss:$8 sps:$4 sm:$0xff]  }
  0x29   : > { %1189 = vmatprep.subr.bf16.mxu0 %v4016_v1  ;;  %3734 = vmatprep.subr.bf16.mxu1 %v4016_v1 }
  0x2c   : > { %1190 = vmatpush1.bf16.msra.mxu0 %v3791_v9  ;;  %3750 = vmatpush1.bf16.msra.mxu1 %v3791_v9  ;;  %v3842_v9 = vld [vmem:[%s4092_s7 + $0xe4] ss:$8 sps:$4 sm:$0xff]  }
  0x2d   : > { %1191 = vmatprep.subr.bf16.mxu0 %v4016_v1  ;;  %3735 = vmatprep.subr.bf16.mxu1 %v4016_v1 }
  0x30   : > { %1192 = vmatpush1.bf16.msra.mxu0 %v3792_v10  ;;  %3751 = vmatpush1.bf16.msra.mxu1 %v3792_v10  ;;  %v3932_v10 = vld [vmem:[%s4092_s7 + $0x2e4] ss:$8 sps:$4 sm:$0xff]  }
  0x31   : > { %1193 = vmatprep.subr.bf16.mxu0 %v4016_v1  ;;  %3736 = vmatprep.subr.bf16.mxu1 %v4016_v1 }
  0x34   : > { %1194 = vmatpush1.bf16.msra.mxu0 %v3793_v11  ;;  %3752 = vmatpush1.bf16.msra.mxu1 %v3793_v11  ;;  %v3844_v11 = vld [vmem:[%s4092_s7 + $0xe0] ss:$8 sps:$4 sm:$0xff]  }
  0x35   : > { %1195 = vmatprep.subr.bf16.mxu0 %v4016_v1  ;;  %3737 = vmatprep.subr.bf16.mxu1 %v4016_v1 }
  0x38   : > { %1196 = vmatpush1.bf16.msra.mxu0 %v3794_v12  ;;  %3753 = vmatpush1.bf16.msra.mxu1 %v3794_v12  ;;  %v3934_v12 = vld [vmem:[%s4092_s7 + $0x2e0] ss:$8 sps:$4 sm:$0xff]  }
  0x39   : > { %1197 = vmatprep.subr.bf16.mxu0 %v4016_v1  ;;  %3738 = vmatprep.subr.bf16.mxu1 %v4016_v1 }
  0x3c   : > { %1198 = vmatpush1.bf16.msra.mxu0 %v3795_v13  ;;  %3754 = vmatpush1.bf16.msra.mxu1 %v3795_v13  ;;  %v3845_v13 = vld [vmem:[%s4092_s7 + $0xf4] ss:$8 sps:$4 sm:$0xff]  }
  0x3d   : > { %1199 = vmatprep.subr.bf16.mxu0 %v4016_v1  ;;  %3739 = vmatprep.subr.bf16.mxu1 %v4016_v1 }
  0x40   : > { %1200 = vmatpush1.bf16.msra.mxu0 %v3796_v14  ;;  %3755 = vmatpush1.bf16.msra.mxu1 %v3796_v14  ;;  %v3938_v14 = vld [vmem:[%s4092_s7 + $0x2f4] ss:$8 sps:$4 sm:$0xff]  }
  0x41   : > { %1201 = vmatprep.subr.bf16.mxu0 %v4016_v1  ;;  %3740 = vmatprep.subr.bf16.mxu1 %v4016_v1 }
  0x44   : > { %1202 = vmatpush1.bf16.msra.mxu0 %v3797_v15  ;;  %3756 = vmatpush1.bf16.msra.mxu1 %v3797_v15  ;;  %v3847_v15 = vld [vmem:[%s4092_s7 + $0xf0] ss:$8 sps:$4 sm:$0xff]  }
  0x45   : > { %1203 = vmatprep.subr.bf16.mxu0 %v4016_v1  ;;  %3741 = vmatprep.subr.bf16.mxu1 %v4016_v1 }
  0x48   : > { %1204 = vmatpush1.bf16.msra.mxu0 %v3798_v16  ;;  %3757 = vmatpush1.bf16.msra.mxu1 %v3798_v16  ;;  %v3940_v16 = vld [vmem:[%s4092_s7 + $0x2f0] ss:$8 sps:$4 sm:$0xff]  }
  0x49   : > { %1205 = vmatprep.subr.bf16.mxu0 %v4016_v1  ;;  %3742 = vmatprep.subr.bf16.mxu1 %v4016_v1  ;;  %v3836_v1 = vld [vmem:[%s4092_s7 + $0xc4] ss:$8 sps:$4 sm:$0xff]  }
  0x4c   : > { %1206 = vmatpush1.bf16.msra.mxu0 %v3799_v18  ;;  %3758 = vmatpush1.bf16.msra.mxu1 %v3799_v18  ;;  %v3944_v18 = vld [vmem:[%s4092_s7 + $0x304] ss:$8 sps:$4 sm:$0xff]  }
  0x4f   : > { %1208 = vmatmul.mubr.bf16.vlgmr.msra.gmra.mrb[0].mxu0 %v3800_v19  ;;  %1464 = vmatmul.mubr.bf16.vlgmr.msra.gmra.mrb[0].mxu1 %v3848_v20  ;;  %v3853_v19 = vld [vmem:[%s4092_s7 + $0x100] ss:$8 sps:$4 sm:$0xff]  }
  0x50   : > { %1215 = vmatprep.mubr.bf16.mxu0 %v3803_v21  ;;  %1471 = vmatprep.mubr.bf16.mxu1 %v3854_v22  ;;  %v3946_v20 = vld [vmem:[%s4092_s7 + $0x300] ss:$8 sps:$4 sm:$0xff]   ;;  %v3857_v21 = vld [vmem:[%s4092_s7 + $0x114] ss:$8 sps:$4 sm:$0xff]  }
  0x51   : > { %v3947_v22 = vld [vmem:[%s4092_s7 + $0x314] ss:$8 sps:$4 sm:$0xff]  }
  0x57   : > { %1216 = vmatmul.mubr.bf16.gmra.mrb[4].mxu0 %v3805_v23  ;;  %1472 = vmatmul.mubr.bf16.gmra.mrb[4].mxu1 %v3856_v24  ;;  %v3859_v23 = vld [vmem:[%s4092_s7 + $0x110] ss:$8 sps:$4 sm:$0xff]  }
  0x58   : > { %1223 = vmatprep.mubr.bf16.mxu0 %v3806_v25  ;;  %1479 = vmatprep.mubr.bf16.mxu1 %v3860_v26  ;;  %v3949_v24 = vld [vmem:[%s4092_s7 + $0x310] ss:$8 sps:$4 sm:$0xff]   ;;  %v3863_v25 = vld [vmem:[%s4092_s7 + $0x124] ss:$8 sps:$4 sm:$0xff]  }
  0x59   : > { %v3950_v26 = vld [vmem:[%s4092_s7 + $0x324] ss:$8 sps:$4 sm:$0xff]  }
  0x5f   : > { %1224 = vmatmul.mubr.bf16.gmra.mrb[8].mxu0 %v3808_v27  ;;  %1480 = vmatmul.mubr.bf16.gmra.mrb[8].mxu1 %v3862_v28  ;;  %v3865_v27 = vld [vmem:[%s4092_s7 + $0x120] ss:$8 sps:$4 sm:$0xff]  }
  0x60   : > { %1231 = vmatprep.mubr.bf16.mxu0 %v3809_v29  ;;  %1487 = vmatprep.mubr.bf16.mxu1 %v3866_v30  ;;  %v3952_v28 = vld [vmem:[%s4092_s7 + $0x320] ss:$8 sps:$4 sm:$0xff]   ;;  %v3869_v29 = vld [vmem:[%s4092_s7 + $0x134] ss:$8 sps:$4 sm:$0xff]  }
  0x61   : > { %v3953_v30 = vld [vmem:[%s4092_s7 + $0x334] ss:$8 sps:$4 sm:$0xff]  }
  0x67   : > { %1232 = vmatmul.mubr.bf16.gmra.mrb[12].mxu0 %v3811_v31  ;;  %1488 = vmatmul.mubr.bf16.gmra.mrb[12].mxu1 %v3868_v32  ;;  %v3871_v31 = vld [vmem:[%s4092_s7 + $0x130] ss:$8 sps:$4 sm:$0xff]  }
  0x68   : > { %1239 = vmatprep.mubr.bf16.mxu0 %v3812_v33  ;;  %1495 = vmatprep.mubr.bf16.mxu1 %v3872_v34  ;;  %v3955_v32 = vld [vmem:[%s4092_s7 + $0x330] ss:$8 sps:$4 sm:$0xff]   ;;  %v3875_v33 = vld [vmem:[%s4092_s7 + $0x144] ss:$8 sps:$4 sm:$0xff]  }
  0x69   : > { %v3956_v34 = vld [vmem:[%s4092_s7 + $0x344] ss:$8 sps:$4 sm:$0xff]  }
  0x6f   : > { %1240 = vmatmul.mubr.bf16.gmra.mrb[16].mxu0 %v3814_v35  ;;  %1496 = vmatmul.mubr.bf16.gmra.mrb[16].mxu1 %v3874_v36  ;;  %v3877_v35 = vld [vmem:[%s4092_s7 + $0x140] ss:$8 sps:$4 sm:$0xff]  }
  0x70   : > { %1247 = vmatprep.mubr.bf16.mxu0 %v3815_v37  ;;  %1503 = vmatprep.mubr.bf16.mxu1 %v3878_v38  ;;  %v3958_v36 = vld [vmem:[%s4092_s7 + $0x340] ss:$8 sps:$4 sm:$0xff]   ;;  %v3881_v37 = vld [vmem:[%s4092_s7 + $0x154] ss:$8 sps:$4 sm:$0xff]  }
  0x71   : > { %v3959_v38 = vld [vmem:[%s4092_s7 + $0x354] ss:$8 sps:$4 sm:$0xff]  }
  0x77   : > { %1248 = vmatmul.mubr.bf16.gmra.mrb[20].mxu0 %v3817_v39  ;;  %1504 = vmatmul.mubr.bf16.gmra.mrb[20].mxu1 %v3880_v40  ;;  %v3883_v39 = vld [vmem:[%s4092_s7 + $0x150] ss:$8 sps:$4 sm:$0xff]  }
  0x78   : > { %1255 = vmatprep.mubr.bf16.mxu0 %v3818_v41  ;;  %1511 = vmatprep.mubr.bf16.mxu1 %v3884_v42  ;;  %v3961_v40 = vld [vmem:[%s4092_s7 + $0x350] ss:$8 sps:$4 sm:$0xff]   ;;  %v3887_v41 = vld [vmem:[%s4092_s7 + $0x164] ss:$8 sps:$4 sm:$0xff]  }
  0x79   : > { %v3962_v42 = vld [vmem:[%s4092_s7 + $0x364] ss:$8 sps:$4 sm:$0xff]  }
  0x7f   : > { %1256 = vmatmul.mubr.bf16.gmra.mrb[24].mxu0 %v3820_v43  ;;  %1512 = vmatmul.mubr.bf16.gmra.mrb[24].mxu1 %v3886_v44  ;;  %v3889_v43 = vld [vmem:[%s4092_s7 + $0x160] ss:$8 sps:$4 sm:$0xff]  }
  0x80   : > { %1263 = vmatprep.mubr.bf16.mxu0 %v3821_v45  ;;  %1519 = vmatprep.mubr.bf16.mxu1 %v3890_v46  ;;  %v3964_v44 = vld [vmem:[%s4092_s7 + $0x360] ss:$8 sps:$4 sm:$0xff]   ;;  %v3893_v45 = vld [vmem:[%s4092_s7 + $0x174] ss:$8 sps:$4 sm:$0xff]  }
  0x81   : > { %v3965_v46 = vld [vmem:[%s4092_s7 + $0x374] ss:$8 sps:$4 sm:$0xff]  }
  0x87   : > { %1264 = vmatmul.mubr.bf16.gmra.mrb[28].mxu0 %v3823_v47  ;;  %1520 = vmatmul.mubr.bf16.gmra.mrb[28].mxu1 %v3892_v48  ;;  %v3895_v47 = vld [vmem:[%s4092_s7 + $0x170] ss:$8 sps:$4 sm:$0xff]  }
  0x88   : > { %1271 = vmatprep.mubr.bf16.mxu0 %v3824_v49  ;;  %1527 = vmatprep.mubr.bf16.mxu1 %v3896_v50  ;;  %v3967_v48 = vld [vmem:[%s4092_s7 + $0x370] ss:$8 sps:$4 sm:$0xff]   ;;  %v3899_v49 = vld [vmem:[%s4092_s7 + $0x184] ss:$8 sps:$4 sm:$0xff]  }
  0x89   : > { %v3968_v50 = vld [vmem:[%s4092_s7 + $0x384] ss:$8 sps:$4 sm:$0xff]  }
  0x8f   : > { %1272 = vmatmul.mubr.bf16.gmra.mrb[32].mxu0 %v3826_v51  ;;  %1528 = vmatmul.mubr.bf16.gmra.mrb[32].mxu1 %v3898_v52  ;;  %v3901_v51 = vld [vmem:[%s4092_s7 + $0x180] ss:$8 sps:$4 sm:$0xff]  }
  0x90   : > { %1279 = vmatprep.mubr.bf16.mxu0 %v3827_v53  ;;  %1535 = vmatprep.mubr.bf16.mxu1 %v3902_v54  ;;  %v3970_v52 = vld [vmem:[%s4092_s7 + $0x380] ss:$8 sps:$4 sm:$0xff]   ;;  %v3905_v53 = vld [vmem:[%s4092_s7 + $0x194] ss:$8 sps:$4 sm:$0xff]  }
  0x91   : > { %v3971_v54 = vld [vmem:[%s4092_s7 + $0x394] ss:$8 sps:$4 sm:$0xff]  }
  0x97   : > { %1280 = vmatmul.mubr.bf16.gmra.mrb[36].mxu0 %v3829_v55  ;;  %1536 = vmatmul.mubr.bf16.gmra.mrb[36].mxu1 %v3904_v56  ;;  %v3907_v55 = vld [vmem:[%s4092_s7 + $0x190] ss:$8 sps:$4 sm:$0xff]  }
  0x98   : > { %1287 = vmatprep.mubr.bf16.mxu0 %v3830_v57  ;;  %1543 = vmatprep.mubr.bf16.mxu1 %v3908_v58  ;;  %v3973_v56 = vld [vmem:[%s4092_s7 + $0x390] ss:$8 sps:$4 sm:$0xff]   ;;  %v3911_v57 = vld [vmem:[%s4092_s7 + $0x1a4] ss:$8 sps:$4 sm:$0xff]  }
  0x99   : > { %v3974_v58 = vld [vmem:[%s4092_s7 + $0x3a4] ss:$8 sps:$4 sm:$0xff]  }
  0x9f   : > { %1288 = vmatmul.mubr.bf16.gmra.mrb[40].mxu0 %v3832_v59  ;;  %1544 = vmatmul.mubr.bf16.gmra.mrb[40].mxu1 %v3910_v60  ;;  %v3913_v59 = vld [vmem:[%s4092_s7 + $0x1a0] ss:$8 sps:$4 sm:$0xff]  }
  0xa0   : > { %1295 = vmatprep.mubr.bf16.mxu0 %v3833_v61  ;;  %1551 = vmatprep.mubr.bf16.mxu1 %v3914_v62  ;;  %v3976_v60 = vld [vmem:[%s4092_s7 + $0x3a0] ss:$8 sps:$4 sm:$0xff]   ;;  %v3917_v61 = vld [vmem:[%s4092_s7 + $0x1b4] ss:$8 sps:$4 sm:$0xff]  }
  0xa1   : > { %v3977_v62 = vld [vmem:[%s4092_s7 + $0x3b4] ss:$8 sps:$4 sm:$0xff]  }
  0xa7   : > { %1296 = vmatmul.mubr.bf16.gmra.mrb[44].mxu0 %v3835_v63  ;;  %1552 = vmatmul.mubr.bf16.gmra.mrb[44].mxu1 %v3916_v0 }
  0xa8   : > { %1303 = vmatprep.mubr.bf16.mxu0 %v3836_v1  ;;  %1559 = vmatprep.mubr.bf16.mxu1 %v3920_v2  ;;  %v3919_v2 = vld [vmem:[%s4092_s7 + $0x1b0] ss:$8 sps:$4 sm:$0xff]  }
  0xaf   : > { %1304 = vmatmul.mubr.bf16.gmra.mrb[48].mxu0 %v3838_v3  ;;  %1560 = vmatmul.mubr.bf16.gmra.mrb[48].mxu1 %v3922_v4  ;;  %v3979_v4 = vld [vmem:[%s4092_s7 + $0x3b0] ss:$8 sps:$4 sm:$0xff]  }
  0xb0   : > { %1311 = vmatprep.mubr.bf16.mxu0 %v3839_v5  ;;  %1567 = vmatprep.mubr.bf16.mxu1 %v3926_v6 }
  0xb7   : > { %1312 = vmatmul.mubr.bf16.gmra.mrb[52].mxu0 %v3841_v7  ;;  %1568 = vmatmul.mubr.bf16.gmra.mrb[52].mxu1 %v3928_v8  ;;  %v3923_v7 = vld [vmem:[%s4092_s7 + $0x1c4] ss:$8 sps:$4 sm:$0xff]  }
  0xb8   : > { %1319 = vmatprep.mubr.bf16.mxu0 %v3842_v9  ;;  %1575 = vmatprep.mubr.bf16.mxu1 %v3932_v10 }
  0xbf   : > { %1320 = vmatmul.mubr.bf16.gmra.mrb[56].mxu0 %v3844_v11  ;;  %1576 = vmatmul.mubr.bf16.gmra.mrb[56].mxu1 %v3934_v12 }
  0xc0   : > { %1327 = vmatprep.mubr.bf16.mxu0 %v3845_v13  ;;  %1583 = vmatprep.mubr.bf16.mxu1 %v3938_v14 }
  0xc7   : > { %1328 = vmatmul.mubr.bf16.gmra.mrb[60].mxu0 %v3847_v15  ;;  %1584 = vmatmul.mubr.bf16.gmra.mrb[60].mxu1 %v3940_v16  ;;  %v3980_v16 = vld [vmem:[%s4092_s7 + $0x3c4] ss:$8 sps:$4 sm:$0xff]  }
  0xc8   : > { %1335 = vmatprep.mubr.bf16.mxu0 %v3851_v17  ;;  %1591 = vmatprep.mubr.bf16.mxu1 %v3944_v18 }
  0xcf   : > { %1336 = vmatmul.mubr.bf16.gmra.mrb[64].mxu0 %v3853_v19  ;;  %1592 = vmatmul.mubr.bf16.gmra.mrb[64].mxu1 %v3946_v20 }
  0xd0   : > { %1343 = vmatprep.mubr.bf16.mxu0 %v3857_v21  ;;  %1599 = vmatprep.mubr.bf16.mxu1 %v3947_v22  ;;  %v3925_v22 = vld [vmem:[%s4092_s7 + $0x1c0] ss:$8 sps:$4 sm:$0xff]  }
  0xd7   : > { %1344 = vmatmul.mubr.bf16.gmra.mrb[68].mxu0 %v3859_v23  ;;  %1600 = vmatmul.mubr.bf16.gmra.mrb[68].mxu1 %v3949_v24  ;;  %v3982_v24 = vld [vmem:[%s4092_s7 + $0x3c0] ss:$8 sps:$4 sm:$0xff]  }
  0xd8   : > { %1351 = vmatprep.mubr.bf16.mxu0 %v3863_v25  ;;  %1607 = vmatprep.mubr.bf16.mxu1 %v3950_v26  ;;  %v3929_v26 = vld [vmem:[%s4092_s7 + $0x1d4] ss:$8 sps:$4 sm:$0xff]  }
  0xdf   : > { %1352 = vmatmul.mubr.bf16.gmra.mrb[72].mxu0 %v3865_v27  ;;  %1608 = vmatmul.mubr.bf16.gmra.mrb[72].mxu1 %v3952_v28 }
  0xe0   : > { %1359 = vmatprep.mubr.bf16.mxu0 %v3869_v29  ;;  %1615 = vmatprep.mubr.bf16.mxu1 %v3953_v30 }
  0xe7   : > { %1360 = vmatmul.mubr.bf16.gmra.mrb[76].mxu0 %v3871_v31  ;;  %1616 = vmatmul.mubr.bf16.gmra.mrb[76].mxu1 %v3955_v32 }
  0xe8   : > { %1367 = vmatprep.mubr.bf16.mxu0 %v3875_v33  ;;  %1623 = vmatprep.mubr.bf16.mxu1 %v3956_v34 }
  0xef   : > { %1368 = vmatmul.mubr.bf16.gmra.mrb[80].mxu0 %v3877_v35  ;;  %1624 = vmatmul.mubr.bf16.gmra.mrb[80].mxu1 %v3958_v36  ;;  %v3983_v36 = vld [vmem:[%s4092_s7 + $0x3d4] ss:$8 sps:$4 sm:$0xff]  }
  0xf0   : > { %1375 = vmatprep.mubr.bf16.mxu0 %v3881_v37  ;;  %1631 = vmatprep.mubr.bf16.mxu1 %v3959_v38 }
  0xf7   : > { %1376 = vmatmul.mubr.bf16.gmra.mrb[84].mxu0 %v3883_v39  ;;  %1632 = vmatmul.mubr.bf16.gmra.mrb[84].mxu1 %v3961_v40 }
  0xf8   : > { %1383 = vmatprep.mubr.bf16.mxu0 %v3887_v41  ;;  %1639 = vmatprep.mubr.bf16.mxu1 %v3962_v42  ;;  %v3931_v42 = vld [vmem:[%s4092_s7 + $0x1d0] ss:$8 sps:$4 sm:$0xff]  }
  0xff   : > { %1384 = vmatmul.mubr.bf16.gmra.mrb[88].mxu0 %v3889_v43  ;;  %1640 = vmatmul.mubr.bf16.gmra.mrb[88].mxu1 %v3964_v44  ;;  %v3985_v44 = vld [vmem:[%s4092_s7 + $0x3d0] ss:$8 sps:$4 sm:$0xff]  }
 0x100   : > { %1391 = vmatprep.mubr.bf16.mxu0 %v3893_v45  ;;  %1647 = vmatprep.mubr.bf16.mxu1 %v3965_v46  ;;  %v3935_v46 = vld [vmem:[%s4092_s7 + $0x1e4] ss:$8 sps:$4 sm:$0xff]  }
 0x107   : > { %1392 = vmatmul.mubr.bf16.gmra.mrb[92].mxu0 %v3895_v47  ;;  %1648 = vmatmul.mubr.bf16.gmra.mrb[92].mxu1 %v3967_v48 }
 0x108   : > { %1399 = vmatprep.mubr.bf16.mxu0 %v3899_v49  ;;  %1655 = vmatprep.mubr.bf16.mxu1 %v3968_v50 }
 0x10f   : > { %1400 = vmatmul.mubr.bf16.gmra.mrb[96].mxu0 %v3901_v51  ;;  %1656 = vmatmul.mubr.bf16.gmra.mrb[96].mxu1 %v3970_v52 }
 0x110   : > { %1407 = vmatprep.mubr.bf16.mxu0 %v3905_v53  ;;  %1663 = vmatprep.mubr.bf16.mxu1 %v3971_v54 }
 0x117   : > { %1408 = vmatmul.mubr.bf16.gmra.mrb[100].mxu0 %v3907_v55  ;;  %1664 = vmatmul.mubr.bf16.gmra.mrb[100].mxu1 %v3973_v56  ;;  %v3986_v56 = vld [vmem:[%s4092_s7 + $0x3e4] ss:$8 sps:$4 sm:$0xff]  }
 0x118   : > { %1415 = vmatprep.mubr.bf16.mxu0 %v3911_v57  ;;  %1671 = vmatprep.mubr.bf16.mxu1 %v3974_v58 }
 0x11f   : > { %1416 = vmatmul.mubr.bf16.gmra.mrb[104].mxu0 %v3913_v59  ;;  %1672 = vmatmul.mubr.bf16.gmra.mrb[104].mxu1 %v3976_v60 }
 0x120   : > { %1423 = vmatprep.mubr.bf16.mxu0 %v3917_v61  ;;  %1679 = vmatprep.mubr.bf16.mxu1 %v3977_v62  ;;  %v3937_v62 = vld [vmem:[%s4092_s7 + $0x1e0] ss:$8 sps:$4 sm:$0xff]  }
 0x122   : > { %v1209_v63 = vpop.f32.mrb[0].mxu0  ;;  %v4262_v0 = vpop.f32.mrb[0].mxu1 }
 0x123   : > { %v1211_v1 = vpop.f32.mrb[1].mxu0  ;;  %v1467_v3 = vpop.f32.mrb[1].mxu1  ;;  %v2494_v5 = vmul.f32 %v1209_v63, %v1209_v63 }
 0x124   : > { %v1212_v6 = vpop.f32.mrb[2].mxu0  ;;  %v4272_v8 = vpop.f32.mrb[2].mxu1  ;;  %v3988_v1 = vld [vmem:[%s4092_s7 + $0x3e0] ss:$8 sps:$4 sm:$0xff]   ;;  %v3941_v3 = vld [vmem:[%s4092_s7 + $0x1f4] ss:$8 sps:$4 sm:$0xff]  }
 0x125   : > { %v3347_v9 = vpack.c.bf16 %v1212_v6, %v1209_v63  ;;  %v2360_v10 = vadd.f32 %v1212_v6, %v1209_v63  ;;  %v2495_v11 = vmul.f32 %v1212_v6, %v1212_v6  ;;  %v1214_v12 = vpop.f32.mrb[3].mxu0  ;;  %v3507_v13 = vpack.c.bf16 %v4272_v8, %v4262_v0  ;;  %v1470_v14 = vpop.f32.mrb[3].mxu1 }
 0x126   : > { %v3989_v14 = vld [vmem:[%s4092_s7 + $0x3f4] ss:$8 sps:$4 sm:$0xff]  }
 0x127   : > { %3348 = vst [vmem:[%s4269_s13] sm:$0xff] %v3347_v9   ;;  %v2622_v15 = vadd.f32 %v2495_v11, %v2494_v5  ;;  %1424 = vmatmul.mubr.bf16.gmra.mrb[108].mxu0 %v3919_v2  ;;  %3695 = vst [vmem:[%s4269_s13 + $0x100] sm:$0xff] %v3507_v13   ;;  %1680 = vmatmul.mubr.bf16.gmra.mrb[108].mxu1 %v3979_v4 }
 0x128   : > { %1431 = vmatprep.mubr.bf16.mxu0 %v3923_v7  ;;  %1687 = vmatprep.mubr.bf16.mxu1 %v3980_v16 }
 0x12a   : > { %v1217_v17 = vpop.f32.mrb[4].mxu0  ;;  %v4279_v18 = vpop.f32.mrb[4].mxu1 }
 0x12b   : > { %v2361_v19 = vadd.f32 %v2360_v10, %v1217_v17  ;;  %v2496_v20 = vmul.f32 %v1217_v17, %v1217_v17  ;;  %v1219_v21 = vpop.f32.mrb[5].mxu0  ;;  %v1475_v23 = vpop.f32.mrb[5].mxu1 }
 0x12c   : > { %v1220_v25 = vpop.f32.mrb[6].mxu0  ;;  %v4284_v27 = vpop.f32.mrb[6].mxu1  ;;  %v3943_v21 = vld [vmem:[%s4092_s7 + $0x1f0] ss:$8 sps:$4 sm:$0xff]  }
 0x12d   : > { %v2623_v28 = vadd.f32 %v2622_v15, %v2496_v20  ;;  %v3352_v29 = vpack.c.bf16 %v1220_v25, %v1217_v17  ;;  %v2362_v30 = vadd.f32 %v2361_v19, %v1220_v25  ;;  %v2497_v31 = vmul.f32 %v1220_v25, %v1220_v25  ;;  %v1222_v32 = vpop.f32.mrb[7].mxu0  ;;  %v1478_v33 = vpop.f32.mrb[7].mxu1  ;;  %v3991_v23 = vld [vmem:[%s4092_s7 + $0x3f0] ss:$8 sps:$4 sm:$0xff]  }
 0x12e   : > { %v3512_v34 = vpack.c.bf16 %v4284_v27, %v4279_v18 }
 0x12f   : > { %3664 = vst [vmem:[%s4269_s13 + $0x8] sm:$0xff] %v3352_v29   ;;  %v2624_v35 = vadd.f32 %v2623_v28, %v2497_v31  ;;  %1432 = vmatmul.mubr.bf16.gmra.mrb[112].mxu0 %v3925_v22  ;;  %1688 = vmatmul.mubr.bf16.gmra.mrb[112].mxu1 %v3982_v24 }
 0x130   : > { %1439 = vmatprep.mubr.bf16.mxu0 %v3929_v26  ;;  %3696 = vst [vmem:[%s4269_s13 + $0x108] sm:$0xff] %v3512_v34   ;;  %1695 = vmatprep.mubr.bf16.mxu1 %v3983_v36 }
 0x132   : > { %v1225_v37 = vpop.f32.mrb[8].mxu0  ;;  %v4291_v38 = vpop.f32.mrb[8].mxu1 }
 0x133   : > { %v2363_v39 = vadd.f32 %v2362_v30, %v1225_v37  ;;  %v2498_v40 = vmul.f32 %v1225_v37, %v1225_v37  ;;  %v1227_v41 = vpop.f32.mrb[9].mxu0  ;;  %v1483_v43 = vpop.f32.mrb[9].mxu1 }
 0x134   : > { %v1228_v45 = vpop.f32.mrb[10].mxu0  ;;  %v4296_v47 = vpop.f32.mrb[10].mxu1 }
 0x135   : > { %v2625_v48 = vadd.f32 %v2624_v35, %v2498_v40  ;;  %v3357_v49 = vpack.c.bf16 %v1228_v45, %v1225_v37  ;;  %v2364_v50 = vadd.f32 %v2363_v39, %v1228_v45  ;;  %v2499_v51 = vmul.f32 %v1228_v45, %v1228_v45  ;;  %v1230_v52 = vpop.f32.mrb[11].mxu0  ;;  %v1486_v53 = vpop.f32.mrb[11].mxu1 }
 0x136   : > { %v3517_v54 = vpack.c.bf16 %v4296_v47, %v4291_v38 }
 0x137   : > { %3665 = vst [vmem:[%s4269_s13 + $0x10] sm:$0xff] %v3357_v49   ;;  %v2626_v55 = vadd.f32 %v2625_v48, %v2499_v51  ;;  %1440 = vmatmul.mubr.bf16.gmra.mrb[116].mxu0 %v3931_v42  ;;  %1696 = vmatmul.mubr.bf16.gmra.mrb[116].mxu1 %v3985_v44 }
 0x138   : > { %1447 = vmatprep.mubr.bf16.mxu0 %v3935_v46  ;;  %3697 = vst [vmem:[%s4269_s13 + $0x110] sm:$0xff] %v3517_v54   ;;  %1703 = vmatprep.mubr.bf16.mxu1 %v3986_v56 }
 0x13a   : > { %v1233_v57 = vpop.f32.mrb[12].mxu0  ;;  %v4303_v58 = vpop.f32.mrb[12].mxu1 }
 0x13b   : > { %v2365_v59 = vadd.f32 %v2364_v50, %v1233_v57  ;;  %v2500_v60 = vmul.f32 %v1233_v57, %v1233_v57  ;;  %v1235_v61 = vpop.f32.mrb[13].mxu0  ;;  %v1491_v63 = vpop.f32.mrb[13].mxu1 }
 0x13c   : > { %v1236_v2 = vpop.f32.mrb[14].mxu0  ;;  %v4308_v4 = vpop.f32.mrb[14].mxu1 }
 0x13d   : > { %v2627_v5 = vadd.f32 %v2626_v55, %v2500_v60  ;;  %v3362_v6 = vpack.c.bf16 %v1236_v2, %v1233_v57  ;;  %v2366_v7 = vadd.f32 %v2365_v59, %v1236_v2  ;;  %v2501_v9 = vmul.f32 %v1236_v2, %v1236_v2  ;;  %v1238_v10 = vpop.f32.mrb[15].mxu0  ;;  %v1494_v11 = vpop.f32.mrb[15].mxu1 }
 0x13e   : > { %v3522_v12 = vpack.c.bf16 %v4308_v4, %v4303_v58 }
 0x13f   : > { %3666 = vst [vmem:[%s4269_s13 + $0x18] sm:$0xff] %v3362_v6   ;;  %v2628_v13 = vadd.f32 %v2627_v5, %v2501_v9  ;;  %1448 = vmatmul.mubr.bf16.gmra.mrb[120].mxu0 %v3937_v62  ;;  %1704 = vmatmul.mubr.bf16.gmra.mrb[120].mxu1 %v3988_v1 }
 0x140   : > { %1455 = vmatprep.mubr.bf16.mxu0 %v3941_v3  ;;  %3698 = vst [vmem:[%s4269_s13 + $0x118] sm:$0xff] %v3522_v12   ;;  %1711 = vmatprep.mubr.bf16.mxu1 %v3989_v14 }
 0x142   : > { %v1241_v15 = vpop.f32.mrb[16].mxu0  ;;  %v4315_v16 = vpop.f32.mrb[16].mxu1 }
 0x143   : > { %v2367_v17 = vadd.f32 %v2366_v7, %v1241_v15  ;;  %v2502_v19 = vmul.f32 %v1241_v15, %v1241_v15  ;;  %v1243_v20 = vpop.f32.mrb[17].mxu0  ;;  %v1499_v22 = vpop.f32.mrb[17].mxu1 }
 0x144   : > { %v1244_v24 = vpop.f32.mrb[18].mxu0  ;;  %v4319_v25 = vpop.f32.mrb[18].mxu1 }
 0x145   : > { %v2629_v26 = vadd.f32 %v2628_v13, %v2502_v19  ;;  %v3367_v28 = vpack.c.bf16 %v1244_v24, %v1241_v15  ;;  %v2368_v29 = vadd.f32 %v2367_v17, %v1244_v24  ;;  %v2503_v30 = vmul.f32 %v1244_v24, %v1244_v24  ;;  %v1246_v31 = vpop.f32.mrb[19].mxu0  ;;  %v1502_v32 = vpop.f32.mrb[19].mxu1 }
 0x146   : > { %v3527_v33 = vpack.c.bf16 %v4319_v25, %v4315_v16 }
 0x147   : > { %3667 = vst [vmem:[%s4269_s13 + $0x20] sm:$0xff] %v3367_v28   ;;  %v2630_v34 = vadd.f32 %v2629_v26, %v2503_v30  ;;  %1456 = vmatmul.mubr.bf16.gmra.mrb[124].mxu0 %v3943_v21  ;;  %1712 = vmatmul.mubr.bf16.gmra.mrb[124].mxu1 %v3991_v23 }
 0x148   : > { %3699 = vst [vmem:[%s4269_s13 + $0x120] sm:$0xff] %v3527_v33  }
 0x14a   : > { %v1249_v35 = vpop.f32.mrb[20].mxu0  ;;  %v4325_v36 = vpop.f32.mrb[20].mxu1 }
 0x14b   : > { %v2369_v37 = vadd.f32 %v2368_v29, %v1249_v35  ;;  %v2504_v39 = vmul.f32 %v1249_v35, %v1249_v35  ;;  %v1251_v40 = vpop.f32.mrb[21].mxu0  ;;  %v1507_v41 = vpop.f32.mrb[21].mxu1 }
 0x14c   : > { %v1252_v42 = vpop.f32.mrb[22].mxu0  ;;  %v4327_v43 = vpop.f32.mrb[22].mxu1 }
 0x14d   : > { %v2631_v44 = vadd.f32 %v2630_v34, %v2504_v39  ;;  %v3372_v45 = vpack.c.bf16 %v1252_v42, %v1249_v35  ;;  %v2370_v46 = vadd.f32 %v2369_v37, %v1252_v42  ;;  %v2505_v48 = vmul.f32 %v1252_v42, %v1252_v42  ;;  %v1254_v49 = vpop.f32.mrb[23].mxu0  ;;  %v1510_v50 = vpop.f32.mrb[23].mxu1 }
 0x14e   : > { %v3532_v51 = vpack.c.bf16 %v4327_v43, %v4325_v36 }
 0x14f   : > { %3668 = vst [vmem:[%s4269_s13 + $0x28] sm:$0xff] %v3372_v45   ;;  %v2632_v52 = vadd.f32 %v2631_v44, %v2505_v48 }
 0x150   : > { %3700 = vst [vmem:[%s4269_s13 + $0x128] sm:$0xff] %v3532_v51  }
 0x152   : > { %v1257_v53 = vpop.f32.mrb[24].mxu0  ;;  %v4333_v54 = vpop.f32.mrb[24].mxu1 }
 0x153   : > { %v2371_v55 = vadd.f32 %v2370_v46, %v1257_v53  ;;  %v2506_v56 = vmul.f32 %v1257_v53, %v1257_v53  ;;  %v1259_v57 = vpop.f32.mrb[25].mxu0  ;;  %v1515_v59 = vpop.f32.mrb[25].mxu1 }
 0x154   : > { %v1260_v60 = vpop.f32.mrb[26].mxu0  ;;  %v4335_v61 = vpop.f32.mrb[26].mxu1 }
 0x155   : > { %v2633_v62 = vadd.f32 %v2632_v52, %v2506_v56  ;;  %v3377_v63 = vpack.c.bf16 %v1260_v60, %v1257_v53  ;;  %v2372_v1 = vadd.f32 %v2371_v55, %v1260_v60  ;;  %v2507_v2 = vmul.f32 %v1260_v60, %v1260_v60  ;;  %v1262_v3 = vpop.f32.mrb[27].mxu0  ;;  %v1518_v5 = vpop.f32.mrb[27].mxu1 }
 0x156   : > { %v3537_v6 = vpack.c.bf16 %v4335_v61, %v4333_v54 }
 0x157   : > { %3669 = vst [vmem:[%s4269_s13 + $0x30] sm:$0xff] %v3377_v63   ;;  %v2634_v7 = vadd.f32 %v2633_v62, %v2507_v2 }
 0x158   : > { %3701 = vst [vmem:[%s4269_s13 + $0x130] sm:$0xff] %v3537_v6  }
 0x15a   : > { %v1265_v9 = vpop.f32.mrb[28].mxu0  ;;  %v4341_v10 = vpop.f32.mrb[28].mxu1 }
 0x15b   : > { %v2373_v11 = vadd.f32 %v2372_v1, %v1265_v9  ;;  %v2508_v12 = vmul.f32 %v1265_v9, %v1265_v9  ;;  %v1267_v13 = vpop.f32.mrb[29].mxu0  ;;  %v1523_v14 = vpop.f32.mrb[29].mxu1 }
 0x15c   : > { %v1268_v15 = vpop.f32.mrb[30].mxu0  ;;  %v4343_v17 = vpop.f32.mrb[30].mxu1 }
 0x15d   : > { %v2635_v19 = vadd.f32 %v2634_v7, %v2508_v12  ;;  %v3382_v20 = vpack.c.bf16 %v1268_v15, %v1265_v9  ;;  %v2374_v21 = vadd.f32 %v2373_v11, %v1268_v15  ;;  %v2509_v22 = vmul.f32 %v1268_v15, %v1268_v15  ;;  %v1270_v23 = vpop.f32.mrb[31].mxu0  ;;  %v1526_v24 = vpop.f32.mrb[31].mxu1 }
 0x15e   : > { %v3542_v26 = vpack.c.bf16 %v4343_v17, %v4341_v10 }
 0x15f   : > { %3670 = vst [vmem:[%s4269_s13 + $0x38] sm:$0xff] %v3382_v20   ;;  %v2636_v28 = vadd.f32 %v2635_v19, %v2509_v22 }
 0x160   : > { %3702 = vst [vmem:[%s4269_s13 + $0x138] sm:$0xff] %v3542_v26  }
 0x162   : > { %v1273_v29 = vpop.f32.mrb[32].mxu0  ;;  %v4349_v30 = vpop.f32.mrb[32].mxu1 }
 0x163   : > { %v2375_v31 = vadd.f32 %v2374_v21, %v1273_v29  ;;  %v2510_v32 = vmul.f32 %v1273_v29, %v1273_v29  ;;  %v1275_v33 = vpop.f32.mrb[33].mxu0  ;;  %v1531_v34 = vpop.f32.mrb[33].mxu1 }
 0x164   : > { %v1276_v35 = vpop.f32.mrb[34].mxu0  ;;  %v4351_v37 = vpop.f32.mrb[34].mxu1 }
 0x165   : > { %v2637_v39 = vadd.f32 %v2636_v28, %v2510_v32  ;;  %v3387_v40 = vpack.c.bf16 %v1276_v35, %v1273_v29  ;;  %v2376_v41 = vadd.f32 %v2375_v31, %v1276_v35  ;;  %v2511_v42 = vmul.f32 %v1276_v35, %v1276_v35  ;;  %v1278_v44 = vpop.f32.mrb[35].mxu0  ;;  %v1534_v45 = vpop.f32.mrb[35].mxu1 }
 0x166   : > { %v3547_v46 = vpack.c.bf16 %v4351_v37, %v4349_v30 }
 0x167   : > { %3671 = vst [vmem:[%s4269_s13 + $0x40] sm:$0xff] %v3387_v40   ;;  %v2638_v48 = vadd.f32 %v2637_v39, %v2511_v42 }
 0x168   : > { %3703 = vst [vmem:[%s4269_s13 + $0x140] sm:$0xff] %v3547_v46  }
 0x16a   : > { %v1281_v49 = vpop.f32.mrb[36].mxu0  ;;  %v4357_v50 = vpop.f32.mrb[36].mxu1 }
 0x16b   : > { %v2377_v51 = vadd.f32 %v2376_v41, %v1281_v49  ;;  %v2512_v52 = vmul.f32 %v1281_v49, %v1281_v49  ;;  %v1283_v53 = vpop.f32.mrb[37].mxu0  ;;  %v1539_v55 = vpop.f32.mrb[37].mxu1 }
 0x16c   : > { %v1284_v56 = vpop.f32.mrb[38].mxu0  ;;  %v4359_v57 = vpop.f32.mrb[38].mxu1 }
 0x16d   : > { %v2639_v59 = vadd.f32 %v2638_v48, %v2512_v52  ;;  %v3392_v60 = vpack.c.bf16 %v1284_v56, %v1281_v49  ;;  %v2378_v62 = vadd.f32 %v2377_v51, %v1284_v56  ;;  %v2513_v63 = vmul.f32 %v1284_v56, %v1284_v56  ;;  %v1286_v1 = vpop.f32.mrb[39].mxu0  ;;  %v1542_v2 = vpop.f32.mrb[39].mxu1 }
 0x16e   : > { %v3552_v3 = vpack.c.bf16 %v4359_v57, %v4357_v50 }
 0x16f   : > { %3672 = vst [vmem:[%s4269_s13 + $0x48] sm:$0xff] %v3392_v60   ;;  %v2640_v5 = vadd.f32 %v2639_v59, %v2513_v63 }
 0x170   : > { %3704 = vst [vmem:[%s4269_s13 + $0x148] sm:$0xff] %v3552_v3  }
 0x172   : > { %v1289_v6 = vpop.f32.mrb[40].mxu0  ;;  %v4365_v7 = vpop.f32.mrb[40].mxu1 }
 0x173   : > { %v2379_v9 = vadd.f32 %v2378_v62, %v1289_v6  ;;  %v2514_v11 = vmul.f32 %v1289_v6, %v1289_v6  ;;  %v1291_v12 = vpop.f32.mrb[41].mxu0  ;;  %v1547_v13 = vpop.f32.mrb[41].mxu1 }
 0x174   : > { %v1292_v14 = vpop.f32.mrb[42].mxu0  ;;  %v4367_v15 = vpop.f32.mrb[42].mxu1 }
 0x175   : > { %v2641_v19 = vadd.f32 %v2640_v5, %v2514_v11  ;;  %v3397_v20 = vpack.c.bf16 %v1292_v14, %v1289_v6  ;;  %v2380_v21 = vadd.f32 %v2379_v9, %v1292_v14  ;;  %v2515_v22 = vmul.f32 %v1292_v14, %v1292_v14  ;;  %v1294_v23 = vpop.f32.mrb[43].mxu0  ;;  %v1550_v24 = vpop.f32.mrb[43].mxu1 }
 0x176   : > { %v3557_v26 = vpack.c.bf16 %v4367_v15, %v4365_v7 }
 0x177   : > { %3673 = vst [vmem:[%s4269_s13 + $0x50] sm:$0xff] %v3397_v20   ;;  %v2642_v28 = vadd.f32 %v2641_v19, %v2515_v22 }
 0x178   : > { %3705 = vst [vmem:[%s4269_s13 + $0x150] sm:$0xff] %v3557_v26  }
 0x17a   : > { %v1297_v29 = vpop.f32.mrb[44].mxu0  ;;  %v4373_v31 = vpop.f32.mrb[44].mxu1 }
 0x17b   : > { %v2381_v32 = vadd.f32 %v2380_v21, %v1297_v29  ;;  %v2516_v33 = vmul.f32 %v1297_v29, %v1297_v29  ;;  %v1299_v34 = vpop.f32.mrb[45].mxu0  ;;  %v1555_v35 = vpop.f32.mrb[45].mxu1 }
 0x17c   : > { %v1300_v39 = vpop.f32.mrb[46].mxu0  ;;  %v4375_v40 = vpop.f32.mrb[46].mxu1 }
 0x17d   : > { %v2643_v41 = vadd.f32 %v2642_v28, %v2516_v33  ;;  %v3402_v42 = vpack.c.bf16 %v1300_v39, %v1297_v29  ;;  %v2382_v44 = vadd.f32 %v2381_v32, %v1300_v39  ;;  %v2517_v45 = vmul.f32 %v1300_v39, %v1300_v39  ;;  %v1302_v46 = vpop.f32.mrb[47].mxu0  ;;  %v1558_v48 = vpop.f32.mrb[47].mxu1 }
 0x17e   : > { %v3562_v49 = vpack.c.bf16 %v4375_v40, %v4373_v31 }
 0x17f   : > { %3674 = vst [vmem:[%s4269_s13 + $0x58] sm:$0xff] %v3402_v42   ;;  %v2644_v51 = vadd.f32 %v2643_v41, %v2517_v45 }
 0x180   : > { %3706 = vst [vmem:[%s4269_s13 + $0x158] sm:$0xff] %v3562_v49  }
 0x182   : > { %v1305_v52 = vpop.f32.mrb[48].mxu0  ;;  %v4381_v53 = vpop.f32.mrb[48].mxu1 }
 0x183   : > { %v2383_v55 = vadd.f32 %v2382_v44, %v1305_v52  ;;  %v2518_v56 = vmul.f32 %v1305_v52, %v1305_v52  ;;  %v1307_v59 = vpop.f32.mrb[49].mxu0  ;;  %v1563_v60 = vpop.f32.mrb[49].mxu1 }
 0x184   : > { %v1308_v62 = vpop.f32.mrb[50].mxu0  ;;  %v4383_v63 = vpop.f32.mrb[50].mxu1 }
 0x185   : > { %v2645_v1 = vadd.f32 %v2644_v51, %v2518_v56  ;;  %v3407_v2 = vpack.c.bf16 %v1308_v62, %v1305_v52  ;;  %v2384_v3 = vadd.f32 %v2383_v55, %v1308_v62  ;;  %v2519_v5 = vmul.f32 %v1308_v62, %v1308_v62  ;;  %v1310_v6 = vpop.f32.mrb[51].mxu0  ;;  %v1566_v9 = vpop.f32.mrb[51].mxu1 }
 0x186   : > { %v3567_v11 = vpack.c.bf16 %v4383_v63, %v4381_v53 }
 0x187   : > { %3675 = vst [vmem:[%s4269_s13 + $0x60] sm:$0xff] %v3407_v2   ;;  %v2646_v12 = vadd.f32 %v2645_v1, %v2519_v5 }
 0x188   : > { %3707 = vst [vmem:[%s4269_s13 + $0x160] sm:$0xff] %v3567_v11  }
 0x18a   : > { %v1313_v13 = vpop.f32.mrb[52].mxu0  ;;  %v4389_v14 = vpop.f32.mrb[52].mxu1 }
 0x18b   : > { %v2385_v19 = vadd.f32 %v2384_v3, %v1313_v13  ;;  %v2520_v20 = vmul.f32 %v1313_v13, %v1313_v13  ;;  %v1315_v21 = vpop.f32.mrb[53].mxu0  ;;  %v1571_v22 = vpop.f32.mrb[53].mxu1 }
 0x18c   : > { %v1316_v23 = vpop.f32.mrb[54].mxu0  ;;  %v4391_v24 = vpop.f32.mrb[54].mxu1 }
 0x18d   : > { %v2647_v26 = vadd.f32 %v2646_v12, %v2520_v20  ;;  %v3412_v28 = vpack.c.bf16 %v1316_v23, %v1313_v13  ;;  %v2386_v29 = vadd.f32 %v2385_v19, %v1316_v23  ;;  %v2521_v32 = vmul.f32 %v1316_v23, %v1316_v23  ;;  %v1318_v33 = vpop.f32.mrb[55].mxu0  ;;  %v1574_v34 = vpop.f32.mrb[55].mxu1 }
 0x18e   : > { %v3572_v35 = vpack.c.bf16 %v4391_v24, %v4389_v14 }
 0x18f   : > { %3676 = vst [vmem:[%s4269_s13 + $0x68] sm:$0xff] %v3412_v28   ;;  %v2648_v39 = vadd.f32 %v2647_v26, %v2521_v32 }
 0x190   : > { %3708 = vst [vmem:[%s4269_s13 + $0x168] sm:$0xff] %v3572_v35  }
 0x192   : > { %v1321_v41 = vpop.f32.mrb[56].mxu0  ;;  %v4397_v42 = vpop.f32.mrb[56].mxu1 }
 0x193   : > { %v2387_v44 = vadd.f32 %v2386_v29, %v1321_v41  ;;  %v2522_v45 = vmul.f32 %v1321_v41, %v1321_v41  ;;  %v1323_v46 = vpop.f32.mrb[57].mxu0  ;;  %v1579_v48 = vpop.f32.mrb[57].mxu1 }
 0x194   : > { %v1324_v49 = vpop.f32.mrb[58].mxu0  ;;  %v4399_v51 = vpop.f32.mrb[58].mxu1 }
 0x195   : > { %v2649_v52 = vadd.f32 %v2648_v39, %v2522_v45  ;;  %v3417_v55 = vpack.c.bf16 %v1324_v49, %v1321_v41  ;;  %v2388_v56 = vadd.f32 %v2387_v44, %v1324_v49  ;;  %v2523_v59 = vmul.f32 %v1324_v49, %v1324_v49  ;;  %v1326_v60 = vpop.f32.mrb[59].mxu0  ;;  %v1582_v62 = vpop.f32.mrb[59].mxu1 }
 0x196   : > { %v3577_v1 = vpack.c.bf16 %v4399_v51, %v4397_v42 }
 0x197   : > { %3677 = vst [vmem:[%s4269_s13 + $0x70] sm:$0xff] %v3417_v55   ;;  %v2650_v2 = vadd.f32 %v2649_v52, %v2523_v59 }
 0x198   : > { %3709 = vst [vmem:[%s4269_s13 + $0x170] sm:$0xff] %v3577_v1  }
 0x19a   : > { %v1329_v3 = vpop.f32.mrb[60].mxu0  ;;  %v4405_v5 = vpop.f32.mrb[60].mxu1 }
 0x19b   : > { %v2389_v6 = vadd.f32 %v2388_v56, %v1329_v3  ;;  %v2524_v9 = vmul.f32 %v1329_v3, %v1329_v3  ;;  %v1331_v11 = vpop.f32.mrb[61].mxu0  ;;  %v1587_v12 = vpop.f32.mrb[61].mxu1 }
 0x19c   : > { %v1332_v13 = vpop.f32.mrb[62].mxu0  ;;  %v4407_v19 = vpop.f32.mrb[62].mxu1 }
 0x19d   : > { %v2651_v20 = vadd.f32 %v2650_v2, %v2524_v9  ;;  %v3422_v21 = vpack.c.bf16 %v1332_v13, %v1329_v3  ;;  %v2390_v22 = vadd.f32 %v2389_v6, %v1332_v13  ;;  %v2525_v23 = vmul.f32 %v1332_v13, %v1332_v13  ;;  %v1334_v26 = vpop.f32.mrb[63].mxu0  ;;  %v1590_v28 = vpop.f32.mrb[63].mxu1 }
 0x19e   : > { %v3582_v29 = vpack.c.bf16 %v4407_v19, %v4405_v5 }
 0x19f   : > { %3678 = vst [vmem:[%s4269_s13 + $0x78] sm:$0xff] %v3422_v21   ;;  %v2652_v32 = vadd.f32 %v2651_v20, %v2525_v23 }
 0x1a0   : > { %3710 = vst [vmem:[%s4269_s13 + $0x178] sm:$0xff] %v3582_v29  }
 0x1a2   : > { %v1337_v33 = vpop.f32.mrb[64].mxu0  ;;  %v4413_v34 = vpop.f32.mrb[64].mxu1 }
 0x1a3   : > { %v2391_v35 = vadd.f32 %v2390_v22, %v1337_v33  ;;  %v2526_v39 = vmul.f32 %v1337_v33, %v1337_v33  ;;  %v1339_v41 = vpop.f32.mrb[65].mxu0  ;;  %v1595_v44 = vpop.f32.mrb[65].mxu1 }
 0x1a4   : > { %v1340_v45 = vpop.f32.mrb[66].mxu0  ;;  %v4415_v46 = vpop.f32.mrb[66].mxu1 }
 0x1a5   : > { %v2653_v48 = vadd.f32 %v2652_v32, %v2526_v39  ;;  %v3427_v49 = vpack.c.bf16 %v1340_v45, %v1337_v33  ;;  %v2392_v52 = vadd.f32 %v2391_v35, %v1340_v45  ;;  %v2527_v55 = vmul.f32 %v1340_v45, %v1340_v45  ;;  %v1342_v56 = vpop.f32.mrb[67].mxu0  ;;  %v1598_v59 = vpop.f32.mrb[67].mxu1 }
 0x1a6   : > { %v3587_v60 = vpack.c.bf16 %v4415_v46, %v4413_v34 }
 0x1a7   : > { %3679 = vst [vmem:[%s4269_s13 + $0x80] sm:$0xff] %v3427_v49   ;;  %v2654_v62 = vadd.f32 %v2653_v48, %v2527_v55 }
 0x1a8   : > { %3711 = vst [vmem:[%s4269_s13 + $0x180] sm:$0xff] %v3587_v60  }
 0x1aa   : > { %v1345_v1 = vpop.f32.mrb[68].mxu0  ;;  %v4421_v2 = vpop.f32.mrb[68].mxu1 }
 0x1ab   : > { %v2393_v3 = vadd.f32 %v2392_v52, %v1345_v1  ;;  %v2528_v6 = vmul.f32 %v1345_v1, %v1345_v1  ;;  %v1347_v9 = vpop.f32.mrb[69].mxu0  ;;  %v1603_v11 = vpop.f32.mrb[69].mxu1 }
 0x1ac   : > { %v1348_v12 = vpop.f32.mrb[70].mxu0  ;;  %v4423_v13 = vpop.f32.mrb[70].mxu1 }
 0x1ad   : > { %v2655_v20 = vadd.f32 %v2654_v62, %v2528_v6  ;;  %v3432_v21 = vpack.c.bf16 %v1348_v12, %v1345_v1  ;;  %v2394_v22 = vadd.f32 %v2393_v3, %v1348_v12  ;;  %v2529_v23 = vmul.f32 %v1348_v12, %v1348_v12  ;;  %v1350_v26 = vpop.f32.mrb[71].mxu0  ;;  %v1606_v28 = vpop.f32.mrb[71].mxu1 }
 0x1ae   : > { %v3592_v29 = vpack.c.bf16 %v4423_v13, %v4421_v2 }
 0x1af   : > { %3680 = vst [vmem:[%s4269_s13 + $0x88] sm:$0xff] %v3432_v21   ;;  %v2656_v32 = vadd.f32 %v2655_v20, %v2529_v23 }
 0x1b0   : > { %3712 = vst [vmem:[%s4269_s13 + $0x188] sm:$0xff] %v3592_v29  }
 0x1b2   : > { %v1353_v33 = vpop.f32.mrb[72].mxu0  ;;  %v4429_v35 = vpop.f32.mrb[72].mxu1 }
 0x1b3   : > { %v2395_v39 = vadd.f32 %v2394_v22, %v1353_v33  ;;  %v2530_v41 = vmul.f32 %v1353_v33, %v1353_v33  ;;  %v1355_v44 = vpop.f32.mrb[73].mxu0  ;;  %v1611_v45 = vpop.f32.mrb[73].mxu1 }
 0x1b4   : > { %v1356_v48 = vpop.f32.mrb[74].mxu0  ;;  %v4431_v49 = vpop.f32.mrb[74].mxu1 }
 0x1b5   : > { %v2657_v52 = vadd.f32 %v2656_v32, %v2530_v41  ;;  %v3437_v55 = vpack.c.bf16 %v1356_v48, %v1353_v33  ;;  %v2396_v56 = vadd.f32 %v2395_v39, %v1356_v48  ;;  %v2531_v59 = vmul.f32 %v1356_v48, %v1356_v48  ;;  %v1358_v60 = vpop.f32.mrb[75].mxu0  ;;  %v1614_v62 = vpop.f32.mrb[75].mxu1 }
 0x1b6   : > { %v3597_v1 = vpack.c.bf16 %v4431_v49, %v4429_v35 }
 0x1b7   : > { %3681 = vst [vmem:[%s4269_s13 + $0x90] sm:$0xff] %v3437_v55   ;;  %v2658_v3 = vadd.f32 %v2657_v52, %v2531_v59 }
 0x1b8   : > { %3713 = vst [vmem:[%s4269_s13 + $0x190] sm:$0xff] %v3597_v1  }
 0x1ba   : > { %v1361_v6 = vpop.f32.mrb[76].mxu0  ;;  %v4437_v9 = vpop.f32.mrb[76].mxu1 }
 0x1bb   : > { %v2397_v11 = vadd.f32 %v2396_v56, %v1361_v6  ;;  %v2532_v12 = vmul.f32 %v1361_v6, %v1361_v6  ;;  %v1363_v20 = vpop.f32.mrb[77].mxu0  ;;  %v1619_v21 = vpop.f32.mrb[77].mxu1 }
 0x1bc   : > { %v1364_v22 = vpop.f32.mrb[78].mxu0  ;;  %v4439_v23 = vpop.f32.mrb[78].mxu1 }
 0x1bd   : > { %v2659_v26 = vadd.f32 %v2658_v3, %v2532_v12  ;;  %v3442_v28 = vpack.c.bf16 %v1364_v22, %v1361_v6  ;;  %v2398_v29 = vadd.f32 %v2397_v11, %v1364_v22  ;;  %v2533_v32 = vmul.f32 %v1364_v22, %v1364_v22  ;;  %v1366_v33 = vpop.f32.mrb[79].mxu0  ;;  %v1622_v39 = vpop.f32.mrb[79].mxu1 }
 0x1be   : > { %v3602_v41 = vpack.c.bf16 %v4439_v23, %v4437_v9 }
 0x1bf   : > { %3682 = vst [vmem:[%s4269_s13 + $0x98] sm:$0xff] %v3442_v28   ;;  %v2660_v44 = vadd.f32 %v2659_v26, %v2533_v32 }
 0x1c0   : > { %3714 = vst [vmem:[%s4269_s13 + $0x198] sm:$0xff] %v3602_v41  }
 0x1c2   : > { %v1369_v45 = vpop.f32.mrb[80].mxu0  ;;  %v4445_v48 = vpop.f32.mrb[80].mxu1 }
 0x1c3   : > { %v2399_v52 = vadd.f32 %v2398_v29, %v1369_v45  ;;  %v2534_v55 = vmul.f32 %v1369_v45, %v1369_v45  ;;  %v1371_v56 = vpop.f32.mrb[81].mxu0  ;;  %v1627_v59 = vpop.f32.mrb[81].mxu1 }
 0x1c4   : > { %v1372_v60 = vpop.f32.mrb[82].mxu0  ;;  %v4447_v62 = vpop.f32.mrb[82].mxu1 }
 0x1c5   : > { %v2661_v1 = vadd.f32 %v2660_v44, %v2534_v55  ;;  %v3447_v3 = vpack.c.bf16 %v1372_v60, %v1369_v45  ;;  %v2400_v6 = vadd.f32 %v2399_v52, %v1372_v60  ;;  %v2535_v11 = vmul.f32 %v1372_v60, %v1372_v60  ;;  %v1374_v12 = vpop.f32.mrb[83].mxu0  ;;  %v1630_v20 = vpop.f32.mrb[83].mxu1 }
 0x1c6   : > { %v3607_v21 = vpack.c.bf16 %v4447_v62, %v4445_v48 }
 0x1c7   : > { %3683 = vst [vmem:[%s4269_s13 + $0xa0] sm:$0xff] %v3447_v3   ;;  %v2662_v22 = vadd.f32 %v2661_v1, %v2535_v11 }
 0x1c8   : > { %3715 = vst [vmem:[%s4269_s13 + $0x1a0] sm:$0xff] %v3607_v21  }
 0x1ca   : > { %v1377_v26 = vpop.f32.mrb[84].mxu0  ;;  %v4453_v28 = vpop.f32.mrb[84].mxu1 }
 0x1cb   : > { %v2401_v29 = vadd.f32 %v2400_v6, %v1377_v26  ;;  %v2536_v32 = vmul.f32 %v1377_v26, %v1377_v26  ;;  %v1379_v33 = vpop.f32.mrb[85].mxu0  ;;  %v1635_v39 = vpop.f32.mrb[85].mxu1 }
 0x1cc   : > { %v1380_v41 = vpop.f32.mrb[86].mxu0  ;;  %v4455_v44 = vpop.f32.mrb[86].mxu1 }
 0x1cd   : > { %v2663_v45 = vadd.f32 %v2662_v22, %v2536_v32  ;;  %v3452_v52 = vpack.c.bf16 %v1380_v41, %v1377_v26  ;;  %v2402_v55 = vadd.f32 %v2401_v29, %v1380_v41  ;;  %v2537_v56 = vmul.f32 %v1380_v41, %v1380_v41  ;;  %v1382_v59 = vpop.f32.mrb[87].mxu0  ;;  %v1638_v60 = vpop.f32.mrb[87].mxu1 }
 0x1ce   : > { %v3612_v1 = vpack.c.bf16 %v4455_v44, %v4453_v28 }
 0x1cf   : > { %3684 = vst [vmem:[%s4269_s13 + $0xa8] sm:$0xff] %v3452_v52   ;;  %v2664_v3 = vadd.f32 %v2663_v45, %v2537_v56 }
 0x1d0   : > { %3716 = vst [vmem:[%s4269_s13 + $0x1a8] sm:$0xff] %v3612_v1  }
 0x1d2   : > { %v1385_v6 = vpop.f32.mrb[88].mxu0  ;;  %v4461_v11 = vpop.f32.mrb[88].mxu1 }
 0x1d3   : > { %4789 = vst [vmem:[#allocation2_spill] sm:$0xff] %v4461_v11  ;;  %v2403_v12 = vadd.f32 %v2402_v55, %v1385_v6  ;;  %v2538_v20 = vmul.f32 %v1385_v6, %v1385_v6  ;;  %v1387_v21 = vpop.f32.mrb[89].mxu0  ;;  %v1643_v22 = vpop.f32.mrb[89].mxu1 }
 0x1d4   : > { %v1388_v26 = vpop.f32.mrb[90].mxu0  ;;  %v4463_v29 = vpop.f32.mrb[90].mxu1 }
 0x1d5   : > { %4790 = vst [vmem:[#allocation3_spill] sm:$0xff] %v4463_v29  ;;  %v2665_v32 = vadd.f32 %v2664_v3, %v2538_v20  ;;  %v3457_v33 = vpack.c.bf16 %v1388_v26, %v1385_v6  ;;  %v2404_v39 = vadd.f32 %v2403_v12, %v1388_v26  ;;  %v2539_v41 = vmul.f32 %v1388_v26, %v1388_v26  ;;  %v1390_v59 = vpop.f32.mrb[91].mxu0  ;;  %v1646_v52 = vpop.f32.mrb[91].mxu1 }
 0x1d6   : > { %v3617_v45 = vpack.c.bf16 %v4463_v29, %v4461_v11 }
 0x1d7   : > { %3685 = vst [vmem:[%s4269_s13 + $0xb0] sm:$0xff] %v3457_v33   ;;  %v2666_v56 = vadd.f32 %v2665_v32, %v2539_v41 }
 0x1d8   : > { %3717 = vst [vmem:[%s4269_s13 + $0x1b0] sm:$0xff] %v3617_v45  }
 0x1da   : > { %v1393_v55 = vpop.f32.mrb[92].mxu0  ;;  %v4469_v60 = vpop.f32.mrb[92].mxu1 }
 0x1db   : > { %4791 = vst [vmem:[#allocation4_spill] sm:$0xff] %v4469_v60  ;;  %v2405_v1 = vadd.f32 %v2404_v39, %v1393_v55  ;;  %v2540_v21 = vmul.f32 %v1393_v55, %v1393_v55  ;;  %v1395_v22 = vpop.f32.mrb[93].mxu0  ;;  %v1651_v3 = vpop.f32.mrb[93].mxu1 }
 0x1dc   : > { %v1396_v6 = vpop.f32.mrb[94].mxu0  ;;  %v4471_v12 = vpop.f32.mrb[94].mxu1 }
 0x1dd   : > { %4792 = vst [vmem:[#allocation5_spill] sm:$0xff] %v4471_v12  ;;  %v2667_v20 = vadd.f32 %v2666_v56, %v2540_v21  ;;  %v3462_v26 = vpack.c.bf16 %v1396_v6, %v1393_v55  ;;  %v2406_v59 = vadd.f32 %v2405_v1, %v1396_v6  ;;  %v2541_v52 = vmul.f32 %v1396_v6, %v1396_v6  ;;  %v1398_v29 = vpop.f32.mrb[95].mxu0  ;;  %v1654_v33 = vpop.f32.mrb[95].mxu1 }
 0x1de   : > { %v3622_v32 = vpack.c.bf16 %v4471_v12, %v4469_v60 }
 0x1df   : > { %3686 = vst [vmem:[%s4269_s13 + $0xb8] sm:$0xff] %v3462_v26   ;;  %v2668_v41 = vadd.f32 %v2667_v20, %v2541_v52 }
 0x1e0   : > { %3718 = vst [vmem:[%s4269_s13 + $0x1b8] sm:$0xff] %v3622_v32  }
 0x1e2   : > { %v1401_v39 = vpop.f32.mrb[96].mxu0  ;;  %v4477_v45 = vpop.f32.mrb[96].mxu1 }
 0x1e3   : > { %4793 = vst [vmem:[#allocation6_spill] sm:$0xff] %v4477_v45  ;;  %v2407_v22 = vadd.f32 %v2406_v59, %v1401_v39  ;;  %v2542_v3 = vmul.f32 %v1401_v39, %v1401_v39  ;;  %v1403_v11 = vpop.f32.mrb[97].mxu0  ;;  %v1659_v56 = vpop.f32.mrb[97].mxu1 }
 0x1e4   : > { %v1404_v55 = vpop.f32.mrb[98].mxu0  ;;  %v4479_v1 = vpop.f32.mrb[98].mxu1 }
 0x1e5   : > { %4794 = vst [vmem:[#allocation7_spill] sm:$0xff] %v4479_v1  ;;  %v2669_v29 = vadd.f32 %v2668_v41, %v2542_v3  ;;  %v3467_v21 = vpack.c.bf16 %v1404_v55, %v1401_v39  ;;  %v2408_v6 = vadd.f32 %v2407_v22, %v1404_v55  ;;  %v2543_v33 = vmul.f32 %v1404_v55, %v1404_v55  ;;  %v1406_v12 = vpop.f32.mrb[99].mxu0  ;;  %v1662_v26 = vpop.f32.mrb[99].mxu1 }
 0x1e6   : > { %v3627_v20 = vpack.c.bf16 %v4479_v1, %v4477_v45 }
 0x1e7   : > { %3687 = vst [vmem:[%s4269_s13 + $0xc0] sm:$0xff] %v3467_v21   ;;  %v2670_v52 = vadd.f32 %v2669_v29, %v2543_v33 }
 0x1e8   : > { %3719 = vst [vmem:[%s4269_s13 + $0x1c0] sm:$0xff] %v3627_v20  }
 0x1ea   : > { %v1409_v59 = vpop.f32.mrb[100].mxu0  ;;  %v4485_v32 = vpop.f32.mrb[100].mxu1 }
 0x1eb   : > { %4795 = vst [vmem:[#allocation8_spill] sm:$0xff] %v4485_v32  ;;  %v2409_v11 = vadd.f32 %v2408_v6, %v1409_v59  ;;  %v2544_v56 = vmul.f32 %v1409_v59, %v1409_v59  ;;  %v1411_v60 = vpop.f32.mrb[101].mxu0  ;;  %v1667_v41 = vpop.f32.mrb[101].mxu1 }
 0x1ec   : > { %v1412_v39 = vpop.f32.mrb[102].mxu0  ;;  %v4487_v22 = vpop.f32.mrb[102].mxu1 }
 0x1ed   : > { %4796 = vst [vmem:[#allocation9_spill] sm:$0xff] %v4487_v22  ;;  %v2671_v12 = vadd.f32 %v2670_v52, %v2544_v56  ;;  %v3472_v3 = vpack.c.bf16 %v1412_v39, %v1409_v59  ;;  %v2410_v55 = vadd.f32 %v2409_v11, %v1412_v39  ;;  %v2545_v26 = vmul.f32 %v1412_v39, %v1412_v39  ;;  %v1414_v1 = vpop.f32.mrb[103].mxu0  ;;  %v1670_v21 = vpop.f32.mrb[103].mxu1 }
 0x1ee   : > { %v3632_v29 = vpack.c.bf16 %v4487_v22, %v4485_v32 }
 0x1ef   : > { %3688 = vst [vmem:[%s4269_s13 + $0xc8] sm:$0xff] %v3472_v3   ;;  %v2672_v33 = vadd.f32 %v2671_v12, %v2545_v26 }
 0x1f0   : > { %3720 = vst [vmem:[%s4269_s13 + $0x1c8] sm:$0xff] %v3632_v29  }
 0x1f2   : > { %v1417_v6 = vpop.f32.mrb[104].mxu0  ;;  %v4493_v20 = vpop.f32.mrb[104].mxu1 }
 0x1f3   : > { %4797 = vst [vmem:[#allocation10_spill] sm:$0xff] %v4493_v20  ;;  %v2411_v60 = vadd.f32 %v2410_v55, %v1417_v6  ;;  %v2546_v41 = vmul.f32 %v1417_v6, %v1417_v6  ;;  %v1419_v45 = vpop.f32.mrb[105].mxu0  ;;  %v1675_v52 = vpop.f32.mrb[105].mxu1 }
 0x1f4   : > { %v1420_v59 = vpop.f32.mrb[106].mxu0  ;;  %v4495_v11 = vpop.f32.mrb[106].mxu1 }
 0x1f5   : > { %4798 = vst [vmem:[#allocation11_spill] sm:$0xff] %v4495_v11  ;;  %v2673_v1 = vadd.f32 %v2672_v33, %v2546_v41  ;;  %v3477_v56 = vpack.c.bf16 %v1420_v59, %v1417_v6  ;;  %v2412_v39 = vadd.f32 %v2411_v60, %v1420_v59  ;;  %v2547_v21 = vmul.f32 %v1420_v59, %v1420_v59  ;;  %v1422_v22 = vpop.f32.mrb[107].mxu0  ;;  %v1678_v3 = vpop.f32.mrb[107].mxu1 }
 0x1f6   : > { %v3637_v12 = vpack.c.bf16 %v4495_v11, %v4493_v20 }
 0x1f7   : > { %3689 = vst [vmem:[%s4269_s13 + $0xd0] sm:$0xff] %v3477_v56   ;;  %v2674_v26 = vadd.f32 %v2673_v1, %v2547_v21 }
 0x1f8   : > { %3721 = vst [vmem:[%s4269_s13 + $0x1d0] sm:$0xff] %v3637_v12  }
 0x1fa   : > { %v1425_v55 = vpop.f32.mrb[108].mxu0  ;;  %v4501_v29 = vpop.f32.mrb[108].mxu1 }
 0x1fb   : > { %4799 = vst [vmem:[#allocation12_spill] sm:$0xff] %v4501_v29  ;;  %v2413_v45 = vadd.f32 %v2412_v39, %v1425_v55  ;;  %v2548_v52 = vmul.f32 %v1425_v55, %v1425_v55  ;;  %v1427_v32 = vpop.f32.mrb[109].mxu0  ;;  %v1683_v33 = vpop.f32.mrb[109].mxu1 }
 0x1fc   : > { %v1428_v6 = vpop.f32.mrb[110].mxu0  ;;  %v4503_v60 = vpop.f32.mrb[110].mxu1 }
 0x1fd   : > { %4800 = vst [vmem:[#allocation13_spill] sm:$0xff] %v4503_v60  ;;  %v2675_v22 = vadd.f32 %v2674_v26, %v2548_v52  ;;  %v3482_v41 = vpack.c.bf16 %v1428_v6, %v1425_v55  ;;  %v2414_v59 = vadd.f32 %v2413_v45, %v1428_v6  ;;  %v2549_v3 = vmul.f32 %v1428_v6, %v1428_v6  ;;  %v1430_v11 = vpop.f32.mrb[111].mxu0  ;;  %v1686_v56 = vpop.f32.mrb[111].mxu1 }
 0x1fe   : > { %v3642_v1 = vpack.c.bf16 %v4503_v60, %v4501_v29 }
 0x1ff   : > { %3690 = vst [vmem:[%s4269_s13 + $0xd8] sm:$0xff] %v3482_v41   ;;  %v2676_v21 = vadd.f32 %v2675_v22, %v2549_v3 }
 0x200   : > { %3722 = vst [vmem:[%s4269_s13 + $0x1d8] sm:$0xff] %v3642_v1  }
 0x202   : > { %v1433_v39 = vpop.f32.mrb[112].mxu0  ;;  %v4509_v12 = vpop.f32.mrb[112].mxu1 }
 0x203   : > { %4801 = vst [vmem:[#allocation14_spill] sm:$0xff] %v4509_v12  ;;  %v2415_v32 = vadd.f32 %v2414_v59, %v1433_v39  ;;  %v2550_v33 = vmul.f32 %v1433_v39, %v1433_v39  ;;  %v1435_v20 = vpop.f32.mrb[113].mxu0  ;;  %v1691_v26 = vpop.f32.mrb[113].mxu1 }
 0x204   : > { %v1436_v55 = vpop.f32.mrb[114].mxu0  ;;  %v4511_v45 = vpop.f32.mrb[114].mxu1 }
 0x205   : > { %4802 = vst [vmem:[#allocation15_spill] sm:$0xff] %v4511_v45  ;;  %v2677_v11 = vadd.f32 %v2676_v21, %v2550_v33  ;;  %v3487_v52 = vpack.c.bf16 %v1436_v55, %v1433_v39  ;;  %v2416_v6 = vadd.f32 %v2415_v32, %v1436_v55  ;;  %v2551_v56 = vmul.f32 %v1436_v55, %v1436_v55  ;;  %v1438_v60 = vpop.f32.mrb[115].mxu0  ;;  %v1694_v41 = vpop.f32.mrb[115].mxu1 }
 0x206   : > { %v3647_v22 = vpack.c.bf16 %v4511_v45, %v4509_v12 }
 0x207   : > { %3691 = vst [vmem:[%s4269_s13 + $0xe0] sm:$0xff] %v3487_v52   ;;  %v2678_v3 = vadd.f32 %v2677_v11, %v2551_v56 }
 0x208   : > { %3723 = vst [vmem:[%s4269_s13 + $0x1e0] sm:$0xff] %v3647_v22  }
 0x20a   : > { %v1441_v59 = vpop.f32.mrb[116].mxu0  ;;  %v4517_v1 = vpop.f32.mrb[116].mxu1 }
 0x20b   : > { %4803 = vst [vmem:[#allocation16_spill] sm:$0xff] %v4517_v1  ;;  %v2417_v20 = vadd.f32 %v2416_v6, %v1441_v59  ;;  %v2552_v26 = vmul.f32 %v1441_v59, %v1441_v59  ;;  %v1443_v29 = vpop.f32.mrb[117].mxu0  ;;  %v1699_v21 = vpop.f32.mrb[117].mxu1 }
 0x20c   : > { %v1444_v39 = vpop.f32.mrb[118].mxu0  ;;  %v4519_v32 = vpop.f32.mrb[118].mxu1 }
 0x20d   : > { %4804 = vst [vmem:[#allocation17_spill] sm:$0xff] %v4519_v32  ;;  %v2679_v60 = vadd.f32 %v2678_v3, %v2552_v26  ;;  %v3492_v33 = vpack.c.bf16 %v1444_v39, %v1441_v59  ;;  %v2418_v55 = vadd.f32 %v2417_v20, %v1444_v39  ;;  %v2553_v41 = vmul.f32 %v1444_v39, %v1444_v39  ;;  %v1446_v45 = vpop.f32.mrb[119].mxu0  ;;  %v1702_v52 = vpop.f32.mrb[119].mxu1 }
 0x20e   : > { %v3652_v11 = vpack.c.bf16 %v4519_v32, %v4517_v1 }
 0x20f   : > { %3692 = vst [vmem:[%s4269_s13 + $0xe8] sm:$0xff] %v3492_v33   ;;  %v2680_v56 = vadd.f32 %v2679_v60, %v2553_v41 }
 0x210   : > { %3724 = vst [vmem:[%s4269_s13 + $0x1e8] sm:$0xff] %v3652_v11  }
 0x212   : > { %v1449_v6 = vpop.f32.mrb[120].mxu0  ;;  %v4525_v22 = vpop.f32.mrb[120].mxu1 }
 0x213   : > { %v2419_v29 = vadd.f32 %v2418_v55, %v1449_v6  ;;  %v2554_v21 = vmul.f32 %v1449_v6, %v1449_v6  ;;  %v1451_v12 = vpop.f32.mrb[121].mxu0  ;;  %v1707_v3 = vpop.f32.mrb[121].mxu1 }
 0x214   : > { %v1452_v59 = vpop.f32.mrb[122].mxu0  ;;  %v4527_v20 = vpop.f32.mrb[122].mxu1 }
 0x215   : > { %4805 = vst [vmem:[#allocation18_spill] sm:$0xff] %v4527_v20  ;;  %v2681_v45 = vadd.f32 %v2680_v56, %v2554_v21  ;;  %v3497_v26 = vpack.c.bf16 %v1452_v59, %v1449_v6  ;;  %v2420_v39 = vadd.f32 %v2419_v29, %v1452_v59  ;;  %v2555_v52 = vmul.f32 %v1452_v59, %v1452_v59  ;;  %v1454_v32 = vpop.f32.mrb[123].mxu0  ;;  %v1710_v33 = vpop.f32.mrb[123].mxu1 }
 0x216   : > { %v3657_v60 = vpack.c.bf16 %v4527_v20, %v4525_v22 }
 0x217   : > { %3693 = vst [vmem:[%s4269_s13 + $0xf0] sm:$0xff] %v3497_v26   ;;  %v2682_v41 = vadd.f32 %v2681_v45, %v2555_v52  ;;  %v2558_v52 = vmul.f32 %v4262_v0, %v4262_v0 }
 0x218   : > { %3725 = vst [vmem:[%s4269_s13 + $0x1f0] sm:$0xff] %v3657_v60   ;;  %v2559_v60 = vmul.f32 %v4272_v8, %v4272_v8 }
 0x21a   : > { %v1457_v11 = vpop.f32.mrb[124].mxu0  ;;  %v4533_v55 = vpop.f32.mrb[124].mxu1 }
 0x21b   : > { %v2421_v12 = vadd.f32 %v2420_v39, %v1457_v11  ;;  %v2556_v3 = vmul.f32 %v1457_v11, %v1457_v11  ;;  %v1459_v1 = vpop.f32.mrb[125].mxu0  ;;  %v1715_v56 = vpop.f32.mrb[125].mxu1 }
 0x21c   : > { %v1460_v6 = vpop.f32.mrb[126].mxu0  ;;  %v4535_v29 = vpop.f32.mrb[126].mxu1  ;;  %v2561_v56 = vmul.f32 %v4284_v27, %v4284_v27 }
 0x21d   : > { %v2683_v32 = vadd.f32 %v2682_v41, %v2556_v3  ;;  %v3502_v21 = vpack.c.bf16 %v1460_v6, %v1457_v11  ;;  %v2422_v59 = vadd.f32 %v2421_v12, %v1460_v6  ;;  %v2557_v33 = vmul.f32 %v1460_v6, %v1460_v6  ;;  %v1462_v20 = vpop.f32.mrb[127].mxu0  ;;  %v1718_v26 = vpop.f32.mrb[127].mxu1 }
 0x21e   : > { %v3662_v45 = vpack.c.bf16 %v4535_v29, %v4533_v55  ;;  %v2560_v20 = vmul.f32 %v4279_v18, %v4279_v18 }
 0x21f   : > { %3694 = vst [vmem:[%s4269_s13 + $0xf8] sm:$0xff] %v3502_v21   ;;  %v2423_v39 = vadd.f32 %v2422_v59, %v4262_v0  ;;  %v2684_v1 = vadd.f32 %v2683_v32, %v2557_v33  ;;  %v2562_v32 = vmul.f32 %v4291_v38, %v4291_v38 }
 0x220   : > { %3726 = vst [vmem:[%s4269_s13 + $0x1f8] sm:$0xff] %v3662_v45  }
 0x221   : > { %v2424_v41 = vadd.f32 %v2423_v39, %v4272_v8  ;;  %v2685_v11 = vadd.f32 %v2684_v1, %v2558_v52  ;;  %v2563_v8 = vmul.f32 %v4296_v47, %v4296_v47 }
 0x223   : > { %v2425_v12 = vadd.f32 %v2424_v41, %v4279_v18  ;;  %v2686_v3 = vadd.f32 %v2685_v11, %v2559_v60  ;;  %v2564_v18 = vmul.f32 %v4303_v58, %v4303_v58 }
 0x225   : > { %v2426_v6 = vadd.f32 %v2425_v12, %v4284_v27  ;;  %v2687_v0 = vadd.f32 %v2686_v3, %v2560_v20  ;;  %v2565_v27 = vmul.f32 %v4308_v4, %v4308_v4 }
 0x227   : > { %v2427_v21 = vadd.f32 %v2426_v6, %v4291_v38  ;;  %v2688_v59 = vadd.f32 %v2687_v0, %v2561_v56  ;;  %v2566_v38 = vmul.f32 %v4315_v16, %v4315_v16 }
 0x229   : > { %v2428_v33 = vadd.f32 %v2427_v21, %v4296_v47  ;;  %v2689_v26 = vadd.f32 %v2688_v59, %v2562_v32  ;;  %v2567_v47 = vmul.f32 %v4319_v25, %v4319_v25 }
 0x22b   : > { %v2429_v45 = vadd.f32 %v2428_v33, %v4303_v58  ;;  %v2690_v52 = vadd.f32 %v2689_v26, %v2563_v8  ;;  %v2568_v58 = vmul.f32 %v4325_v36, %v4325_v36 }
 0x22d   : > { %v2430_v39 = vadd.f32 %v2429_v45, %v4308_v4  ;;  %v2691_v1 = vadd.f32 %v2690_v52, %v2564_v18  ;;  %v2569_v4 = vmul.f32 %v4327_v43, %v4327_v43 }
 0x22f   : > { %v2431_v60 = vadd.f32 %v2430_v39, %v4315_v16  ;;  %v2692_v41 = vadd.f32 %v2691_v1, %v2565_v27  ;;  %v2570_v16 = vmul.f32 %v4333_v54, %v4333_v54 }
 0x231   : > { %v2432_v11 = vadd.f32 %v2431_v60, %v4319_v25  ;;  %v2693_v20 = vadd.f32 %v2692_v41, %v2566_v38  ;;  %v2571_v25 = vmul.f32 %v4335_v61, %v4335_v61 }
 0x233   : > { %v2433_v12 = vadd.f32 %v2432_v11, %v4325_v36  ;;  %v2694_v3 = vadd.f32 %v2693_v20, %v2567_v47  ;;  %v2572_v36 = vmul.f32 %v4341_v10, %v4341_v10 }
 0x235   : > { %v2434_v56 = vadd.f32 %v2433_v12, %v4327_v43  ;;  %v2695_v6 = vadd.f32 %v2694_v3, %v2568_v58  ;;  %v2573_v43 = vmul.f32 %v4343_v17, %v4343_v17 }
 0x237   : > { %v2435_v0 = vadd.f32 %v2434_v56, %v4333_v54  ;;  %v2696_v32 = vadd.f32 %v2695_v6, %v2569_v4  ;;  %v2574_v54 = vmul.f32 %v4349_v30, %v4349_v30 }
 0x239   : > { %v2436_v21 = vadd.f32 %v2435_v0, %v4335_v61  ;;  %v2697_v59 = vadd.f32 %v2696_v32, %v2570_v16  ;;  %v2575_v61 = vmul.f32 %v4351_v37, %v4351_v37 }
 0x23b   : > { %v2437_v8 = vadd.f32 %v2436_v21, %v4341_v10  ;;  %v2698_v33 = vadd.f32 %v2697_v59, %v2571_v25  ;;  %v2576_v10 = vmul.f32 %v4357_v50, %v4357_v50 }
 0x23d   : > { %v2438_v26 = vadd.f32 %v2437_v8, %v4343_v17  ;;  %v2699_v18 = vadd.f32 %v2698_v33, %v2572_v36  ;;  %v2577_v17 = vmul.f32 %v4359_v57, %v4359_v57 }
 0x23f   : > { %v2439_v45 = vadd.f32 %v2438_v26, %v4349_v30  ;;  %v2700_v52 = vadd.f32 %v2699_v18, %v2573_v43  ;;  %v2578_v30 = vmul.f32 %v4365_v7, %v4365_v7 }
 0x241   : > { %v2701_v27 = vadd.f32 %v2700_v52, %v2574_v54  ;;  %v2440_v39 = vadd.f32 %v2439_v45, %v4351_v37  ;;  %v2579_v37 = vmul.f32 %v4367_v15, %v4367_v15 }
 0x243   : > { %v2441_v1 = vadd.f32 %v2440_v39, %v4357_v50  ;;  %v2702_v38 = vadd.f32 %v2701_v27, %v2575_v61  ;;  %v2580_v50 = vmul.f32 %v4373_v31, %v4373_v31  ;;  %v2590_v61 = vmul.f32 %v4413_v34, %v4413_v34 }
 0x245   : > { %v2442_v60 = vadd.f32 %v2441_v1, %v4359_v57  ;;  %v2703_v41 = vadd.f32 %v2702_v38, %v2576_v10  ;;  %v2581_v57 = vmul.f32 %v4375_v40, %v4375_v40  ;;  %v2591_v10 = vmul.f32 %v4415_v46, %v4415_v46 }
 0x246   : > { %v2592_v38 = vmul.f32 %v4421_v2, %v4421_v2 }
 0x247   : > { %v2443_v47 = vadd.f32 %v2442_v60, %v4365_v7  ;;  %v2704_v11 = vadd.f32 %v2703_v41, %v2577_v17  ;;  %v2582_v7 = vmul.f32 %v4381_v53, %v4381_v53  ;;  %v2593_v60 = vmul.f32 %v4423_v13, %v4423_v13 }
 0x249   : > { %v2444_v20 = vadd.f32 %v2443_v47, %v4367_v15  ;;  %v2705_v58 = vadd.f32 %v2704_v11, %v2578_v30  ;;  %v2583_v15 = vmul.f32 %v4383_v63, %v4383_v63  ;;  %v2594_v30 = vmul.f32 %v4429_v35, %v4429_v35 }
 0x24a   : > { %v2595_v11 = vmul.f32 %v4431_v49, %v4431_v49 }
 0x24b   : > { %v2445_v12 = vadd.f32 %v2444_v20, %v4373_v31  ;;  %v2706_v3 = vadd.f32 %v2705_v58, %v2579_v37  ;;  %v2584_v31 = vmul.f32 %v4389_v14, %v4389_v14  ;;  %v2596_v20 = vmul.f32 %v4437_v9, %v4437_v9 }
 0x24d   : > { %v2446_v4 = vadd.f32 %v2445_v12, %v4375_v40  ;;  %v2707_v56 = vadd.f32 %v2706_v3, %v2580_v50  ;;  %v2585_v40 = vmul.f32 %v4391_v24, %v4391_v24  ;;  %v2597_v50 = vmul.f32 %v4439_v23, %v4439_v23 }
 0x24e   : > { %v2598_v3 = vmul.f32 %v4445_v48, %v4445_v48 }
 0x24f   : > { %v2447_v6 = vadd.f32 %v2446_v4, %v4381_v53  ;;  %v2708_v16 = vadd.f32 %v2707_v56, %v2581_v57  ;;  %v2586_v53 = vmul.f32 %v4397_v42, %v4397_v42  ;;  %v2599_v4 = vmul.f32 %v4447_v62, %v4447_v62 }
 0x251   : > { %v2448_v0 = vadd.f32 %v2447_v6, %v4383_v63  ;;  %v2709_v32 = vadd.f32 %v2708_v16, %v2582_v7  ;;  %v2587_v63 = vmul.f32 %v4399_v51, %v4399_v51  ;;  %v2600_v7 = vmul.f32 %v4453_v28, %v4453_v28 }
 0x252   : > { %v2601_v16 = vmul.f32 %v4455_v44, %v4455_v44 }
 0x253   : > { %v2449_v25 = vadd.f32 %v2448_v0, %v4389_v14  ;;  %v2710_v21 = vadd.f32 %v2709_v32, %v2583_v15  ;;  %v2588_v14 = vmul.f32 %v4405_v5, %v4405_v5 }
 0x255   : > { %v2450_v59 = vadd.f32 %v2449_v25, %v4391_v24  ;;  %v2711_v36 = vadd.f32 %v2710_v21, %v2584_v31  ;;  %v2589_v24 = vmul.f32 %v4407_v19, %v4407_v19 }
 0x257   : > { %v2451_v8 = vadd.f32 %v2450_v59, %v4397_v42  ;;  %v2712_v33 = vadd.f32 %v2711_v36, %v2585_v40 }
 0x259   : > { %v2452_v43 = vadd.f32 %v2451_v8, %v4399_v51  ;;  %v2713_v26 = vadd.f32 %v2712_v33, %v2586_v53 }
 0x25b   : > { %v2453_v18 = vadd.f32 %v2452_v43, %v4405_v5  ;;  %v2714_v54 = vadd.f32 %v2713_v26, %v2587_v63  ;;  %v4810_v43 = vld [vmem:[#allocation6_spill] sm:$0xff] }
 0x25d   : > { %v2454_v45 = vadd.f32 %v2453_v18, %v4407_v19  ;;  %v2715_v52 = vadd.f32 %v2714_v54, %v2588_v14  ;;  %v2606_v14 = vmul.f32 %v4810_v43, %v4810_v43  ;;  %v4811_v54 = vld [vmem:[#allocation7_spill] sm:$0xff] }
 0x25f   : > { %v2455_v42 = vadd.f32 %v2454_v45, %v4413_v34  ;;  %v2716_v27 = vadd.f32 %v2715_v52, %v2589_v24  ;;  %v2607_v45 = vmul.f32 %v4811_v54, %v4811_v54 }
 0x261   : > { %v2717_v51 = vadd.f32 %v2716_v27, %v2590_v61  ;;  %v2456_v39 = vadd.f32 %v2455_v42, %v4415_v46  ;;  %v4812_v42 = vld [vmem:[#allocation8_spill] sm:$0xff] }
 0x262   : > { %v2608_v27 = vmul.f32 %v4812_v42, %v4812_v42 }
 0x263   : > { %v2718_v5 = vadd.f32 %v2717_v51, %v2591_v10  ;;  %v2457_v1 = vadd.f32 %v2456_v39, %v4421_v2  ;;  %v4813_v39 = vld [vmem:[#allocation9_spill] sm:$0xff] }
 0x265   : > { %v2719_v19 = vadd.f32 %v2718_v5, %v2592_v38  ;;  %v2458_v17 = vadd.f32 %v2457_v1, %v4423_v13  ;;  %v2609_v5 = vmul.f32 %v4813_v39, %v4813_v39  ;;  %v4814_v38 = vld [vmem:[#allocation10_spill] sm:$0xff] }
 0x267   : > { %v2720_v34 = vadd.f32 %v2719_v19, %v2593_v60  ;;  %v2459_v41 = vadd.f32 %v2458_v17, %v4429_v35  ;;  %v2610_v17 = vmul.f32 %v4814_v38, %v4814_v38 }
 0x269   : > { %v2721_v47 = vadd.f32 %v2720_v34, %v2594_v30  ;;  %v2460_v46 = vadd.f32 %v2459_v41, %v4431_v49  ;;  %v4815_v34 = vld [vmem:[#allocation11_spill] sm:$0xff] }
 0x26a   : > { %v2611_v30 = vmul.f32 %v4815_v34, %v4815_v34 }
 0x26b   : > { %v2722_v37 = vadd.f32 %v2721_v47, %v2595_v11  ;;  %v2461_v2 = vadd.f32 %v2460_v46, %v4437_v9  ;;  %v4816_v46 = vld [vmem:[#allocation12_spill] sm:$0xff] }
 0x26d   : > { %v2723_v58 = vadd.f32 %v2722_v37, %v2596_v20  ;;  %v2462_v13 = vadd.f32 %v2461_v2, %v4439_v23  ;;  %v2612_v37 = vmul.f32 %v4816_v46, %v4816_v46  ;;  %v4817_v20 = vld [vmem:[#allocation13_spill] sm:$0xff] }
 0x26f   : > { %v2724_v12 = vadd.f32 %v2723_v58, %v2597_v50  ;;  %v2463_v35 = vadd.f32 %v2462_v13, %v4445_v48  ;;  %v4806_v48 = vld [vmem:[#allocation2_spill] sm:$0xff]  ;;  %v2613_v13 = vmul.f32 %v4817_v20, %v4817_v20 }
 0x270   : > { %v2602_v32 = vmul.f32 %v4806_v48, %v4806_v48 }
 0x271   : > { %v2725_v57 = vadd.f32 %v2724_v12, %v2598_v3  ;;  %v2464_v49 = vadd.f32 %v2463_v35, %v4447_v62  ;;  %v4807_v62 = vld [vmem:[#allocation3_spill] sm:$0xff]  ;;  %v4818_v12 = vld [vmem:[#allocation14_spill] sm:$0xff] }
 0x272   : > { %v2603_v21 = vmul.f32 %v4807_v62, %v4807_v62  ;;  %v2614_v3 = vmul.f32 %v4818_v12, %v4818_v12 }
 0x273   : > { %v2726_v56 = vadd.f32 %v2725_v57, %v2599_v4  ;;  %v2465_v9 = vadd.f32 %v2464_v49, %v4453_v28  ;;  %v4808_v28 = vld [vmem:[#allocation4_spill] sm:$0xff]  ;;  %v4819_v49 = vld [vmem:[#allocation15_spill] sm:$0xff] }
 0x274   : > { %v2604_v36 = vmul.f32 %v4808_v28, %v4808_v28 }
 0x275   : > { %v2727_v6 = vadd.f32 %v2726_v56, %v2600_v7  ;;  %v2466_v23 = vadd.f32 %v2465_v9, %v4455_v44  ;;  %v4809_v44 = vld [vmem:[#allocation5_spill] sm:$0xff]  ;;  %v2615_v56 = vmul.f32 %v4819_v49, %v4819_v49  ;;  %v4820_v7 = vld [vmem:[#allocation16_spill] sm:$0xff] }
 0x276   : > { %v2605_v33 = vmul.f32 %v4809_v44, %v4809_v44 }
 0x277   : > { %v2728_v15 = vadd.f32 %v2727_v6, %v2601_v16  ;;  %v2467_v0 = vadd.f32 %v2466_v23, %v4806_v48  ;;  %v2616_v23 = vmul.f32 %v4820_v7, %v4820_v7 }
 0x279   : > { %v2729_v31 = vadd.f32 %v2728_v15, %v2602_v32  ;;  %v2468_v25 = vadd.f32 %v2467_v0, %v4807_v62  ;;  %v4821_v15 = vld [vmem:[#allocation17_spill] sm:$0xff]  ;;  %v2618_v62 = vmul.f32 %v4525_v22, %v4525_v22 }
 0x27a   : > { %v2617_v0 = vmul.f32 %v4821_v15, %v4821_v15 }
 0x27b   : > { %v2730_v40 = vadd.f32 %v2729_v31, %v2603_v21  ;;  %v2469_v59 = vadd.f32 %v2468_v25, %v4808_v28  ;;  %v4822_v21 = vld [vmem:[#allocation18_spill] sm:$0xff] }
 0x27c   : > { %v2619_v28 = vmul.f32 %v4822_v21, %v4822_v21 }
 0x27d   : > { %v2731_v53 = vadd.f32 %v2730_v40, %v2604_v36  ;;  %v2470_v8 = vadd.f32 %v2469_v59, %v4809_v44  ;;  %v2620_v59 = vmul.f32 %v4533_v55, %v4533_v55 }
 0x27f   : > { %v2732_v63 = vadd.f32 %v2731_v53, %v2605_v33  ;;  %v2471_v26 = vadd.f32 %v2470_v8, %v4810_v43  ;;  %v2621_v33 = vmul.f32 %v4535_v29, %v4535_v29 }
 0x281   : > { %v2733_v18 = vadd.f32 %v2732_v63, %v2606_v14  ;;  %v2472_v24 = vadd.f32 %v2471_v26, %v4811_v54 }
 0x283   : > { %v2734_v52 = vadd.f32 %v2733_v18, %v2607_v45  ;;  %v2473_v61 = vadd.f32 %v2472_v24, %v4812_v42 }
 0x285   : > { %v2735_v51 = vadd.f32 %v2734_v52, %v2608_v27  ;;  %v2474_v10 = vadd.f32 %v2473_v61, %v4813_v39 }
 0x287   : > { %v2736_v1 = vadd.f32 %v2735_v51, %v2609_v5  ;;  %v2475_v19 = vadd.f32 %v2474_v10, %v4814_v38 }
 0x289   : > { %v2737_v60 = vadd.f32 %v2736_v1, %v2610_v17  ;;  %v2476_v41 = vadd.f32 %v2475_v19, %v4815_v34 }
 0x28b   : > { %v2738_v47 = vadd.f32 %v2737_v60, %v2611_v30  ;;  %v2477_v11 = vadd.f32 %v2476_v41, %v4816_v46 }
 0x28d   : > { %v2739_v2 = vadd.f32 %v2738_v47, %v2612_v37  ;;  %v2478_v58 = vadd.f32 %v2477_v11, %v4817_v20 }
 0x28f   : > { %v2740_v50 = vadd.f32 %v2739_v2, %v2613_v13  ;;  %v2479_v35 = vadd.f32 %v2478_v58, %v4818_v12 }
 0x291   : > { %v2741_v57 = vadd.f32 %v2740_v50, %v2614_v3  ;;  %v2480_v4 = vadd.f32 %v2479_v35, %v4819_v49 }
 0x293   : > { %v2742_v9 = vadd.f32 %v2741_v57, %v2615_v56  ;;  %v2481_v6 = vadd.f32 %v2480_v4, %v4820_v7 }
 0x295   : > { %v2743_v16 = vadd.f32 %v2742_v9, %v2616_v23  ;;  %v2482_v48 = vadd.f32 %v2481_v6, %v4821_v15 }
 0x297   : > { %v2744_v32 = vadd.f32 %v2743_v16, %v2617_v0  ;;  %v2483_v31 = vadd.f32 %v2482_v48, %v4525_v22 }
 0x299   : > { %v2745_v25 = vadd.f32 %v2744_v32, %v2618_v62  ;;  %v2484_v40 = vadd.f32 %v2483_v31, %v4822_v21 }
 0x29b   : > { %v2746_v36 = vadd.f32 %v2745_v25, %v2619_v28  ;;  %v2485_v53 = vadd.f32 %v2484_v40, %v4533_v55 }
 0x29d   : > { %v2747_v44 = vadd.f32 %v2746_v36, %v2620_v59  ;;  %v2486_v8 = vadd.f32 %v2485_v53, %v4535_v29 }
 0x29f   : > { %v2487_v22 = vrot.slane %v2486_v8, 4  ;;  %v2748_v63 = vadd.f32 %v2747_v44, %v2621_v33 }
 0x2a1   : > { %v2488_v43 = vadd.f32 %v2487_v22, %v2486_v8  ;;  %v2749_v26 = vrot.slane %v2748_v63, 4 }
 0x2a3   : > { %v2489_v14 = vrot.slane %v2488_v43, 2  ;;  %v2750_v18 = vadd.f32 %v2749_v26, %v2748_v63 }
 0x2a5   : > { %v2490_v54 = vadd.f32 %v2489_v14, %v2488_v43  ;;  %v2751_v24 = vrot.slane %v2750_v18, 2 }
 0x2a7   : > { %v2491_v45 = vrot.slane %v2490_v54, 1  ;;  %v2752_v52 = vadd.f32 %v2751_v24, %v2750_v18 }
 0x2a9   : > { %v2492_v55 = vadd.f32 %v2491_v45, %v2490_v54  ;;  %v2753_v42 = vrot.slane %v2752_v52, 1 }
 0x2ab   : > { %2493 = vst [vmem:[%s270_s19] sm:$0xff] %v2492_v55  ;;  %v2754_v29 = vadd.f32 %v2753_v42, %v2752_v52 }
 0x2ad   : > { %2755 = vst [vmem:[%s277_s23] sm:$0xff] %v2754_v29 }
 0x2ae PF: > { %s15_s17 = sadd.s32 1, %s4014_s17   ;;  %s4823_s15 = smov %s4010_s16 }
 0x2af   : > { %p12_p6 = scmp.ge.s32.totalorder %s15_s17, 27   ;;  %s4824_s16 = smov %s4826_s18 }
 0x2b1   :  { %14 = sbr.rel (!%p12_p6) target bundleno = 2 (0x2), region = 85 }

// kernel: _conv_bn_jit.3
= control target key start
LH: loop header
LB: loop body
LE: loop exit
PB: predicated region body
PF: predicated region fallthrough
CT: control target
= control target key end

     0   :  { %s2533_s12 = smov 0   ;;  %s2965_s0 = inlined_call_operand.vmem [shape: bf16[25600,128], index: 0, kind: input, shape index: {}]   ;;  %s2966_s1 = inlined_call_operand.vmem [shape: f32[1,128], index: 1, kind: input, shape index: {}]   ;;  %s2967_s2 = inlined_call_operand.vmem [shape: f32[1,128], index: 2, kind: input, shape index: {}]   ;;  %s2968_s3 = inlined_call_operand.vmem [shape: bf16[25600,128], index: 3, kind: output, shape index: {}]  }
   0x1 LB: > { %s1524_s13 = sadd.s32 4294967295, %s2511_s12   ;;  %p1528_p0 = scmp.ge.s32.totalorder %s2511_s12, 1  ;;  %s2511_s12 = sphi %s2533_s12, %s13_s12  }
   0x2   : > { %p138_p1 = scmp.lt.s32.totalorder %s2511_s12, 26 }
   0x4   : > { %p139_p2 = pnand %p1528_p0, %p138_p1 }
   0x5   : > { %s1529_s14 = sshll.u32 (!%p139_p2), %s1524_s13, 7  ;;  %v2554_v0 = vld [vmem:[%s2966_s1] ss:$0 sm:$0xff] (!%p139_p2) }
   0x6   : > { %142 = sbr.rel (%p139_p2) target bundleno = 167 (0xa7), region = 32  ;;  %p163_p3 = scmp.lt.s32.totalorder (!%p139_p2), %s1529_s14, 3199  ;;  %v2563_v9 = vld [vmem:[%s2967_s2] ss:$0 sm:$0xff] (!%p139_p2) }
   0xd   : > { %s2970_s14 = smov (!%p163_p3, %s1529_s14), 3199 }
   0xe   : > { %s1530_s15 = sshll.u32 %s2970_s14, 2 }
   0xf   : > { %s2549_s18 = scalar_lea.vmem %s2965_s0, %s1530_s15  ;;  %s2588_s25 = scalar_lea.vmem %s2968_s3, %s1530_s15 }
  0x10   : > { %v1794_v1 = vld [vmem:[%s2549_s18] sm:$0xff]   ;;  %v2369_v2 = vld [vmem:[%s2549_s18 + $0x8] sm:$0xff]   ;;  %v2370_v3 = vld [vmem:[%s2549_s18 + $0x10] sm:$0xff]  }
  0x11   : > { %v1795_v4 = vunpack.c.l.bf16 %v1794_v1  ;;  %v1796_v5 = vunpack.c.h.bf16 %v1794_v1  ;;  %v1799_v6 = vunpack.c.l.bf16 %v2369_v2  ;;  %v1800_v7 = vunpack.c.h.bf16 %v2369_v2  ;;  %v2371_v8 = vld [vmem:[%s2549_s18 + $0x18] sm:$0xff]   ;;  %v2372_v30 = vld [vmem:[%s2549_s18 + $0x20] sm:$0xff]   ;;  %v2373_v35 = vld [vmem:[%s2549_s18 + $0x28] sm:$0xff]  }
  0x12   : > { %v1803_v10 = vunpack.c.l.bf16 %v2370_v3  ;;  %v1804_v11 = vunpack.c.h.bf16 %v2370_v3  ;;  %v1807_v12 = vunpack.c.l.bf16 %v2371_v8  ;;  %v1808_v13 = vunpack.c.h.bf16 %v2371_v8  ;;  %v2374_v40 = vld [vmem:[%s2549_s18 + $0x30] sm:$0xff]   ;;  %v2375_v45 = vld [vmem:[%s2549_s18 + $0x38] sm:$0xff]   ;;  %v2376_v3 = vld [vmem:[%s2549_s18 + $0x40] sm:$0xff]  }
  0x13   : > { %v437_v14 = vmul.f32 %v1795_v4, %v2554_v0  ;;  %v438_v15 = vmul.f32 %v1796_v5, %v2554_v0  ;;  %v439_v16 = vmul.f32 %v1799_v6, %v2554_v0  ;;  %v440_v17 = vmul.f32 %v1800_v7, %v2554_v0 }
  0x14   : > { %v441_v18 = vmul.f32 %v1803_v10, %v2554_v0  ;;  %v442_v19 = vmul.f32 %v1804_v11, %v2554_v0  ;;  %v443_v20 = vmul.f32 %v1807_v12, %v2554_v0  ;;  %v444_v21 = vmul.f32 %v1808_v13, %v2554_v0  ;;  %v2377_v13 = vld [vmem:[%s2549_s18 + $0x48] sm:$0xff]  }
  0x15   : > { %v572_v22 = vadd.f32 %v2563_v9, %v437_v14  ;;  %v573_v23 = vadd.f32 %v2563_v9, %v438_v15  ;;  %v574_v24 = vadd.f32 %v2563_v9, %v439_v16  ;;  %v575_v25 = vadd.f32 %v2563_v9, %v440_v17 }
  0x16   : > { %v576_v26 = vadd.f32 %v2563_v9, %v441_v18  ;;  %v577_v27 = vadd.f32 %v2563_v9, %v442_v19  ;;  %v578_v28 = vadd.f32 %v2563_v9, %v443_v20  ;;  %v579_v29 = vadd.f32 %v2563_v9, %v444_v21  ;;  %v2378_v18 = vld [vmem:[%s2549_s18 + $0x50] sm:$0xff]  }
  0x17   : > { %v700_v31 = vmax.f32 %v572_v22, 0.0  ;;  %v701_v32 = vmax.f32 %v573_v23, 0.0  ;;  %v702_v33 = vmax.f32 %v574_v24, 0.0  ;;  %v703_v34 = vmax.f32 %v575_v25, 0.0  ;;  %v2379_v23 = vld [vmem:[%s2549_s18 + $0x58] sm:$0xff]  }
  0x18   : > { %v704_v36 = vmax.f32 %v576_v26, 0.0  ;;  %v705_v37 = vmax.f32 %v577_v27, 0.0  ;;  %v706_v38 = vmax.f32 %v578_v28, 0.0  ;;  %v707_v39 = vmax.f32 %v579_v29, 0.0 }
  0x19   : > { %v2052_v41 = vpack.c.bf16 %v701_v32, %v700_v31  ;;  %v2057_v42 = vpack.c.bf16 %v703_v34, %v702_v33  ;;  %v1811_v43 = vunpack.c.l.bf16 %v2372_v30  ;;  %v1812_v44 = vunpack.c.h.bf16 %v2372_v30 }
  0x1a   : > { %v2062_v46 = vpack.c.bf16 %v705_v37, %v704_v36  ;;  %v2067_v47 = vpack.c.bf16 %v707_v39, %v706_v38  ;;  %v1815_v48 = vunpack.c.l.bf16 %v2373_v35  ;;  %v1816_v49 = vunpack.c.h.bf16 %v2373_v35 }
  0x1b   : > { %2053 = vst [vmem:[%s2588_s25] sm:$0xff] %v2052_v41   ;;  %2432 = vst [vmem:[%s2588_s25 + $0x8] sm:$0xff] %v2057_v42   ;;  %v445_v50 = vmul.f32 %v1811_v43, %v2554_v0  ;;  %v446_v51 = vmul.f32 %v1812_v44, %v2554_v0  ;;  %v1819_v52 = vunpack.c.l.bf16 %v2374_v40  ;;  %v1820_v53 = vunpack.c.h.bf16 %v2374_v40  ;;  %v2380_v40 = vld [vmem:[%s2549_s18 + $0x60] sm:$0xff]  }
  0x1c   : > { %2433 = vst [vmem:[%s2588_s25 + $0x10] sm:$0xff] %v2062_v46   ;;  %2434 = vst [vmem:[%s2588_s25 + $0x18] sm:$0xff] %v2067_v47   ;;  %v447_v54 = vmul.f32 %v1815_v48, %v2554_v0  ;;  %v448_v55 = vmul.f32 %v1816_v49, %v2554_v0  ;;  %v1823_v56 = vunpack.c.l.bf16 %v2375_v45  ;;  %v1824_v57 = vunpack.c.h.bf16 %v2375_v45 }
  0x1d   : > { %v580_v58 = vadd.f32 %v2563_v9, %v445_v50  ;;  %v581_v59 = vadd.f32 %v2563_v9, %v446_v51  ;;  %v449_v60 = vmul.f32 %v1819_v52, %v2554_v0  ;;  %v450_v61 = vmul.f32 %v1820_v53, %v2554_v0  ;;  %v2381_v53 = vld [vmem:[%s2549_s18 + $0x68] sm:$0xff]  }
  0x1e   : > { %v582_v62 = vadd.f32 %v2563_v9, %v447_v54  ;;  %v583_v63 = vadd.f32 %v2563_v9, %v448_v55  ;;  %v451_v1 = vmul.f32 %v1823_v56, %v2554_v0  ;;  %v452_v2 = vmul.f32 %v1824_v57, %v2554_v0 }
  0x1f   : > { %v708_v4 = vmax.f32 %v580_v58, 0.0  ;;  %v709_v5 = vmax.f32 %v581_v59, 0.0  ;;  %v584_v6 = vadd.f32 %v2563_v9, %v449_v60  ;;  %v585_v7 = vadd.f32 %v2563_v9, %v450_v61  ;;  %v2382_v58 = vld [vmem:[%s2549_s18 + $0x70] sm:$0xff]  }
  0x20   : > { %v710_v8 = vmax.f32 %v582_v62, 0.0  ;;  %v711_v10 = vmax.f32 %v583_v63, 0.0  ;;  %v586_v11 = vadd.f32 %v2563_v9, %v451_v1  ;;  %v587_v12 = vadd.f32 %v2563_v9, %v452_v2  ;;  %v2383_v63 = vld [vmem:[%s2549_s18 + $0x78] sm:$0xff]  }
  0x21   : > { %v2072_v14 = vpack.c.bf16 %v709_v5, %v708_v4  ;;  %v712_v15 = vmax.f32 %v584_v6, 0.0  ;;  %v713_v16 = vmax.f32 %v585_v7, 0.0  ;;  %v1827_v17 = vunpack.c.l.bf16 %v2376_v3 }
  0x22   : > { %v2077_v19 = vpack.c.bf16 %v711_v10, %v710_v8  ;;  %v714_v20 = vmax.f32 %v586_v11, 0.0  ;;  %v715_v21 = vmax.f32 %v587_v12, 0.0  ;;  %v1828_v22 = vunpack.c.h.bf16 %v2376_v3 }
  0x23   : > { %2435 = vst [vmem:[%s2588_s25 + $0x20] sm:$0xff] %v2072_v14   ;;  %v2082_v24 = vpack.c.bf16 %v713_v16, %v712_v15  ;;  %v453_v25 = vmul.f32 %v1827_v17, %v2554_v0  ;;  %v1831_v26 = vunpack.c.l.bf16 %v2377_v13  ;;  %v1832_v27 = vunpack.c.h.bf16 %v2377_v13  ;;  %v2384_v14 = vld [vmem:[%s2549_s18 + $0x80] sm:$0xff]  }
  0x24   : > { %2436 = vst [vmem:[%s2588_s25 + $0x28] sm:$0xff] %v2077_v19   ;;  %v2087_v28 = vpack.c.bf16 %v715_v21, %v714_v20  ;;  %v454_v29 = vmul.f32 %v1828_v22, %v2554_v0  ;;  %v1835_v30 = vunpack.c.l.bf16 %v2378_v18  ;;  %v1836_v31 = vunpack.c.h.bf16 %v2378_v18 }
  0x25   : > { %2437 = vst [vmem:[%s2588_s25 + $0x30] sm:$0xff] %v2082_v24   ;;  %v588_v32 = vadd.f32 %v2563_v9, %v453_v25  ;;  %v455_v33 = vmul.f32 %v1831_v26, %v2554_v0  ;;  %v456_v34 = vmul.f32 %v1832_v27, %v2554_v0  ;;  %v1839_v35 = vunpack.c.l.bf16 %v2379_v23 }
  0x26   : > { %2438 = vst [vmem:[%s2588_s25 + $0x38] sm:$0xff] %v2087_v28   ;;  %v589_v36 = vadd.f32 %v2563_v9, %v454_v29  ;;  %v457_v37 = vmul.f32 %v1835_v30, %v2554_v0  ;;  %v458_v38 = vmul.f32 %v1836_v31, %v2554_v0  ;;  %v1840_v39 = vunpack.c.h.bf16 %v2379_v23  ;;  %v2385_v31 = vld [vmem:[%s2549_s18 + $0x88] sm:$0xff]  }
  0x27   : > { %v716_v41 = vmax.f32 %v588_v32, 0.0  ;;  %v590_v42 = vadd.f32 %v2563_v9, %v455_v33  ;;  %v591_v43 = vadd.f32 %v2563_v9, %v456_v34  ;;  %v459_v44 = vmul.f32 %v1839_v35, %v2554_v0 }
  0x28   : > { %v717_v45 = vmax.f32 %v589_v36, 0.0  ;;  %v592_v46 = vadd.f32 %v2563_v9, %v457_v37  ;;  %v593_v47 = vadd.f32 %v2563_v9, %v458_v38  ;;  %v460_v48 = vmul.f32 %v1840_v39, %v2554_v0  ;;  %v2386_v36 = vld [vmem:[%s2549_s18 + $0x90] sm:$0xff]  }
  0x29   : > { %v718_v49 = vmax.f32 %v590_v42, 0.0  ;;  %v719_v50 = vmax.f32 %v591_v43, 0.0  ;;  %v594_v51 = vadd.f32 %v2563_v9, %v459_v44  ;;  %v1843_v52 = vunpack.c.l.bf16 %v2380_v40 }
  0x2a   : > { %v2092_v54 = vpack.c.bf16 %v717_v45, %v716_v41  ;;  %v720_v55 = vmax.f32 %v592_v46, 0.0  ;;  %v721_v56 = vmax.f32 %v593_v47, 0.0  ;;  %v595_v57 = vadd.f32 %v2563_v9, %v460_v48  ;;  %v2387_v41 = vld [vmem:[%s2549_s18 + $0x98] sm:$0xff]  }
  0x2b   : > { %v2097_v59 = vpack.c.bf16 %v719_v50, %v718_v49  ;;  %v722_v60 = vmax.f32 %v594_v51, 0.0  ;;  %v1844_v61 = vunpack.c.h.bf16 %v2380_v40  ;;  %v461_v62 = vmul.f32 %v1843_v52, %v2554_v0 }
  0x2c   : > { %2439 = vst [vmem:[%s2588_s25 + $0x40] sm:$0xff] %v2092_v54   ;;  %v2102_v1 = vpack.c.bf16 %v721_v56, %v720_v55  ;;  %v723_v2 = vmax.f32 %v595_v57, 0.0  ;;  %v1847_v3 = vunpack.c.l.bf16 %v2381_v53  ;;  %v1848_v4 = vunpack.c.h.bf16 %v2381_v53  ;;  %v2388_v54 = vld [vmem:[%s2549_s18 + $0xa0] sm:$0xff]  }
  0x2d   : > { %2440 = vst [vmem:[%s2588_s25 + $0x48] sm:$0xff] %v2097_v59   ;;  %v462_v5 = vmul.f32 %v1844_v61, %v2554_v0  ;;  %v596_v6 = vadd.f32 %v2563_v9, %v461_v62  ;;  %v1851_v7 = vunpack.c.l.bf16 %v2382_v58  ;;  %v1852_v8 = vunpack.c.h.bf16 %v2382_v58 }
  0x2e   : > { %2441 = vst [vmem:[%s2588_s25 + $0x50] sm:$0xff] %v2102_v1   ;;  %v2107_v10 = vpack.c.bf16 %v723_v2, %v722_v60  ;;  %v463_v11 = vmul.f32 %v1847_v3, %v2554_v0  ;;  %v464_v12 = vmul.f32 %v1848_v4, %v2554_v0  ;;  %v1855_v13 = vunpack.c.l.bf16 %v2383_v63  ;;  %v2389_v4 = vld [vmem:[%s2549_s18 + $0xa8] sm:$0xff]  }
  0x2f   : > { %v597_v15 = vadd.f32 %v2563_v9, %v462_v5  ;;  %v724_v16 = vmax.f32 %v596_v6, 0.0  ;;  %v465_v17 = vmul.f32 %v1851_v7, %v2554_v0  ;;  %v466_v18 = vmul.f32 %v1852_v8, %v2554_v0 }
  0x30   : > { %2442 = vst [vmem:[%s2588_s25 + $0x58] sm:$0xff] %v2107_v10   ;;  %v598_v19 = vadd.f32 %v2563_v9, %v463_v11  ;;  %v599_v20 = vadd.f32 %v2563_v9, %v464_v12  ;;  %v1856_v21 = vunpack.c.h.bf16 %v2383_v63  ;;  %v467_v22 = vmul.f32 %v1855_v13, %v2554_v0 }
  0x31   : > { %v725_v23 = vmax.f32 %v597_v15, 0.0  ;;  %v600_v24 = vadd.f32 %v2563_v9, %v465_v17  ;;  %v601_v25 = vadd.f32 %v2563_v9, %v466_v18  ;;  %v1859_v26 = vunpack.c.l.bf16 %v2384_v14 }
  0x32   : > { %v726_v27 = vmax.f32 %v598_v19, 0.0  ;;  %v727_v28 = vmax.f32 %v599_v20, 0.0  ;;  %v468_v29 = vmul.f32 %v1856_v21, %v2554_v0  ;;  %v602_v30 = vadd.f32 %v2563_v9, %v467_v22  ;;  %v2391_v19 = vld [vmem:[%s2549_s18 + $0xb8] sm:$0xff]  }
  0x33   : > { %v2112_v32 = vpack.c.bf16 %v725_v23, %v724_v16  ;;  %v728_v33 = vmax.f32 %v600_v24, 0.0  ;;  %v729_v34 = vmax.f32 %v601_v25, 0.0  ;;  %v1860_v35 = vunpack.c.h.bf16 %v2384_v14  ;;  %v2390_v14 = vld [vmem:[%s2549_s18 + $0xb0] sm:$0xff]  }
  0x34   : > { %v2117_v37 = vpack.c.bf16 %v727_v28, %v726_v27  ;;  %v603_v38 = vadd.f32 %v2563_v9, %v468_v29  ;;  %v730_v39 = vmax.f32 %v602_v30, 0.0  ;;  %v469_v40 = vmul.f32 %v1859_v26, %v2554_v0 }
  0x35   : > { %2443 = vst [vmem:[%s2588_s25 + $0x60] sm:$0xff] %v2112_v32   ;;  %v2122_v42 = vpack.c.bf16 %v729_v34, %v728_v33  ;;  %v470_v43 = vmul.f32 %v1860_v35, %v2554_v0  ;;  %v1863_v44 = vunpack.c.l.bf16 %v2385_v31  ;;  %v1864_v45 = vunpack.c.h.bf16 %v2385_v31  ;;  %v2392_v32 = vld [vmem:[%s2549_s18 + $0xc0] sm:$0xff]  }
  0x36   : > { %2444 = vst [vmem:[%s2588_s25 + $0x68] sm:$0xff] %v2117_v37   ;;  %v731_v46 = vmax.f32 %v603_v38, 0.0  ;;  %v604_v47 = vadd.f32 %v2563_v9, %v469_v40  ;;  %v1867_v48 = vunpack.c.l.bf16 %v2386_v36  ;;  %v1868_v49 = vunpack.c.h.bf16 %v2386_v36 }
  0x37   : > { %2445 = vst [vmem:[%s2588_s25 + $0x70] sm:$0xff] %v2122_v42   ;;  %v605_v50 = vadd.f32 %v2563_v9, %v470_v43  ;;  %v471_v51 = vmul.f32 %v1863_v44, %v2554_v0  ;;  %v472_v52 = vmul.f32 %v1864_v45, %v2554_v0  ;;  %v1871_v53 = vunpack.c.l.bf16 %v2387_v41  ;;  %v2393_v45 = vld [vmem:[%s2549_s18 + $0xc8] sm:$0xff]  }
  0x38   : > { %v2127_v55 = vpack.c.bf16 %v731_v46, %v730_v39  ;;  %v732_v56 = vmax.f32 %v604_v47, 0.0  ;;  %v473_v57 = vmul.f32 %v1867_v48, %v2554_v0  ;;  %v474_v58 = vmul.f32 %v1868_v49, %v2554_v0 }
  0x39   : > { %v733_v59 = vmax.f32 %v605_v50, 0.0  ;;  %v606_v60 = vadd.f32 %v2563_v9, %v471_v51  ;;  %v607_v61 = vadd.f32 %v2563_v9, %v472_v52  ;;  %v1872_v62 = vunpack.c.h.bf16 %v2387_v41 }
  0x3a   : > { %2446 = vst [vmem:[%s2588_s25 + $0x78] sm:$0xff] %v2127_v55   ;;  %v608_v63 = vadd.f32 %v2563_v9, %v473_v57  ;;  %v609_v1 = vadd.f32 %v2563_v9, %v474_v58  ;;  %v475_v2 = vmul.f32 %v1871_v53, %v2554_v0  ;;  %v1875_v3 = vunpack.c.l.bf16 %v2388_v54 }
  0x3b   : > { %v2132_v5 = vpack.c.bf16 %v733_v59, %v732_v56  ;;  %v734_v6 = vmax.f32 %v606_v60, 0.0  ;;  %v735_v7 = vmax.f32 %v607_v61, 0.0  ;;  %v476_v8 = vmul.f32 %v1872_v62, %v2554_v0 }
  0x3c   : > { %v736_v10 = vmax.f32 %v608_v63, 0.0  ;;  %v737_v11 = vmax.f32 %v609_v1, 0.0  ;;  %v610_v12 = vadd.f32 %v2563_v9, %v475_v2  ;;  %v1876_v13 = vunpack.c.h.bf16 %v2388_v54  ;;  %v2394_v54 = vld [vmem:[%s2549_s18 + $0xd0] sm:$0xff]   ;;  %v2395_v63 = vld [vmem:[%s2549_s18 + $0xd8] sm:$0xff]  }
  0x3d   : > { %2447 = vst [vmem:[%s2588_s25 + $0x80] sm:$0xff] %v2132_v5   ;;  %v2137_v15 = vpack.c.bf16 %v735_v7, %v734_v6  ;;  %v611_v16 = vadd.f32 %v2563_v9, %v476_v8  ;;  %v477_v17 = vmul.f32 %v1875_v3, %v2554_v0  ;;  %v1879_v18 = vunpack.c.l.bf16 %v2389_v4 }
  0x3e   : > { %v2142_v20 = vpack.c.bf16 %v737_v11, %v736_v10  ;;  %v738_v21 = vmax.f32 %v610_v12, 0.0  ;;  %v478_v22 = vmul.f32 %v1876_v13, %v2554_v0  ;;  %v1880_v23 = vunpack.c.h.bf16 %v2389_v4  ;;  %v2396_v10 = vld [vmem:[%s2549_s18 + $0xe0] sm:$0xff]  }
  0x3f   : > { %2448 = vst [vmem:[%s2588_s25 + $0x88] sm:$0xff] %v2137_v15   ;;  %v739_v24 = vmax.f32 %v611_v16, 0.0  ;;  %v612_v25 = vadd.f32 %v2563_v9, %v477_v17  ;;  %v479_v26 = vmul.f32 %v1879_v18, %v2554_v0  ;;  %v1883_v27 = vunpack.c.l.bf16 %v2390_v14 }
  0x40   : > { %2449 = vst [vmem:[%s2588_s25 + $0x90] sm:$0xff] %v2142_v20   ;;  %v613_v28 = vadd.f32 %v2563_v9, %v478_v22  ;;  %v480_v29 = vmul.f32 %v1880_v23, %v2554_v0  ;;  %v1884_v30 = vunpack.c.h.bf16 %v2390_v14  ;;  %v1887_v31 = vunpack.c.l.bf16 %v2391_v19  ;;  %v2397_v23 = vld [vmem:[%s2549_s18 + $0xe8] sm:$0xff]  }
  0x41   : > { %v2147_v33 = vpack.c.bf16 %v739_v24, %v738_v21  ;;  %v740_v34 = vmax.f32 %v612_v25, 0.0  ;;  %v614_v35 = vadd.f32 %v2563_v9, %v479_v26  ;;  %v481_v36 = vmul.f32 %v1883_v27, %v2554_v0 }
  0x42   : > { %v741_v37 = vmax.f32 %v613_v28, 0.0  ;;  %v615_v38 = vadd.f32 %v2563_v9, %v480_v29  ;;  %v482_v39 = vmul.f32 %v1884_v30, %v2554_v0  ;;  %v1888_v40 = vunpack.c.h.bf16 %v2391_v19 }
  0x43   : > { %2450 = vst [vmem:[%s2588_s25 + $0x98] sm:$0xff] %v2147_v33   ;;  %v742_v41 = vmax.f32 %v614_v35, 0.0  ;;  %v616_v42 = vadd.f32 %v2563_v9, %v481_v36  ;;  %v483_v43 = vmul.f32 %v1887_v31, %v2554_v0  ;;  %v1891_v44 = vunpack.c.l.bf16 %v2392_v32 }
  0x44   : > { %v2152_v46 = vpack.c.bf16 %v741_v37, %v740_v34  ;;  %v743_v47 = vmax.f32 %v615_v38, 0.0  ;;  %v617_v48 = vadd.f32 %v2563_v9, %v482_v39  ;;  %v484_v49 = vmul.f32 %v1888_v40, %v2554_v0 }
  0x45   : > { %v744_v50 = vmax.f32 %v616_v42, 0.0  ;;  %v618_v51 = vadd.f32 %v2563_v9, %v483_v43  ;;  %v1892_v52 = vunpack.c.h.bf16 %v2392_v32  ;;  %v485_v53 = vmul.f32 %v1891_v44, %v2554_v0  ;;  %v2398_v32 = vld [vmem:[%s2549_s18 + $0xf0] sm:$0xff]  }
  0x46   : > { %2451 = vst [vmem:[%s2588_s25 + $0xa0] sm:$0xff] %v2152_v46   ;;  %v2157_v55 = vpack.c.bf16 %v743_v47, %v742_v41  ;;  %v745_v56 = vmax.f32 %v617_v48, 0.0  ;;  %v619_v57 = vadd.f32 %v2563_v9, %v484_v49  ;;  %v1895_v58 = vunpack.c.l.bf16 %v2393_v45  ;;  %v2399_v41 = vld [vmem:[%s2549_s18 + $0xf8] sm:$0xff]  }
  0x47   : > { %v746_v59 = vmax.f32 %v618_v51, 0.0  ;;  %v486_v60 = vmul.f32 %v1892_v52, %v2554_v0  ;;  %v620_v61 = vadd.f32 %v2563_v9, %v485_v53  ;;  %v1896_v62 = vunpack.c.h.bf16 %v2393_v45 }
  0x48   : > { %2452 = vst [vmem:[%s2588_s25 + $0xa8] sm:$0xff] %v2157_v55   ;;  %v2162_v1 = vpack.c.bf16 %v745_v56, %v744_v50  ;;  %v747_v2 = vmax.f32 %v619_v57, 0.0  ;;  %v487_v3 = vmul.f32 %v1895_v58, %v2554_v0  ;;  %v1899_v4 = vunpack.c.l.bf16 %v2394_v54  ;;  %v2400_v50 = vld [vmem:[%s2549_s18 + $0x100] sm:$0xff]  }
  0x49   : > { %v621_v5 = vadd.f32 %v2563_v9, %v486_v60  ;;  %v748_v6 = vmax.f32 %v620_v61, 0.0  ;;  %v488_v7 = vmul.f32 %v1896_v62, %v2554_v0  ;;  %v1900_v8 = vunpack.c.h.bf16 %v2394_v54 }
  0x4a   : > { %2453 = vst [vmem:[%s2588_s25 + $0xb0] sm:$0xff] %v2162_v1   ;;  %v2167_v11 = vpack.c.bf16 %v747_v2, %v746_v59  ;;  %v622_v12 = vadd.f32 %v2563_v9, %v487_v3  ;;  %v489_v13 = vmul.f32 %v1899_v4, %v2554_v0  ;;  %v1903_v14 = vunpack.c.l.bf16 %v2395_v63 }
  0x4b   : > { %v749_v15 = vmax.f32 %v621_v5, 0.0  ;;  %v623_v16 = vadd.f32 %v2563_v9, %v488_v7  ;;  %v490_v17 = vmul.f32 %v1900_v8, %v2554_v0  ;;  %v1904_v18 = vunpack.c.h.bf16 %v2395_v63  ;;  %v2401_v63 = vld [vmem:[%s2549_s18 + $0x108] sm:$0xff]  }
  0x4c   : > { %2454 = vst [vmem:[%s2588_s25 + $0xb8] sm:$0xff] %v2167_v11   ;;  %v750_v19 = vmax.f32 %v622_v12, 0.0  ;;  %v624_v20 = vadd.f32 %v2563_v9, %v489_v13  ;;  %v491_v21 = vmul.f32 %v1903_v14, %v2554_v0  ;;  %v1907_v22 = vunpack.c.l.bf16 %v2396_v10 }
  0x4d   : > { %v2172_v24 = vpack.c.bf16 %v749_v15, %v748_v6  ;;  %v751_v25 = vmax.f32 %v623_v16, 0.0  ;;  %v625_v26 = vadd.f32 %v2563_v9, %v490_v17  ;;  %v492_v27 = vmul.f32 %v1904_v18, %v2554_v0 }
  0x4e   : > { %v752_v28 = vmax.f32 %v624_v20, 0.0  ;;  %v626_v29 = vadd.f32 %v2563_v9, %v491_v21  ;;  %v1908_v30 = vunpack.c.h.bf16 %v2396_v10  ;;  %v493_v31 = vmul.f32 %v1907_v22, %v2554_v0  ;;  %v2402_v10 = vld [vmem:[%s2549_s18 + $0x110] sm:$0xff]  }
  0x4f   : > { %2455 = vst [vmem:[%s2588_s25 + $0xc0] sm:$0xff] %v2172_v24   ;;  %v2177_v33 = vpack.c.bf16 %v751_v25, %v750_v19  ;;  %v753_v34 = vmax.f32 %v625_v26, 0.0  ;;  %v627_v35 = vadd.f32 %v2563_v9, %v492_v27  ;;  %v1911_v36 = vunpack.c.l.bf16 %v2397_v23  ;;  %v2403_v19 = vld [vmem:[%s2549_s18 + $0x118] sm:$0xff]  }
  0x50   : > { %v754_v37 = vmax.f32 %v626_v29, 0.0  ;;  %v494_v38 = vmul.f32 %v1908_v30, %v2554_v0  ;;  %v628_v39 = vadd.f32 %v2563_v9, %v493_v31  ;;  %v1912_v40 = vunpack.c.h.bf16 %v2397_v23 }
  0x51   : > { %2456 = vst [vmem:[%s2588_s25 + $0xc8] sm:$0xff] %v2177_v33   ;;  %v2182_v42 = vpack.c.bf16 %v753_v34, %v752_v28  ;;  %v755_v43 = vmax.f32 %v627_v35, 0.0  ;;  %v495_v44 = vmul.f32 %v1911_v36, %v2554_v0  ;;  %v1915_v45 = vunpack.c.l.bf16 %v2398_v32  ;;  %v2404_v28 = vld [vmem:[%s2549_s18 + $0x120] sm:$0xff]  }
  0x52   : > { %v629_v46 = vadd.f32 %v2563_v9, %v494_v38  ;;  %v756_v47 = vmax.f32 %v628_v39, 0.0  ;;  %v496_v48 = vmul.f32 %v1912_v40, %v2554_v0  ;;  %v1916_v49 = vunpack.c.h.bf16 %v2398_v32 }
  0x53   : > { %2457 = vst [vmem:[%s2588_s25 + $0xd0] sm:$0xff] %v2182_v42   ;;  %v2187_v51 = vpack.c.bf16 %v755_v43, %v754_v37  ;;  %v630_v52 = vadd.f32 %v2563_v9, %v495_v44  ;;  %v497_v53 = vmul.f32 %v1915_v45, %v2554_v0  ;;  %v1919_v54 = vunpack.c.l.bf16 %v2399_v41 }
  0x54   : > { %v757_v55 = vmax.f32 %v629_v46, 0.0  ;;  %v631_v56 = vadd.f32 %v2563_v9, %v496_v48  ;;  %v498_v57 = vmul.f32 %v1916_v49, %v2554_v0  ;;  %v1920_v58 = vunpack.c.h.bf16 %v2399_v41  ;;  %v2405_v41 = vld [vmem:[%s2549_s18 + $0x128] sm:$0xff]  }
  0x55   : > { %2458 = vst [vmem:[%s2588_s25 + $0xd8] sm:$0xff] %v2187_v51   ;;  %v758_v59 = vmax.f32 %v630_v52, 0.0  ;;  %v632_v60 = vadd.f32 %v2563_v9, %v497_v53  ;;  %v499_v61 = vmul.f32 %v1919_v54, %v2554_v0  ;;  %v1923_v62 = vunpack.c.l.bf16 %v2400_v50 }
  0x56   : > { %v2192_v1 = vpack.c.bf16 %v757_v55, %v756_v47  ;;  %v759_v2 = vmax.f32 %v631_v56, 0.0  ;;  %v633_v3 = vadd.f32 %v2563_v9, %v498_v57  ;;  %v500_v4 = vmul.f32 %v1920_v58, %v2554_v0 }
  0x57   : > { %v760_v5 = vmax.f32 %v632_v60, 0.0  ;;  %v634_v6 = vadd.f32 %v2563_v9, %v499_v61  ;;  %v1924_v7 = vunpack.c.h.bf16 %v2400_v50  ;;  %v501_v8 = vmul.f32 %v1923_v62, %v2554_v0  ;;  %v2406_v50 = vld [vmem:[%s2549_s18 + $0x130] sm:$0xff]  }
  0x58   : > { %2459 = vst [vmem:[%s2588_s25 + $0xe0] sm:$0xff] %v2192_v1   ;;  %v2197_v11 = vpack.c.bf16 %v759_v2, %v758_v59  ;;  %v761_v12 = vmax.f32 %v633_v3, 0.0  ;;  %v635_v13 = vadd.f32 %v2563_v9, %v500_v4  ;;  %v1927_v14 = vunpack.c.l.bf16 %v2401_v63  ;;  %v2407_v59 = vld [vmem:[%s2549_s18 + $0x138] sm:$0xff]  }
  0x59   : > { %v762_v15 = vmax.f32 %v634_v6, 0.0  ;;  %v502_v16 = vmul.f32 %v1924_v7, %v2554_v0  ;;  %v636_v17 = vadd.f32 %v2563_v9, %v501_v8  ;;  %v1928_v18 = vunpack.c.h.bf16 %v2401_v63 }
  0x5a   : > { %2460 = vst [vmem:[%s2588_s25 + $0xe8] sm:$0xff] %v2197_v11   ;;  %v2202_v20 = vpack.c.bf16 %v761_v12, %v760_v5  ;;  %v763_v21 = vmax.f32 %v635_v13, 0.0  ;;  %v503_v22 = vmul.f32 %v1927_v14, %v2554_v0  ;;  %v1931_v23 = vunpack.c.l.bf16 %v2402_v10  ;;  %v2408_v5 = vld [vmem:[%s2549_s18 + $0x140] sm:$0xff]  }
  0x5b   : > { %v637_v24 = vadd.f32 %v2563_v9, %v502_v16  ;;  %v764_v25 = vmax.f32 %v636_v17, 0.0  ;;  %v504_v26 = vmul.f32 %v1928_v18, %v2554_v0  ;;  %v1932_v27 = vunpack.c.h.bf16 %v2402_v10 }
  0x5c   : > { %2461 = vst [vmem:[%s2588_s25 + $0xf0] sm:$0xff] %v2202_v20   ;;  %v2207_v29 = vpack.c.bf16 %v763_v21, %v762_v15  ;;  %v638_v30 = vadd.f32 %v2563_v9, %v503_v22  ;;  %v505_v31 = vmul.f32 %v1931_v23, %v2554_v0  ;;  %v1935_v32 = vunpack.c.l.bf16 %v2403_v19 }
  0x5d   : > { %v765_v33 = vmax.f32 %v637_v24, 0.0  ;;  %v639_v34 = vadd.f32 %v2563_v9, %v504_v26  ;;  %v506_v35 = vmul.f32 %v1932_v27, %v2554_v0  ;;  %v1936_v36 = vunpack.c.h.bf16 %v2403_v19  ;;  %v2409_v19 = vld [vmem:[%s2549_s18 + $0x148] sm:$0xff]  }
  0x5e   : > { %2462 = vst [vmem:[%s2588_s25 + $0xf8] sm:$0xff] %v2207_v29   ;;  %v766_v37 = vmax.f32 %v638_v30, 0.0  ;;  %v640_v38 = vadd.f32 %v2563_v9, %v505_v31  ;;  %v507_v39 = vmul.f32 %v1935_v32, %v2554_v0  ;;  %v1939_v40 = vunpack.c.l.bf16 %v2404_v28 }
  0x5f   : > { %v2212_v42 = vpack.c.bf16 %v765_v33, %v764_v25  ;;  %v767_v43 = vmax.f32 %v639_v34, 0.0  ;;  %v641_v44 = vadd.f32 %v2563_v9, %v506_v35  ;;  %v508_v45 = vmul.f32 %v1936_v36, %v2554_v0 }
  0x60   : > { %v768_v46 = vmax.f32 %v640_v38, 0.0  ;;  %v642_v47 = vadd.f32 %v2563_v9, %v507_v39  ;;  %v1940_v48 = vunpack.c.h.bf16 %v2404_v28  ;;  %v509_v49 = vmul.f32 %v1939_v40, %v2554_v0  ;;  %v2410_v28 = vld [vmem:[%s2549_s18 + $0x150] sm:$0xff]  }
  0x61   : > { %2463 = vst [vmem:[%s2588_s25 + $0x100] sm:$0xff] %v2212_v42   ;;  %v2217_v51 = vpack.c.bf16 %v767_v43, %v766_v37  ;;  %v769_v52 = vmax.f32 %v641_v44, 0.0  ;;  %v643_v53 = vadd.f32 %v2563_v9, %v508_v45  ;;  %v1943_v54 = vunpack.c.l.bf16 %v2405_v41  ;;  %v2411_v37 = vld [vmem:[%s2549_s18 + $0x158] sm:$0xff]  }
  0x62   : > { %v770_v55 = vmax.f32 %v642_v47, 0.0  ;;  %v510_v56 = vmul.f32 %v1940_v48, %v2554_v0  ;;  %v644_v57 = vadd.f32 %v2563_v9, %v509_v49  ;;  %v1944_v58 = vunpack.c.h.bf16 %v2405_v41 }
  0x63   : > { %2464 = vst [vmem:[%s2588_s25 + $0x108] sm:$0xff] %v2217_v51   ;;  %v2222_v60 = vpack.c.bf16 %v769_v52, %v768_v46  ;;  %v771_v61 = vmax.f32 %v643_v53, 0.0  ;;  %v511_v62 = vmul.f32 %v1943_v54, %v2554_v0  ;;  %v1947_v63 = vunpack.c.l.bf16 %v2406_v50  ;;  %v2412_v46 = vld [vmem:[%s2549_s18 + $0x160] sm:$0xff]  }
  0x64   : > { %v645_v1 = vadd.f32 %v2563_v9, %v510_v56  ;;  %v772_v2 = vmax.f32 %v644_v57, 0.0  ;;  %v512_v3 = vmul.f32 %v1944_v58, %v2554_v0  ;;  %v1948_v4 = vunpack.c.h.bf16 %v2406_v50 }
  0x65   : > { %2465 = vst [vmem:[%s2588_s25 + $0x110] sm:$0xff] %v2222_v60   ;;  %v2227_v6 = vpack.c.bf16 %v771_v61, %v770_v55  ;;  %v646_v7 = vadd.f32 %v2563_v9, %v511_v62  ;;  %v513_v8 = vmul.f32 %v1947_v63, %v2554_v0  ;;  %v1951_v10 = vunpack.c.l.bf16 %v2407_v59 }
  0x66   : > { %v773_v11 = vmax.f32 %v645_v1, 0.0  ;;  %v647_v12 = vadd.f32 %v2563_v9, %v512_v3  ;;  %v514_v13 = vmul.f32 %v1948_v4, %v2554_v0  ;;  %v1952_v14 = vunpack.c.h.bf16 %v2407_v59  ;;  %v2413_v59 = vld [vmem:[%s2549_s18 + $0x168] sm:$0xff]  }
  0x67   : > { %2466 = vst [vmem:[%s2588_s25 + $0x118] sm:$0xff] %v2227_v6   ;;  %v774_v15 = vmax.f32 %v646_v7, 0.0  ;;  %v648_v16 = vadd.f32 %v2563_v9, %v513_v8  ;;  %v515_v17 = vmul.f32 %v1951_v10, %v2554_v0  ;;  %v1955_v18 = vunpack.c.l.bf16 %v2408_v5 }
  0x68   : > { %v2232_v20 = vpack.c.bf16 %v773_v11, %v772_v2  ;;  %v775_v21 = vmax.f32 %v647_v12, 0.0  ;;  %v649_v22 = vadd.f32 %v2563_v9, %v514_v13  ;;  %v516_v23 = vmul.f32 %v1952_v14, %v2554_v0 }
  0x69   : > { %v776_v24 = vmax.f32 %v648_v16, 0.0  ;;  %v650_v25 = vadd.f32 %v2563_v9, %v515_v17  ;;  %v1956_v26 = vunpack.c.h.bf16 %v2408_v5  ;;  %v517_v27 = vmul.f32 %v1955_v18, %v2554_v0  ;;  %v2414_v5 = vld [vmem:[%s2549_s18 + $0x170] sm:$0xff]  }
  0x6a   : > { %2467 = vst [vmem:[%s2588_s25 + $0x120] sm:$0xff] %v2232_v20   ;;  %v2237_v29 = vpack.c.bf16 %v775_v21, %v774_v15  ;;  %v777_v30 = vmax.f32 %v649_v22, 0.0  ;;  %v651_v31 = vadd.f32 %v2563_v9, %v516_v23  ;;  %v1959_v32 = vunpack.c.l.bf16 %v2409_v19  ;;  %v2415_v15 = vld [vmem:[%s2549_s18 + $0x178] sm:$0xff]  }
  0x6b   : > { %v778_v33 = vmax.f32 %v650_v25, 0.0  ;;  %v518_v34 = vmul.f32 %v1956_v26, %v2554_v0  ;;  %v652_v35 = vadd.f32 %v2563_v9, %v517_v27  ;;  %v1960_v36 = vunpack.c.h.bf16 %v2409_v19 }
  0x6c   : > { %2468 = vst [vmem:[%s2588_s25 + $0x128] sm:$0xff] %v2237_v29   ;;  %v2242_v38 = vpack.c.bf16 %v777_v30, %v776_v24  ;;  %v779_v39 = vmax.f32 %v651_v31, 0.0  ;;  %v519_v40 = vmul.f32 %v1959_v32, %v2554_v0  ;;  %v1963_v41 = vunpack.c.l.bf16 %v2410_v28  ;;  %v2416_v24 = vld [vmem:[%s2549_s18 + $0x180] sm:$0xff]  }
  0x6d   : > { %v653_v42 = vadd.f32 %v2563_v9, %v518_v34  ;;  %v780_v43 = vmax.f32 %v652_v35, 0.0  ;;  %v520_v44 = vmul.f32 %v1960_v36, %v2554_v0  ;;  %v1964_v45 = vunpack.c.h.bf16 %v2410_v28  ;;  %v2851_v35 = vld [vmem:[%s2966_s1] ss:$0 sm:$0xff] }
  0x6e   : > { %2469 = vst [vmem:[%s2588_s25 + $0x130] sm:$0xff] %v2242_v38   ;;  %v2247_v47 = vpack.c.bf16 %v779_v39, %v778_v33  ;;  %v654_v48 = vadd.f32 %v2563_v9, %v519_v40  ;;  %v521_v49 = vmul.f32 %v1963_v41, %v2554_v0  ;;  %v1967_v50 = vunpack.c.l.bf16 %v2411_v37  ;;  %v2417_v38 = vld [vmem:[%s2549_s18 + $0x188] sm:$0xff]  }
  0x6f   : > { %v781_v51 = vmax.f32 %v653_v42, 0.0  ;;  %v655_v52 = vadd.f32 %v2563_v9, %v520_v44  ;;  %v522_v53 = vmul.f32 %v1964_v45, %v2554_v0  ;;  %v1968_v54 = vunpack.c.h.bf16 %v2411_v37 }
  0x70   : > { %2470 = vst [vmem:[%s2588_s25 + $0x138] sm:$0xff] %v2247_v47   ;;  %v782_v55 = vmax.f32 %v654_v48, 0.0  ;;  %v656_v56 = vadd.f32 %v2563_v9, %v521_v49  ;;  %v523_v57 = vmul.f32 %v1967_v50, %v2554_v0  ;;  %v1971_v58 = vunpack.c.l.bf16 %v2412_v46  ;;  %v2418_v47 = vld [vmem:[%s2549_s18 + $0x190] sm:$0xff]  }
  0x71   : > { %v2252_v60 = vpack.c.bf16 %v781_v51, %v780_v43  ;;  %v783_v61 = vmax.f32 %v655_v52, 0.0  ;;  %v657_v62 = vadd.f32 %v2563_v9, %v522_v53  ;;  %v524_v63 = vmul.f32 %v1968_v54, %v2554_v0  ;;  %v2860_v43 = vld [vmem:[%s2967_s2] ss:$0 sm:$0xff] }
  0x72   : > { %v784_v1 = vmax.f32 %v656_v56, 0.0  ;;  %v658_v2 = vadd.f32 %v2563_v9, %v523_v57  ;;  %v1972_v3 = vunpack.c.h.bf16 %v2412_v46  ;;  %v525_v4 = vmul.f32 %v1971_v58, %v2554_v0 }
  0x73   : > { %2471 = vst [vmem:[%s2588_s25 + $0x140] sm:$0xff] %v2252_v60   ;;  %v2257_v6 = vpack.c.bf16 %v783_v61, %v782_v55  ;;  %v785_v7 = vmax.f32 %v657_v62, 0.0  ;;  %v659_v8 = vadd.f32 %v2563_v9, %v524_v63  ;;  %v1975_v10 = vunpack.c.l.bf16 %v2413_v59  ;;  %v2419_v55 = vld [vmem:[%s2549_s18 + $0x198] sm:$0xff]  }
  0x74   : > { %v786_v11 = vmax.f32 %v658_v2, 0.0  ;;  %v526_v12 = vmul.f32 %v1972_v3, %v2554_v0  ;;  %v660_v13 = vadd.f32 %v2563_v9, %v525_v4  ;;  %v1976_v14 = vunpack.c.h.bf16 %v2413_v59 }
  0x75   : > { %2472 = vst [vmem:[%s2588_s25 + $0x148] sm:$0xff] %v2257_v6   ;;  %v2262_v16 = vpack.c.bf16 %v785_v7, %v784_v1  ;;  %v787_v17 = vmax.f32 %v659_v8, 0.0  ;;  %v527_v18 = vmul.f32 %v1975_v10, %v2554_v0  ;;  %v1979_v19 = vunpack.c.l.bf16 %v2414_v5  ;;  %v2420_v1 = vld [vmem:[%s2549_s18 + $0x1a0] sm:$0xff]  }
  0x76   : > { %v661_v20 = vadd.f32 %v2563_v9, %v526_v12  ;;  %v788_v21 = vmax.f32 %v660_v13, 0.0  ;;  %v528_v22 = vmul.f32 %v1976_v14, %v2554_v0  ;;  %v1980_v23 = vunpack.c.h.bf16 %v2414_v5 }
  0x77   : > { %2473 = vst [vmem:[%s2588_s25 + $0x150] sm:$0xff] %v2262_v16   ;;  %v2267_v25 = vpack.c.bf16 %v787_v17, %v786_v11  ;;  %v662_v26 = vadd.f32 %v2563_v9, %v527_v18  ;;  %v529_v27 = vmul.f32 %v1979_v19, %v2554_v0  ;;  %v1983_v28 = vunpack.c.l.bf16 %v2415_v15 }
  0x78   : > { %v789_v29 = vmax.f32 %v661_v20, 0.0  ;;  %v663_v30 = vadd.f32 %v2563_v9, %v528_v22  ;;  %v530_v31 = vmul.f32 %v1980_v23, %v2554_v0  ;;  %v1984_v32 = vunpack.c.h.bf16 %v2415_v15  ;;  %v2421_v15 = vld [vmem:[%s2549_s18 + $0x1a8] sm:$0xff]  }
  0x79   : > { %2474 = vst [vmem:[%s2588_s25 + $0x158] sm:$0xff] %v2267_v25   ;;  %v790_v33 = vmax.f32 %v662_v26, 0.0  ;;  %v664_v34 = vadd.f32 %v2563_v9, %v529_v27  ;;  %v531_v36 = vmul.f32 %v2851_v35, %v1983_v28  ;;  %v1987_v37 = vunpack.c.l.bf16 %v2416_v24 }
  0x7a   : > { %v2272_v39 = vpack.c.bf16 %v789_v29, %v788_v21  ;;  %v791_v40 = vmax.f32 %v663_v30, 0.0  ;;  %v665_v0 = vadd.f32 %v2563_v9, %v530_v31  ;;  %v532_v41 = vmul.f32 %v2851_v35, %v1984_v32 }
  0x7b   : > { %v792_v42 = vmax.f32 %v664_v34, 0.0  ;;  %v666_v44 = vadd.f32 %v2860_v43, %v531_v36  ;;  %v1988_v45 = vunpack.c.h.bf16 %v2416_v24  ;;  %v533_v46 = vmul.f32 %v2851_v35, %v1987_v37  ;;  %v2422_v24 = vld [vmem:[%s2549_s18 + $0x1b0] sm:$0xff]  }
  0x7c   : > { %2475 = vst [vmem:[%s2588_s25 + $0x160] sm:$0xff] %v2272_v39   ;;  %v2277_v48 = vpack.c.bf16 %v791_v40, %v790_v33  ;;  %v793_v49 = vmax.f32 %v665_v0, 0.0  ;;  %v667_v9 = vadd.f32 %v2860_v43, %v532_v41  ;;  %v1991_v50 = vunpack.c.l.bf16 %v2417_v38  ;;  %v2423_v33 = vld [vmem:[%s2549_s18 + $0x1b8] sm:$0xff]  }
  0x7d   : > { %v794_v51 = vmax.f32 %v666_v44, 0.0  ;;  %v534_v52 = vmul.f32 %v2851_v35, %v1988_v45  ;;  %v668_v53 = vadd.f32 %v2860_v43, %v533_v46  ;;  %v1992_v54 = vunpack.c.h.bf16 %v2417_v38 }
  0x7e   : > { %2476 = vst [vmem:[%s2588_s25 + $0x168] sm:$0xff] %v2277_v48   ;;  %v2282_v56 = vpack.c.bf16 %v793_v49, %v792_v42  ;;  %v795_v57 = vmax.f32 %v667_v9, 0.0  ;;  %v535_v58 = vmul.f32 %v2851_v35, %v1991_v50  ;;  %v1995_v59 = vunpack.c.l.bf16 %v2418_v47  ;;  %v2424_v42 = vld [vmem:[%s2549_s18 + $0x1c0] sm:$0xff]  }
  0x7f   : > { %v669_v60 = vadd.f32 %v2860_v43, %v534_v52  ;;  %v796_v61 = vmax.f32 %v668_v53, 0.0  ;;  %v536_v62 = vmul.f32 %v2851_v35, %v1992_v54  ;;  %v1996_v63 = vunpack.c.h.bf16 %v2418_v47 }
  0x80   : > { %2477 = vst [vmem:[%s2588_s25 + $0x170] sm:$0xff] %v2282_v56   ;;  %v2287_v2 = vpack.c.bf16 %v795_v57, %v794_v51  ;;  %v670_v3 = vadd.f32 %v2860_v43, %v535_v58  ;;  %v537_v4 = vmul.f32 %v2851_v35, %v1995_v59  ;;  %v1999_v5 = vunpack.c.l.bf16 %v2419_v55 }
  0x81   : > { %v797_v6 = vmax.f32 %v669_v60, 0.0  ;;  %v671_v7 = vadd.f32 %v2860_v43, %v536_v62  ;;  %v538_v8 = vmul.f32 %v2851_v35, %v1996_v63  ;;  %v2000_v10 = vunpack.c.h.bf16 %v2419_v55  ;;  %v2425_v55 = vld [vmem:[%s2549_s18 + $0x1c8] sm:$0xff]  }
  0x82   : > { %2478 = vst [vmem:[%s2588_s25 + $0x178] sm:$0xff] %v2287_v2   ;;  %v798_v11 = vmax.f32 %v670_v3, 0.0  ;;  %v672_v12 = vadd.f32 %v2860_v43, %v537_v4  ;;  %v539_v13 = vmul.f32 %v2851_v35, %v1999_v5  ;;  %v2003_v14 = vunpack.c.l.bf16 %v2420_v1 }
  0x83   : > { %v2292_v16 = vpack.c.bf16 %v797_v6, %v796_v61  ;;  %v799_v17 = vmax.f32 %v671_v7, 0.0  ;;  %v673_v18 = vadd.f32 %v2860_v43, %v538_v8  ;;  %v540_v19 = vmul.f32 %v2851_v35, %v2000_v10 }
  0x84   : > { %v800_v20 = vmax.f32 %v672_v12, 0.0  ;;  %v674_v21 = vadd.f32 %v2860_v43, %v539_v13  ;;  %v2004_v22 = vunpack.c.h.bf16 %v2420_v1  ;;  %v541_v23 = vmul.f32 %v2851_v35, %v2003_v14  ;;  %v2426_v1 = vld [vmem:[%s2549_s18 + $0x1d0] sm:$0xff]  }
  0x85   : > { %2479 = vst [vmem:[%s2588_s25 + $0x180] sm:$0xff] %v2292_v16   ;;  %v2297_v25 = vpack.c.bf16 %v799_v17, %v798_v11  ;;  %v801_v26 = vmax.f32 %v673_v18, 0.0  ;;  %v675_v27 = vadd.f32 %v2860_v43, %v540_v19  ;;  %v2007_v28 = vunpack.c.l.bf16 %v2421_v15  ;;  %v2427_v11 = vld [vmem:[%s2549_s18 + $0x1d8] sm:$0xff]  }
  0x86   : > { %v802_v29 = vmax.f32 %v674_v21, 0.0  ;;  %v542_v30 = vmul.f32 %v2851_v35, %v2004_v22  ;;  %v676_v31 = vadd.f32 %v2860_v43, %v541_v23  ;;  %v2008_v32 = vunpack.c.h.bf16 %v2421_v15 }
  0x87   : > { %2480 = vst [vmem:[%s2588_s25 + $0x188] sm:$0xff] %v2297_v25   ;;  %v2302_v34 = vpack.c.bf16 %v801_v26, %v800_v20  ;;  %v803_v36 = vmax.f32 %v675_v27, 0.0  ;;  %v543_v37 = vmul.f32 %v2851_v35, %v2007_v28  ;;  %v2011_v38 = vunpack.c.l.bf16 %v2422_v24  ;;  %v2428_v20 = vld [vmem:[%s2549_s18 + $0x1e0] sm:$0xff]  }
  0x88   : > { %v677_v39 = vadd.f32 %v2860_v43, %v542_v30  ;;  %v804_v40 = vmax.f32 %v676_v31, 0.0  ;;  %v544_v0 = vmul.f32 %v2851_v35, %v2008_v32  ;;  %v2012_v41 = vunpack.c.h.bf16 %v2422_v24 }
  0x89   : > { %2481 = vst [vmem:[%s2588_s25 + $0x190] sm:$0xff] %v2302_v34   ;;  %v2307_v44 = vpack.c.bf16 %v803_v36, %v802_v29  ;;  %v678_v45 = vadd.f32 %v2860_v43, %v543_v37  ;;  %v545_v46 = vmul.f32 %v2851_v35, %v2011_v38  ;;  %v2015_v47 = vunpack.c.l.bf16 %v2423_v33 }
  0x8a   : > { %v805_v48 = vmax.f32 %v677_v39, 0.0  ;;  %v679_v49 = vadd.f32 %v2860_v43, %v544_v0  ;;  %v546_v9 = vmul.f32 %v2851_v35, %v2012_v41  ;;  %v2016_v50 = vunpack.c.h.bf16 %v2423_v33  ;;  %v2429_v33 = vld [vmem:[%s2549_s18 + $0x1e8] sm:$0xff]  }
  0x8b   : > { %2482 = vst [vmem:[%s2588_s25 + $0x198] sm:$0xff] %v2307_v44   ;;  %v806_v51 = vmax.f32 %v678_v45, 0.0  ;;  %v680_v52 = vadd.f32 %v2860_v43, %v545_v46  ;;  %v547_v53 = vmul.f32 %v2851_v35, %v2015_v47  ;;  %v2019_v54 = vunpack.c.l.bf16 %v2424_v42 }
  0x8c   : > { %v2312_v56 = vpack.c.bf16 %v805_v48, %v804_v40  ;;  %v807_v57 = vmax.f32 %v679_v49, 0.0  ;;  %v681_v58 = vadd.f32 %v2860_v43, %v546_v9  ;;  %v548_v59 = vmul.f32 %v2851_v35, %v2016_v50 }
  0x8d   : > { %v808_v60 = vmax.f32 %v680_v52, 0.0  ;;  %v682_v61 = vadd.f32 %v2860_v43, %v547_v53  ;;  %v2020_v62 = vunpack.c.h.bf16 %v2424_v42  ;;  %v549_v63 = vmul.f32 %v2851_v35, %v2019_v54  ;;  %v2430_v42 = vld [vmem:[%s2549_s18 + $0x1f0] sm:$0xff]  }
  0x8e   : > { %2483 = vst [vmem:[%s2588_s25 + $0x1a0] sm:$0xff] %v2312_v56   ;;  %v2317_v2 = vpack.c.bf16 %v807_v57, %v806_v51  ;;  %v809_v3 = vmax.f32 %v681_v58, 0.0  ;;  %v683_v4 = vadd.f32 %v2860_v43, %v548_v59  ;;  %v2023_v5 = vunpack.c.l.bf16 %v2425_v55  ;;  %v2431_v51 = vld [vmem:[%s2549_s18 + $0x1f8] sm:$0xff]  }
  0x8f   : > { %v810_v6 = vmax.f32 %v682_v61, 0.0  ;;  %v550_v7 = vmul.f32 %v2851_v35, %v2020_v62  ;;  %v684_v8 = vadd.f32 %v2860_v43, %v549_v63  ;;  %v2024_v10 = vunpack.c.h.bf16 %v2425_v55 }
  0x90   : > { %2484 = vst [vmem:[%s2588_s25 + $0x1a8] sm:$0xff] %v2317_v2   ;;  %v2322_v12 = vpack.c.bf16 %v809_v3, %v808_v60  ;;  %v811_v13 = vmax.f32 %v683_v4, 0.0  ;;  %v551_v14 = vmul.f32 %v2851_v35, %v2023_v5  ;;  %v2027_v15 = vunpack.c.l.bf16 %v2426_v1 }
  0x91   : > { %v685_v16 = vadd.f32 %v2860_v43, %v550_v7  ;;  %v812_v17 = vmax.f32 %v684_v8, 0.0  ;;  %v552_v18 = vmul.f32 %v2851_v35, %v2024_v10  ;;  %v2028_v19 = vunpack.c.h.bf16 %v2426_v1 }
  0x92   : > { %2485 = vst [vmem:[%s2588_s25 + $0x1b0] sm:$0xff] %v2322_v12   ;;  %v2327_v21 = vpack.c.bf16 %v811_v13, %v810_v6  ;;  %v686_v22 = vadd.f32 %v2860_v43, %v551_v14  ;;  %v553_v23 = vmul.f32 %v2851_v35, %v2027_v15  ;;  %v2031_v24 = vunpack.c.l.bf16 %v2427_v11 }
  0x93   : > { %v813_v25 = vmax.f32 %v685_v16, 0.0  ;;  %v687_v26 = vadd.f32 %v2860_v43, %v552_v18  ;;  %v554_v27 = vmul.f32 %v2851_v35, %v2028_v19  ;;  %v2032_v28 = vunpack.c.h.bf16 %v2427_v11 }
  0x94   : > { %2486 = vst [vmem:[%s2588_s25 + $0x1b8] sm:$0xff] %v2327_v21   ;;  %v814_v29 = vmax.f32 %v686_v22, 0.0  ;;  %v688_v30 = vadd.f32 %v2860_v43, %v553_v23  ;;  %v555_v31 = vmul.f32 %v2851_v35, %v2031_v24  ;;  %v2035_v32 = vunpack.c.l.bf16 %v2428_v20 }
  0x95   : > { %v2332_v34 = vpack.c.bf16 %v813_v25, %v812_v17  ;;  %v815_v36 = vmax.f32 %v687_v26, 0.0  ;;  %v689_v37 = vadd.f32 %v2860_v43, %v554_v27  ;;  %v556_v38 = vmul.f32 %v2851_v35, %v2032_v28 }
  0x96   : > { %v816_v39 = vmax.f32 %v688_v30, 0.0  ;;  %v690_v40 = vadd.f32 %v2860_v43, %v555_v31  ;;  %v2036_v0 = vunpack.c.h.bf16 %v2428_v20  ;;  %v557_v41 = vmul.f32 %v2851_v35, %v2035_v32 }
  0x97   : > { %2487 = vst [vmem:[%s2588_s25 + $0x1c0] sm:$0xff] %v2332_v34   ;;  %v2337_v44 = vpack.c.bf16 %v815_v36, %v814_v29  ;;  %v817_v45 = vmax.f32 %v689_v37, 0.0  ;;  %v691_v46 = vadd.f32 %v2860_v43, %v556_v38  ;;  %v2039_v47 = vunpack.c.l.bf16 %v2429_v33 }
  0x98   : > { %v818_v48 = vmax.f32 %v690_v40, 0.0  ;;  %v558_v49 = vmul.f32 %v2851_v35, %v2036_v0  ;;  %v692_v9 = vadd.f32 %v2860_v43, %v557_v41  ;;  %v2040_v50 = vunpack.c.h.bf16 %v2429_v33 }
  0x99   : > { %2488 = vst [vmem:[%s2588_s25 + $0x1c8] sm:$0xff] %v2337_v44   ;;  %v2342_v52 = vpack.c.bf16 %v817_v45, %v816_v39  ;;  %v819_v53 = vmax.f32 %v691_v46, 0.0  ;;  %v559_v54 = vmul.f32 %v2851_v35, %v2039_v47  ;;  %v2043_v55 = vunpack.c.l.bf16 %v2430_v42 }
  0x9a   : > { %v693_v56 = vadd.f32 %v2860_v43, %v558_v49  ;;  %v820_v57 = vmax.f32 %v692_v9, 0.0  ;;  %v560_v58 = vmul.f32 %v2851_v35, %v2040_v50  ;;  %v2044_v59 = vunpack.c.h.bf16 %v2430_v42 }
  0x9b   : > { %2489 = vst [vmem:[%s2588_s25 + $0x1d0] sm:$0xff] %v2342_v52   ;;  %v2347_v60 = vpack.c.bf16 %v819_v53, %v818_v48  ;;  %v694_v61 = vadd.f32 %v2860_v43, %v559_v54  ;;  %v561_v62 = vmul.f32 %v2851_v35, %v2043_v55  ;;  %v2047_v63 = vunpack.c.l.bf16 %v2431_v51 }
  0x9c   : > { %v821_v1 = vmax.f32 %v693_v56, 0.0  ;;  %v695_v2 = vadd.f32 %v2860_v43, %v560_v58  ;;  %v562_v3 = vmul.f32 %v2851_v35, %v2044_v59  ;;  %v2048_v4 = vunpack.c.h.bf16 %v2431_v51 }
  0x9d   : > { %2490 = vst [vmem:[%s2588_s25 + $0x1d8] sm:$0xff] %v2347_v60   ;;  %v822_v5 = vmax.f32 %v694_v61, 0.0  ;;  %v696_v6 = vadd.f32 %v2860_v43, %v561_v62  ;;  %v563_v7 = vmul.f32 %v2851_v35, %v2047_v63 }
  0x9e   : > { %v2352_v8 = vpack.c.bf16 %v821_v1, %v820_v57  ;;  %v823_v10 = vmax.f32 %v695_v2, 0.0  ;;  %v697_v11 = vadd.f32 %v2860_v43, %v562_v3  ;;  %v564_v12 = vmul.f32 %v2851_v35, %v2048_v4 }
  0x9f   : > { %v824_v13 = vmax.f32 %v696_v6, 0.0  ;;  %v698_v14 = vadd.f32 %v2860_v43, %v563_v7 }
  0xa0   : > { %2491 = vst [vmem:[%s2588_s25 + $0x1e0] sm:$0xff] %v2352_v8   ;;  %v2357_v15 = vpack.c.bf16 %v823_v10, %v822_v5  ;;  %v825_v16 = vmax.f32 %v697_v11, 0.0  ;;  %v699_v17 = vadd.f32 %v2860_v43, %v564_v12 }
  0xa1   : > { %v826_v18 = vmax.f32 %v698_v14, 0.0 }
  0xa2   : > { %2492 = vst [vmem:[%s2588_s25 + $0x1e8] sm:$0xff] %v2357_v15   ;;  %v2362_v19 = vpack.c.bf16 %v825_v16, %v824_v13  ;;  %v827_v20 = vmax.f32 %v699_v17, 0.0 }
  0xa4   : > { %2493 = vst [vmem:[%s2588_s25 + $0x1f0] sm:$0xff] %v2362_v19   ;;  %v2367_v21 = vpack.c.bf16 %v827_v20, %v826_v18 }
  0xa6   : > { %2494 = vst [vmem:[%s2588_s25 + $0x1f8] sm:$0xff] %v2367_v21  }
  0xa7 PF: > { %s13_s12 = sadd.s32 1, %s2511_s12  }
  0xa8   : > { %p10_p4 = scmp.ge.s32.totalorder %s13_s12, 27  }
  0xaa   :  { %12 = sbr.rel (!%p10_p4) target bundleno = 1 (0x1), region = 62 }

</bundles_post_ra>
